<compile_context>
chip_gen: v7x
topology: tpu7x:2x2x1
jax: 0.10.0
libtpu: 0.0.40
codegen_flags: <defaults>
</compile_context>

<pallas_src>
import functools

import jax
import jax.numpy as jnp
from jax.experimental import pallas as pl
from jax.experimental.pallas import tpu as pltpu


# ----------------------------- kernel ---------------------------------------
def seres2net_kernel(
    x_ref,                                   # (TM, C_in)  bf16 (f32 if no shortcut)
    w1c_ref, b1_ref, s1_ref, t1_ref,         # tdnn1 (+ fused shortcut columns)
    b_sc_ref,                                # shortcut bias (dummy if unused)
    wr_ref, br_ref, sr_ref, tr_ref,          # res2net stacked blocks
    w2_ref, b2_ref, s2_ref, t2_ref,          # tdnn2
    wse1_ref, bse1_ref, wse2_ref, bse2_ref,  # SE block convs
    o_ref,                                   # (TM, C_out) f32
    y_scr,                                   # (TM, C_out) bf16 scratch (res2net concat)
    *, scale, hidden, tb, seq_len, has_shortcut, c_out,
):
    x = x_ref[...]
    xb = x.astype(jnp.bfloat16)

    # ---- tdnn1 (+ fused shortcut): one matmul over [w1 | w_sc] ----
    h01 = jnp.dot(xb, w1c_ref[...], preferred_element_type=jnp.float32)
    h1 = jnp.maximum(h01[:, :c_out] + b1_ref[...], 0.0) * s1_ref[...] + t1_ref[...]
    if has_shortcut:
        residual = h01[:, c_out:] + b_sc_ref[...]            # (TM, C_out) f32
    else:
        residual = x.astype(jnp.float32)

    # ---- Res2Net: write chunks into a bf16 scratch (lane offsets i*hidden) ----
    prev = None
    for i in range(scale):
        xi = h1[:, i * hidden:(i + 1) * hidden]              # lane-aligned slice
        if i == 0:
            yi = xi
        else:
            inp = xi if i == 1 else xi + prev
            yi = jnp.dot(inp.astype(jnp.bfloat16), wr_ref[i - 1],
                         preferred_element_type=jnp.float32) + br_ref[i - 1]
            yi = jnp.maximum(yi, 0.0) * sr_ref[i - 1] + tr_ref[i - 1]
        prev = yi
        y_scr[:, i * hidden:(i + 1) * hidden] = yi.astype(jnp.bfloat16)

    # ---- tdnn2: single K = C_out matmul (full MXU contraction depth) ----
    h2 = jnp.dot(y_scr[...], w2_ref[...], preferred_element_type=jnp.float32)
    h2 = jnp.maximum(h2 + b2_ref[...], 0.0) * s2_ref[...] + t2_ref[...]

    # ---- SE block (lengths=None): per-batch mean over time -> 1x1 -> relu -> 1x1 -> sigmoid ----
    hr = h2.reshape(tb, seq_len, c_out)                       # (TB, L, C_out)
    s = jnp.mean(hr, axis=1)                                  # (TB, C_out)
    s = jnp.dot(s.astype(jnp.bfloat16), wse1_ref[...],
                preferred_element_type=jnp.float32) + bse1_ref[...]
    s = jnp.maximum(s, 0.0)
    g = jax.nn.sigmoid(jnp.dot(s.astype(jnp.bfloat16), wse2_ref[...],
                               preferred_element_type=jnp.float32) + bse2_ref[...])
    h3 = (hr * g[:, None, :]).reshape(tb * seq_len, c_out)    # gated (TM, C_out)

    # ---- residual add ----
    o_ref[...] = (h3 + residual).astype(o_ref.dtype)


# ----------------------------- wrapper ---------------------------------------
def _pick_tb(B, L, max_rows=2048, min_grid_steps=4):
    """Largest batch-per-tile dividing B with TB*L <= max_rows, preferring at
    least `min_grid_steps` grid steps (>=2 per TensorCore on v7x) so BlockSpec
    pipelining can hide the x-tile DMA and output writeback."""
    candidates = [d for d in range(1, B + 1) if B % d == 0 and d * L <= max_rows]
    if not candidates:
        return 1
    pipelined = [d for d in candidates if B // d >= min_grid_steps]
    pool = pipelined if pipelined else candidates
    return max(pool)


def _const_spec(a):
    """Full-array block with a constant index map; single-buffered since the
    same weights are reused every grid step."""
    nd = a.ndim
    imap = lambda m, _nd=nd: (0,) * _nd
    buffered = getattr(pl, "Buffered", None)
    if buffered is not None:
        try:
            return pl.BlockSpec(a.shape, imap, pipeline_mode=buffered(1))
        except TypeError:
            pass
    return pl.BlockSpec(a.shape, imap)


def seres2net_block(x_ncl, params, *, scale, max_rows_per_tile=2048,
                    min_grid_steps=4):
    """x_ncl: (B, C_in, L) float32, PyTorch NCL layout. Returns (B, C_out, L) f32."""
    B, C_in, L = x_ncl.shape
    C_out = params["w1"].shape[1]
    assert C_out % scale == 0 and scale >= 2
    hidden = C_out // scale
    has_shortcut = C_in != C_out            # matches PyTorch: shortcut only if shapes differ

    tb = _pick_tb(B, L, max_rows_per_tile, min_grid_steps)
    TM = tb * L
    M = B * L
    assert TM % 16 == 0, "tile rows must be 16-aligned (bf16 sublane packing)"

    # channels-last, (B*L, C) flattened so matmuls see M = TB*L rows per step
    x = jnp.transpose(x_ncl, (0, 2, 1)).reshape(M, C_in)
    x_in = x.astype(jnp.bfloat16) if has_shortcut else x.astype(jnp.float32)

    bf, f32 = jnp.bfloat16, jnp.float32

    def row(v):                              # 1-D param -> (1, C): lands on the lane axis
        return v.reshape(1, -1).astype(f32)

    # Fuse shortcut weight into tdnn1's weight (one matmul over xb).
    if has_shortcut:
        w1c = jnp.concatenate([params["w1"], params["w_sc"]], axis=1).astype(bf)
        b_sc = row(params["b_sc"])
    else:
        w1c = params["w1"].astype(bf)
        b_sc = jnp.zeros((1, 1), f32)                          # unused dummy

    ordered = [
        w1c, row(params["b1"]), row(params["s1"]), row(params["t1"]),
        b_sc,
        params["wr"].astype(bf),
        params["br"].reshape(scale - 1, 1, hidden).astype(f32),
        params["sr"].reshape(scale - 1, 1, hidden).astype(f32),
        params["tr"].reshape(scale - 1, 1, hidden).astype(f32),
        params["w2"].astype(bf),                               # (C_out, C_out), single matmul
        row(params["b2"]), row(params["s2"]), row(params["t2"]),
        params["wse1"].astype(bf), row(params["bse1"]),
        params["wse2"].astype(bf), row(params["bse2"]),
    ]

    in_specs = [pl.BlockSpec((TM, C_in), lambda m: (m, 0))]
    in_specs += [_const_spec(a) for a in ordered]

    se_ch = params["wse1"].shape[1]
    flops = 2 * M * (C_in * C_out * (2 if has_shortcut else 1)
                     + (scale - 1) * hidden * hidden
                     + C_out * C_out)
    flops += 2 * B * 2 * C_out * se_ch
    param_bytes = sum(int(a.size) * a.dtype.itemsize for a in ordered)
    bytes_accessed = (int(x_in.size) * x_in.dtype.itemsize
                      + M * C_out * 4
                      + param_bytes)
    cost = pl.CostEstimate(flops=int(flops), transcendentals=int(B * C_out),
                           bytes_accessed=int(bytes_accessed))

    # VMEM budget: live f32 slabs (h01, h1, h2, h3, residual, temp) + bf16
    # scratch + double-buffered x/out tiles + single-buffered weights, x1.5.
    w1c_cols = w1c.shape[1]
    vmem_est = (TM * C_out * 4 * 5
                + TM * w1c_cols * 4
                + TM * C_out * 2
                + 2 * (TM * C_in * x_in.dtype.itemsize + TM * C_out * 4)
                + param_bytes)
    vmem_limit = int(min(max(int(vmem_est * 1.5), 32 << 20), 64 << 20))

    out = pl.pallas_call(
        functools.partial(seres2net_kernel, scale=scale, hidden=hidden,
                          tb=tb, seq_len=L, has_shortcut=has_shortcut,
                          c_out=C_out),
        out_shape=jax.ShapeDtypeStruct((M, C_out), jnp.float32),
        grid=(M // TM,),
        in_specs=in_specs,
        out_specs=pl.BlockSpec((TM, C_out), lambda m: (m, 0)),
        scratch_shapes=[pltpu.VMEM((TM, C_out), jnp.bfloat16)],
        compiler_params=pltpu.CompilerParams(
            dimension_semantics=("parallel",),
            vmem_limit_bytes=vmem_limit),
        cost_estimate=cost,
    )(x_in, *ordered)

    return jnp.transpose(out.reshape(B, L, C_out), (0, 2, 1))        # back to (B, C_out, L)


# ---------------- parameter construction (deterministic, synthetic) ----------------
def fold_bn(gamma, beta, mean, var, eps=1e-5):
    s = gamma / jnp.sqrt(var + eps)
    t = beta - mean * s
    return s, t


def make_params(key, C_in, C_out, scale, se_ch):
    hidden = C_out // scale
    keys = jax.random.split(key, 32)
    k = iter(keys)

    def w(shape, sc=0.1):
        return jax.random.normal(next(k), shape, jnp.float32) * sc

    def bn(n):
        gamma = jax.random.uniform(next(k), (n,), jnp.float32, 0.5, 1.5)
        beta = jax.random.normal(next(k), (n,), jnp.float32) * 0.05
        mean = jax.random.normal(next(k), (n,), jnp.float32) * 0.05
        var = jax.random.uniform(next(k), (n,), jnp.float32, 0.5, 1.5)
        return fold_bn(gamma, beta, mean, var)

    p = {}
    p["w_sc"], p["b_sc"] = w((C_in, C_out)), w((C_out,), 0.05)       # shortcut 1x1
    p["w1"], p["b1"] = w((C_in, C_out)), w((C_out,), 0.05)           # tdnn1
    p["s1"], p["t1"] = bn(C_out)
    p["wr"] = w((scale - 1, hidden, hidden))                          # res2net blocks
    p["br"] = w((scale - 1, hidden), 0.05)
    sr, tr = [], []
    for _ in range(scale - 1):
        s_, t_ = bn(hidden)
        sr.append(s_); tr.append(t_)
    p["sr"], p["tr"] = jnp.stack(sr), jnp.stack(tr)
    p["w2"], p["b2"] = w((C_out, C_out)), w((C_out,), 0.05)           # tdnn2
    p["s2"], p["t2"] = bn(C_out)
    p["wse1"], p["bse1"] = w((C_out, se_ch)), w((se_ch,), 0.05)       # SE block
    p["wse2"], p["bse2"] = w((se_ch, C_out)), w((C_out,), 0.05)
    return p


# ---------------- pure-JAX reference (same bf16-matmul math, for verification) ----------------
def _mm(a, w):
    return jnp.dot(a.astype(jnp.bfloat16), w.astype(jnp.bfloat16),
                   preferred_element_type=jnp.float32)


def reference(x_ncl, p, *, scale):
    x = jnp.transpose(x_ncl, (0, 2, 1))                              # (B, L, C_in)
    C_in = x.shape[-1]
    C_out = p["w1"].shape[1]
    hidden = C_out // scale
    has_shortcut = C_in != C_out

    def per_batch(xb):
        residual = _mm(xb, p["w_sc"]) + p["b_sc"] if has_shortcut else xb
        h = jnp.maximum(_mm(xb, p["w1"]) + p["b1"], 0.0) * p["s1"] + p["t1"]
        ys, prev = [], None
        for i in range(scale):
            xi = h[:, i * hidden:(i + 1) * hidden]
            if i == 0:
                yi = xi
            else:
                inp = xi if i == 1 else xi + prev
                yi = (jnp.maximum(_mm(inp, p["wr"][i - 1]) + p["br"][i - 1], 0.0)
                      * p["sr"][i - 1] + p["tr"][i - 1])
            ys.append(yi); prev = yi
        h = jnp.concatenate(ys, axis=-1)
        h = jnp.maximum(_mm(h, p["w2"]) + p["b2"], 0.0) * p["s2"] + p["t2"]
        s = jnp.mean(h, axis=0, keepdims=True)
        s = jnp.maximum(_mm(s, p["wse1"]) + p["bse1"], 0.0)
        s = jax.nn.sigmoid(_mm(s, p["wse2"]) + p["bse2"])
        return h * s + residual

    out = jax.vmap(per_batch)(x)
    return jnp.transpose(out, (0, 2, 1))


if __name__ == "__main__":
    # Small but TPU-friendly shapes: channels are multiples of 128 so every
    # matmul / res2net chunk slice / output store is lane-dense.
    B, C_in, C_out, L = 8, 256, 512, 64
    scale, se_ch = 4, 128                     # hidden = 128

    key = jax.random.PRNGKey(0)
    kx, kp = jax.random.split(key)
    x = jax.random.normal(kx, (B, C_in, L), jnp.float32)              # PyTorch NCL input
    params = make_params(kp, C_in, C_out, scale, se_ch)

    run = jax.jit(functools.partial(seres2net_block, scale=scale))
    out = jax.block_until_ready(run(x, params))

    ref = reference(x, params, scale=scale)
    assert out.shape == (B, C_out, L)
    assert jnp.allclose(out, ref, atol=5e-2, rtol=5e-2), "mismatch vs reference"

    print("KERNEL_OK")
</pallas_src>

<mosaic_0001>
module attributes {stable_mosaic.version = 11 : i64} {
  func.func @seres2net_kernel(%arg0: i32, %arg1: memref<128x256xbf16, #tpu.memory_space<vmem>>, %arg2: memref<256x1024xbf16, #tpu.memory_space<vmem>>, %arg3: memref<1x512xf32, #tpu.memory_space<vmem>>, %arg4: memref<1x512xf32, #tpu.memory_space<vmem>>, %arg5: memref<1x512xf32, #tpu.memory_space<vmem>>, %arg6: memref<1x512xf32, #tpu.memory_space<vmem>>, %arg7: memref<3x128x128xbf16, #tpu.memory_space<vmem>>, %arg8: memref<3x1x128xf32, #tpu.memory_space<vmem>>, %arg9: memref<3x1x128xf32, #tpu.memory_space<vmem>>, %arg10: memref<3x1x128xf32, #tpu.memory_space<vmem>>, %arg11: memref<512x512xbf16, #tpu.memory_space<vmem>>, %arg12: memref<1x512xf32, #tpu.memory_space<vmem>>, %arg13: memref<1x512xf32, #tpu.memory_space<vmem>>, %arg14: memref<1x512xf32, #tpu.memory_space<vmem>>, %arg15: memref<512x128xbf16, #tpu.memory_space<vmem>>, %arg16: memref<1x128xf32, #tpu.memory_space<vmem>>, %arg17: memref<128x512xbf16, #tpu.memory_space<vmem>>, %arg18: memref<1x512xf32, #tpu.memory_space<vmem>>, %arg19: memref<128x512xf32, #tpu.memory_space<vmem>>, %arg20: memref<128x512xbf16, #tpu.memory_space<vmem>>) attributes {dimension_semantics = [#tpu.dimension_semantics<parallel>], iteration_bounds = array<i64: 4>, scalar_prefetch = 0 : i64, scratch_operands = 1 : i64, tpu.core_type = #tpu.core_type<tc>, window_params = [{transform_indices = @transform_0, window_bounds = array<i64: 128, 256>}, {pipeline_mode = #tpu.pipeline_mode<synchronous>, transform_indices = @transform_1, window_bounds = array<i64: 256, 1024>}, {pipeline_mode = #tpu.pipeline_mode<synchronous>, transform_indices = @transform_2, window_bounds = array<i64: 1, 512>}, {pipeline_mode = #tpu.pipeline_mode<synchronous>, transform_indices = @transform_3, window_bounds = array<i64: 1, 512>}, {pipeline_mode = #tpu.pipeline_mode<synchronous>, transform_indices = @transform_4, window_bounds = array<i64: 1, 512>}, {pipeline_mode = #tpu.pipeline_mode<synchronous>, transform_indices = @transform_5, window_bounds = array<i64: 1, 512>}, {pipeline_mode = #tpu.pipeline_mode<synchronous>, transform_indices = @transform_6, window_bounds = array<i64: 3, 128, 128>}, {pipeline_mode = #tpu.pipeline_mode<synchronous>, transform_indices = @transform_7, window_bounds = array<i64: 3, 1, 128>}, {pipeline_mode = #tpu.pipeline_mode<synchronous>, transform_indices = @transform_8, window_bounds = array<i64: 3, 1, 128>}, {pipeline_mode = #tpu.pipeline_mode<synchronous>, transform_indices = @transform_9, window_bounds = array<i64: 3, 1, 128>}, {pipeline_mode = #tpu.pipeline_mode<synchronous>, transform_indices = @transform_10, window_bounds = array<i64: 512, 512>}, {pipeline_mode = #tpu.pipeline_mode<synchronous>, transform_indices = @transform_11, window_bounds = array<i64: 1, 512>}, {pipeline_mode = #tpu.pipeline_mode<synchronous>, transform_indices = @transform_12, window_bounds = array<i64: 1, 512>}, {pipeline_mode = #tpu.pipeline_mode<synchronous>, transform_indices = @transform_13, window_bounds = array<i64: 1, 512>}, {pipeline_mode = #tpu.pipeline_mode<synchronous>, transform_indices = @transform_14, window_bounds = array<i64: 512, 128>}, {pipeline_mode = #tpu.pipeline_mode<synchronous>, transform_indices = @transform_15, window_bounds = array<i64: 1, 128>}, {pipeline_mode = #tpu.pipeline_mode<synchronous>, transform_indices = @transform_16, window_bounds = array<i64: 128, 512>}, {pipeline_mode = #tpu.pipeline_mode<synchronous>, transform_indices = @transform_17, window_bounds = array<i64: 1, 512>}, {transform_indices = @transform_18, window_bounds = array<i64: 128, 512>}]} {
    %c0 = arith.constant 0 : index
    %c0_0 = arith.constant 0 : index
    %0 = vector.load %arg1[%c0, %c0_0] : memref<128x256xbf16, #tpu.memory_space<vmem>>, vector<128x256xbf16>
    %c0_1 = arith.constant 0 : index
    %c0_2 = arith.constant 0 : index
    %1 = vector.load %arg2[%c0_1, %c0_2] : memref<256x1024xbf16, #tpu.memory_space<vmem>>, vector<256x1024xbf16>
    %cst = arith.constant dense<0.000000e+00> : vector<128x1024xf32>
    %2 = tpu.matmul %0, %1, %cst {dimension_numbers = #tpu.dot_dimension_numbers<[1], [0], [0], [1], [0, 0, 1, 1], [], []>} : vector<128x256xbf16>, vector<256x1024xbf16>, vector<128x1024xf32> -> vector<128x1024xf32>
    %3 = vector.extract_strided_slice %2 {offsets = [0, 0], sizes = [128, 512], strides = [1, 1]} : vector<128x1024xf32> to vector<128x512xf32>
    %c0_3 = arith.constant 0 : index
    %c0_4 = arith.constant 0 : index
    %4 = vector.load %arg3[%c0_3, %c0_4] : memref<1x512xf32, #tpu.memory_space<vmem>>, vector<1x512xf32>
    %5 = vector.broadcast %4 : vector<1x512xf32> to vector<128x512xf32>
    %6 = arith.addf %3, %5 : vector<128x512xf32>
    %cst_5 = arith.constant 0.000000e+00 : f32
    %7 = vector.broadcast %cst_5 : f32 to vector<128x512xf32>
    %8 = arith.maximumf %6, %7 : vector<128x512xf32>
    %c0_6 = arith.constant 0 : index
    %c0_7 = arith.constant 0 : index
    %9 = vector.load %arg4[%c0_6, %c0_7] : memref<1x512xf32, #tpu.memory_space<vmem>>, vector<1x512xf32>
    %10 = vector.broadcast %9 : vector<1x512xf32> to vector<128x512xf32>
    %11 = arith.mulf %8, %10 : vector<128x512xf32>
    %c0_8 = arith.constant 0 : index
    %c0_9 = arith.constant 0 : index
    %12 = vector.load %arg5[%c0_8, %c0_9] : memref<1x512xf32, #tpu.memory_space<vmem>>, vector<1x512xf32>
    %13 = vector.broadcast %12 : vector<1x512xf32> to vector<128x512xf32>
    %14 = arith.addf %11, %13 : vector<128x512xf32>
    %15 = vector.extract_strided_slice %2 {offsets = [0, 512], sizes = [128, 512], strides = [1, 1]} : vector<128x1024xf32> to vector<128x512xf32>
    %c0_10 = arith.constant 0 : index
    %c0_11 = arith.constant 0 : index
    %16 = vector.load %arg6[%c0_10, %c0_11] : memref<1x512xf32, #tpu.memory_space<vmem>>, vector<1x512xf32>
    %17 = vector.broadcast %16 : vector<1x512xf32> to vector<128x512xf32>
    %18 = arith.addf %15, %17 : vector<128x512xf32>
    %19 = vector.extract_strided_slice %14 {offsets = [0, 0], sizes = [128, 128], strides = [1, 1]} : vector<128x512xf32> to vector<128x128xf32>
    %20 = arith.truncf %19 : vector<128x128xf32> to vector<128x128xbf16>
    %c0_12 = arith.constant 0 : index
    %c0_13 = arith.constant 0 : index
    %21 = vector.load %arg20[%c0_12, %c0_13] : memref<128x512xbf16, #tpu.memory_space<vmem>>, vector<128x128xbf16>
    tpu.vector_store %arg20[%c0_12, %c0_13], %20 {strides = array<i32>} : memref<128x512xbf16, #tpu.memory_space<vmem>>, vector<128x128xbf16>,
    %22 = vector.extract_strided_slice %14 {offsets = [0, 128], sizes = [128, 128], strides = [1, 1]} : vector<128x512xf32> to vector<128x128xf32>
    %23 = arith.truncf %22 : vector<128x128xf32> to vector<128x128xbf16>
    %c0_14 = arith.constant 0 : index
    %c0_15 = arith.constant 0 : index
    %c0_16 = arith.constant 0 : index
    %24 = vector.load %arg7[%c0_14, %c0_15, %c0_16] : memref<3x128x128xbf16, #tpu.memory_space<vmem>>, vector<1x128x128xbf16>
    %25 = vector.shape_cast %24 : vector<1x128x128xbf16> to vector<128x128xbf16>
    %cst_17 = arith.constant dense<0.000000e+00> : vector<128x128xf32>
    %26 = tpu.matmul %23, %25, %cst_17 {dimension_numbers = #tpu.dot_dimension_numbers<[1], [0], [0], [1], [0, 0, 1, 1], [], []>} : vector<128x128xbf16>, vector<128x128xbf16>, vector<128x128xf32> -> vector<128x128xf32>
    %c0_18 = arith.constant 0 : index
    %c0_19 = arith.constant 0 : index
    %c0_20 = arith.constant 0 : index
    %27 = vector.load %arg8[%c0_18, %c0_19, %c0_20] : memref<3x1x128xf32, #tpu.memory_space<vmem>>, vector<1x1x128xf32>
    %28 = vector.shape_cast %27 : vector<1x1x128xf32> to vector<1x128xf32>
    %29 = vector.broadcast %28 : vector<1x128xf32> to vector<128x128xf32>
    %30 = arith.addf %26, %29 : vector<128x128xf32>
    %cst_21 = arith.constant 0.000000e+00 : f32
    %31 = vector.broadcast %cst_21 : f32 to vector<128x128xf32>
    %32 = arith.maximumf %30, %31 : vector<128x128xf32>
    %c0_22 = arith.constant 0 : index
    %c0_23 = arith.constant 0 : index
    %c0_24 = arith.constant 0 : index
    %33 = vector.load %arg9[%c0_22, %c0_23, %c0_24] : memref<3x1x128xf32, #tpu.memory_space<vmem>>, vector<1x1x128xf32>
    %34 = vector.shape_cast %33 : vector<1x1x128xf32> to vector<1x128xf32>
    %35 = vector.broadcast %34 : vector<1x128xf32> to vector<128x128xf32>
    %36 = arith.mulf %32, %35 : vector<128x128xf32>
    %c0_25 = arith.constant 0 : index
    %c0_26 = arith.constant 0 : index
    %c0_27 = arith.constant 0 : index
    %37 = vector.load %arg10[%c0_25, %c0_26, %c0_27] : memref<3x1x128xf32, #tpu.memory_space<vmem>>, vector<1x1x128xf32>
    %38 = vector.shape_cast %37 : vector<1x1x128xf32> to vector<1x128xf32>
    %39 = vector.broadcast %38 : vector<1x128xf32> to vector<128x128xf32>
    %40 = arith.addf %36, %39 : vector<128x128xf32>
    %41 = arith.truncf %40 : vector<128x128xf32> to vector<128x128xbf16>
    %c0_28 = arith.constant 0 : index
    %c128 = arith.constant 128 : index
    %42 = vector.load %arg20[%c0_28, %c128] : memref<128x512xbf16, #tpu.memory_space<vmem>>, vector<128x128xbf16>
    tpu.vector_store %arg20[%c0_28, %c128], %41 {strides = array<i32>} : memref<128x512xbf16, #tpu.memory_space<vmem>>, vector<128x128xbf16>,
    %43 = vector.extract_strided_slice %14 {offsets = [0, 256], sizes = [128, 128], strides = [1, 1]} : vector<128x512xf32> to vector<128x128xf32>
    %44 = arith.addf %43, %40 : vector<128x128xf32>
    %45 = arith.truncf %44 : vector<128x128xf32> to vector<128x128xbf16>
    %c1 = arith.constant 1 : index
    %c0_29 = arith.constant 0 : index
    %c0_30 = arith.constant 0 : index
    %46 = vector.load %arg7[%c1, %c0_29, %c0_30] : memref<3x128x128xbf16, #tpu.memory_space<vmem>>, vector<1x128x128xbf16>
    %47 = vector.shape_cast %46 : vector<1x128x128xbf16> to vector<128x128xbf16>
    %cst_31 = arith.constant dense<0.000000e+00> : vector<128x128xf32>
    %48 = tpu.matmul %45, %47, %cst_31 {dimension_numbers = #tpu.dot_dimension_numbers<[1], [0], [0], [1], [0, 0, 1, 1], [], []>} : vector<128x128xbf16>, vector<128x128xbf16>, vector<128x128xf32> -> vector<128x128xf32>
    %c1_32 = arith.constant 1 : index
    %c0_33 = arith.constant 0 : index
    %c0_34 = arith.constant 0 : index
    %49 = vector.load %arg8[%c1_32, %c0_33, %c0_34] : memref<3x1x128xf32, #tpu.memory_space<vmem>>, vector<1x1x128xf32>
    %50 = vector.shape_cast %49 : vector<1x1x128xf32> to vector<1x128xf32>
    %51 = vector.broadcast %50 : vector<1x128xf32> to vector<128x128xf32>
    %52 = arith.addf %48, %51 : vector<128x128xf32>
    %cst_35 = arith.constant 0.000000e+00 : f32
    %53 = vector.broadcast %cst_35 : f32 to vector<128x128xf32>
    %54 = arith.maximumf %52, %53 : vector<128x128xf32>
    %c1_36 = arith.constant 1 : index
    %c0_37 = arith.constant 0 : index
    %c0_38 = arith.constant 0 : index
    %55 = vector.load %arg9[%c1_36, %c0_37, %c0_38] : memref<3x1x128xf32, #tpu.memory_space<vmem>>, vector<1x1x128xf32>
    %56 = vector.shape_cast %55 : vector<1x1x128xf32> to vector<1x128xf32>
    %57 = vector.broadcast %56 : vector<1x128xf32> to vector<128x128xf32>
    %58 = arith.mulf %54, %57 : vector<128x128xf32>
    %c1_39 = arith.constant 1 : index
    %c0_40 = arith.constant 0 : index
    %c0_41 = arith.constant 0 : index
    %59 = vector.load %arg10[%c1_39, %c0_40, %c0_41] : memref<3x1x128xf32, #tpu.memory_space<vmem>>, vector<1x1x128xf32>
    %60 = vector.shape_cast %59 : vector<1x1x128xf32> to vector<1x128xf32>
    %61 = vector.broadcast %60 : vector<1x128xf32> to vector<128x128xf32>
    %62 = arith.addf %58, %61 : vector<128x128xf32>
    %63 = arith.truncf %62 : vector<128x128xf32> to vector<128x128xbf16>
    %c0_42 = arith.constant 0 : index
    %c256 = arith.constant 256 : index
    %64 = vector.load %arg20[%c0_42, %c256] : memref<128x512xbf16, #tpu.memory_space<vmem>>, vector<128x128xbf16>
    tpu.vector_store %arg20[%c0_42, %c256], %63 {strides = array<i32>} : memref<128x512xbf16, #tpu.memory_space<vmem>>, vector<128x128xbf16>,
    %65 = vector.extract_strided_slice %14 {offsets = [0, 384], sizes = [128, 128], strides = [1, 1]} : vector<128x512xf32> to vector<128x128xf32>
    %66 = arith.addf %65, %62 : vector<128x128xf32>
    %67 = arith.truncf %66 : vector<128x128xf32> to vector<128x128xbf16>
    %c2 = arith.constant 2 : index
    %c0_43 = arith.constant 0 : index
    %c0_44 = arith.constant 0 : index
    %68 = vector.load %arg7[%c2, %c0_43, %c0_44] : memref<3x128x128xbf16, #tpu.memory_space<vmem>>, vector<1x128x128xbf16>
    %69 = vector.shape_cast %68 : vector<1x128x128xbf16> to vector<128x128xbf16>
    %cst_45 = arith.constant dense<0.000000e+00> : vector<128x128xf32>
    %70 = tpu.matmul %67, %69, %cst_45 {dimension_numbers = #tpu.dot_dimension_numbers<[1], [0], [0], [1], [0, 0, 1, 1], [], []>} : vector<128x128xbf16>, vector<128x128xbf16>, vector<128x128xf32> -> vector<128x128xf32>
    %c2_46 = arith.constant 2 : index
    %c0_47 = arith.constant 0 : index
    %c0_48 = arith.constant 0 : index
    %71 = vector.load %arg8[%c2_46, %c0_47, %c0_48] : memref<3x1x128xf32, #tpu.memory_space<vmem>>, vector<1x1x128xf32>
    %72 = vector.shape_cast %71 : vector<1x1x128xf32> to vector<1x128xf32>
    %73 = vector.broadcast %72 : vector<1x128xf32> to vector<128x128xf32>
    %74 = arith.addf %70, %73 : vector<128x128xf32>
    %cst_49 = arith.constant 0.000000e+00 : f32
    %75 = vector.broadcast %cst_49 : f32 to vector<128x128xf32>
    %76 = arith.maximumf %74, %75 : vector<128x128xf32>
    %c2_50 = arith.constant 2 : index
    %c0_51 = arith.constant 0 : index
    %c0_52 = arith.constant 0 : index
    %77 = vector.load %arg9[%c2_50, %c0_51, %c0_52] : memref<3x1x128xf32, #tpu.memory_space<vmem>>, vector<1x1x128xf32>
    %78 = vector.shape_cast %77 : vector<1x1x128xf32> to vector<1x128xf32>
    %79 = vector.broadcast %78 : vector<1x128xf32> to vector<128x128xf32>
    %80 = arith.mulf %76, %79 : vector<128x128xf32>
    %c2_53 = arith.constant 2 : index
    %c0_54 = arith.constant 0 : index
    %c0_55 = arith.constant 0 : index
    %81 = vector.load %arg10[%c2_53, %c0_54, %c0_55] : memref<3x1x128xf32, #tpu.memory_space<vmem>>, vector<1x1x128xf32>
    %82 = vector.shape_cast %81 : vector<1x1x128xf32> to vector<1x128xf32>
    %83 = vector.broadcast %82 : vector<1x128xf32> to vector<128x128xf32>
    %84 = arith.addf %80, %83 : vector<128x128xf32>
    %85 = arith.truncf %84 : vector<128x128xf32> to vector<128x128xbf16>
    %c0_56 = arith.constant 0 : index
    %c384 = arith.constant 384 : index
    %86 = vector.load %arg20[%c0_56, %c384] : memref<128x512xbf16, #tpu.memory_space<vmem>>, vector<128x128xbf16>
    tpu.vector_store %arg20[%c0_56, %c384], %85 {strides = array<i32>} : memref<128x512xbf16, #tpu.memory_space<vmem>>, vector<128x128xbf16>,
    %c0_57 = arith.constant 0 : index
    %c0_58 = arith.constant 0 : index
    %87 = vector.load %arg20[%c0_57, %c0_58] : memref<128x512xbf16, #tpu.memory_space<vmem>>, vector<128x512xbf16>
    %c0_59 = arith.constant 0 : index
    %c0_60 = arith.constant 0 : index
    %88 = vector.load %arg11[%c0_59, %c0_60] : memref<512x512xbf16, #tpu.memory_space<vmem>>, vector<512x512xbf16>
    %cst_61 = arith.constant dense<0.000000e+00> : vector<128x512xf32>
    %89 = tpu.matmul %87, %88, %cst_61 {dimension_numbers = #tpu.dot_dimension_numbers<[1], [0], [0], [1], [0, 0, 1, 1], [], []>} : vector<128x512xbf16>, vector<512x512xbf16>, vector<128x512xf32> -> vector<128x512xf32>
    %c0_62 = arith.constant 0 : index
    %c0_63 = arith.constant 0 : index
    %90 = vector.load %arg12[%c0_62, %c0_63] : memref<1x512xf32, #tpu.memory_space<vmem>>, vector<1x512xf32>
    %91 = vector.broadcast %90 : vector<1x512xf32> to vector<128x512xf32>
    %92 = arith.addf %89, %91 : vector<128x512xf32>
    %cst_64 = arith.constant 0.000000e+00 : f32
    %93 = vector.broadcast %cst_64 : f32 to vector<128x512xf32>
    %94 = arith.maximumf %92, %93 : vector<128x512xf32>
    %c0_65 = arith.constant 0 : index
    %c0_66 = arith.constant 0 : index
    %95 = vector.load %arg13[%c0_65, %c0_66] : memref<1x512xf32, #tpu.memory_space<vmem>>, vector<1x512xf32>
    %96 = vector.broadcast %95 : vector<1x512xf32> to vector<128x512xf32>
    %97 = arith.mulf %94, %96 : vector<128x512xf32>
    %c0_67 = arith.constant 0 : index
    %c0_68 = arith.constant 0 : index
    %98 = vector.load %arg14[%c0_67, %c0_68] : memref<1x512xf32, #tpu.memory_space<vmem>>, vector<1x512xf32>
    %99 = vector.broadcast %98 : vector<1x512xf32> to vector<128x512xf32>
    %100 = arith.addf %97, %99 : vector<128x512xf32>
    %101 = vector.shape_cast %100 : vector<128x512xf32> to vector<2x64x512xf32>
    %cst_69 = arith.constant dense<0.000000e+00> : vector<2x512xf32>
    %102 = vector.multi_reduction <add>, %101, %cst_69 [1] : vector<2x64x512xf32> to vector<2x512xf32>
    %cst_70 = arith.constant 6.400000e+01 : f32
    %103 = vector.broadcast %cst_70 : f32 to vector<2x512xf32>
    %104 = arith.divf %102, %103 : vector<2x512xf32>
    %105 = arith.truncf %104 : vector<2x512xf32> to vector<2x512xbf16>
    %c0_71 = arith.constant 0 : index
    %c0_72 = arith.constant 0 : index
    %106 = vector.load %arg15[%c0_71, %c0_72] : memref<512x128xbf16, #tpu.memory_space<vmem>>, vector<512x128xbf16>
    %cst_73 = arith.constant dense<0.000000e+00> : vector<2x128xf32>
    %107 = tpu.matmul %105, %106, %cst_73 {dimension_numbers = #tpu.dot_dimension_numbers<[1], [0], [0], [1], [0, 0, 1, 1], [], []>} : vector<2x512xbf16>, vector<512x128xbf16>, vector<2x128xf32> -> vector<2x128xf32>
    %c0_74 = arith.constant 0 : index
    %c0_75 = arith.constant 0 : index
    %108 = vector.load %arg16[%c0_74, %c0_75] : memref<1x128xf32, #tpu.memory_space<vmem>>, vector<1x128xf32>
    %109 = vector.broadcast %108 : vector<1x128xf32> to vector<2x128xf32>
    %110 = arith.addf %107, %109 : vector<2x128xf32>
    %cst_76 = arith.constant 0.000000e+00 : f32
    %111 = vector.broadcast %cst_76 : f32 to vector<2x128xf32>
    %112 = arith.maximumf %110, %111 : vector<2x128xf32>
    %113 = arith.truncf %112 : vector<2x128xf32> to vector<2x128xbf16>
    %c0_77 = arith.constant 0 : index
    %c0_78 = arith.constant 0 : index
    %114 = vector.load %arg17[%c0_77, %c0_78] : memref<128x512xbf16, #tpu.memory_space<vmem>>, vector<128x512xbf16>
    %cst_79 = arith.constant dense<0.000000e+00> : vector<2x512xf32>
    %115 = tpu.matmul %113, %114, %cst_79 {dimension_numbers = #tpu.dot_dimension_numbers<[1], [0], [0], [1], [0, 0, 1, 1], [], []>} : vector<2x128xbf16>, vector<128x512xbf16>, vector<2x512xf32> -> vector<2x512xf32>
    %c0_80 = arith.constant 0 : index
    %c0_81 = arith.constant 0 : index
    %116 = vector.load %arg18[%c0_80, %c0_81] : memref<1x512xf32, #tpu.memory_space<vmem>>, vector<1x512xf32>
    %117 = vector.broadcast %116 : vector<1x512xf32> to vector<2x512xf32>
    %118 = arith.addf %115, %117 : vector<2x512xf32>
    %119 = arith.negf %118 : vector<2x512xf32>
    %120 = math.exp %119 : vector<2x512xf32>
    %cst_82 = arith.constant 1.000000e+00 : f32
    %121 = vector.broadcast %cst_82 : f32 to vector<2x512xf32>
    %122 = arith.addf %121, %120 : vector<2x512xf32>
    %123 = arith.divf %121, %122 : vector<2x512xf32>
    %124 = vector.shape_cast %123 : vector<2x512xf32> to vector<2x1x512xf32>
    %125 = vector.broadcast %124 : vector<2x1x512xf32> to vector<2x64x512xf32>
    %126 = arith.mulf %101, %125 : vector<2x64x512xf32>
    %127 = vector.shape_cast %126 : vector<2x64x512xf32> to vector<128x512xf32>
    %128 = arith.addf %127, %18 : vector<128x512xf32>
    %c0_83 = arith.constant 0 : index
    %c0_84 = arith.constant 0 : index
    %129 = vector.load %arg19[%c0_83, %c0_84] : memref<128x512xf32, #tpu.memory_space<vmem>>, vector<128x512xf32>
    tpu.vector_store %arg19[%c0_83, %c0_84], %128 {strides = array<i32>} : memref<128x512xf32, #tpu.memory_space<vmem>>, vector<128x512xf32>,
    return
  }
  func.func @transform_0(%arg0: i32) -> (i32, i32) {
    %c0_i32 = arith.constant 0 : i32
    %c0_i32_0 = arith.constant 0 : i32
    return %arg0, %c0_i32 : i32, i32
  }
  func.func @transform_1(%arg0: i32) -> (i32, i32) {
    %c0_i32 = arith.constant 0 : i32
    %c0_i32_0 = arith.constant 0 : i32
    %c0_i32_1 = arith.constant 0 : i32
    return %c0_i32, %c0_i32_0 : i32, i32
  }
  func.func @transform_2(%arg0: i32) -> (i32, i32) {
    %c0_i32 = arith.constant 0 : i32
    %c0_i32_0 = arith.constant 0 : i32
    %c0_i32_1 = arith.constant 0 : i32
    return %c0_i32, %c0_i32_0 : i32, i32
  }
  func.func @transform_3(%arg0: i32) -> (i32, i32) {
    %c0_i32 = arith.constant 0 : i32
    %c0_i32_0 = arith.constant 0 : i32
    %c0_i32_1 = arith.constant 0 : i32
    return %c0_i32, %c0_i32_0 : i32, i32
  }
  func.func @transform_4(%arg0: i32) -> (i32, i32) {
    %c0_i32 = arith.constant 0 : i32
    %c0_i32_0 = arith.constant 0 : i32
    %c0_i32_1 = arith.constant 0 : i32
    return %c0_i32, %c0_i32_0 : i32, i32
  }
  func.func @transform_5(%arg0: i32) -> (i32, i32) {
    %c0_i32 = arith.constant 0 : i32
    %c0_i32_0 = arith.constant 0 : i32
    %c0_i32_1 = arith.constant 0 : i32
    return %c0_i32, %c0_i32_0 : i32, i32
  }
  func.func @transform_6(%arg0: i32) -> (i32, i32, i32) {
    %c0_i32 = arith.constant 0 : i32
    %c0_i32_0 = arith.constant 0 : i32
    %c0_i32_1 = arith.constant 0 : i32
    %c0_i32_2 = arith.constant 0 : i32
    return %c0_i32, %c0_i32_0, %c0_i32_1 : i32, i32, i32
  }
  func.func @transform_7(%arg0: i32) -> (i32, i32, i32) {
    %c0_i32 = arith.constant 0 : i32
    %c0_i32_0 = arith.constant 0 : i32
    %c0_i32_1 = arith.constant 0 : i32
    %c0_i32_2 = arith.constant 0 : i32
    return %c0_i32, %c0_i32_0, %c0_i32_1 : i32, i32, i32
  }
  func.func @transform_8(%arg0: i32) -> (i32, i32, i32) {
    %c0_i32 = arith.constant 0 : i32
    %c0_i32_0 = arith.constant 0 : i32
    %c0_i32_1 = arith.constant 0 : i32
    %c0_i32_2 = arith.constant 0 : i32
    return %c0_i32, %c0_i32_0, %c0_i32_1 : i32, i32, i32
  }
  func.func @transform_9(%arg0: i32) -> (i32, i32, i32) {
    %c0_i32 = arith.constant 0 : i32
    %c0_i32_0 = arith.constant 0 : i32
    %c0_i32_1 = arith.constant 0 : i32
    %c0_i32_2 = arith.constant 0 : i32
    return %c0_i32, %c0_i32_0, %c0_i32_1 : i32, i32, i32
  }
  func.func @transform_10(%arg0: i32) -> (i32, i32) {
    %c0_i32 = arith.constant 0 : i32
    %c0_i32_0 = arith.constant 0 : i32
    %c0_i32_1 = arith.constant 0 : i32
    return %c0_i32, %c0_i32_0 : i32, i32
  }
  func.func @transform_11(%arg0: i32) -> (i32, i32) {
    %c0_i32 = arith.constant 0 : i32
    %c0_i32_0 = arith.constant 0 : i32
    %c0_i32_1 = arith.constant 0 : i32
    return %c0_i32, %c0_i32_0 : i32, i32
  }
  func.func @transform_12(%arg0: i32) -> (i32, i32) {
    %c0_i32 = arith.constant 0 : i32
    %c0_i32_0 = arith.constant 0 : i32
    %c0_i32_1 = arith.constant 0 : i32
    return %c0_i32, %c0_i32_0 : i32, i32
  }
  func.func @transform_13(%arg0: i32) -> (i32, i32) {
    %c0_i32 = arith.constant 0 : i32
    %c0_i32_0 = arith.constant 0 : i32
    %c0_i32_1 = arith.constant 0 : i32
    return %c0_i32, %c0_i32_0 : i32, i32
  }
  func.func @transform_14(%arg0: i32) -> (i32, i32) {
    %c0_i32 = arith.constant 0 : i32
    %c0_i32_0 = arith.constant 0 : i32
    %c0_i32_1 = arith.constant 0 : i32
    return %c0_i32, %c0_i32_0 : i32, i32
  }
  func.func @transform_15(%arg0: i32) -> (i32, i32) {
    %c0_i32 = arith.constant 0 : i32
    %c0_i32_0 = arith.constant 0 : i32
    %c0_i32_1 = arith.constant 0 : i32
    return %c0_i32, %c0_i32_0 : i32, i32
  }
  func.func @transform_16(%arg0: i32) -> (i32, i32) {
    %c0_i32 = arith.constant 0 : i32
    %c0_i32_0 = arith.constant 0 : i32
    %c0_i32_1 = arith.constant 0 : i32
    return %c0_i32, %c0_i32_0 : i32, i32
  }
  func.func @transform_17(%arg0: i32) -> (i32, i32) {
    %c0_i32 = arith.constant 0 : i32
    %c0_i32_0 = arith.constant 0 : i32
    %c0_i32_1 = arith.constant 0 : i32
    return %c0_i32, %c0_i32_0 : i32, i32
  }
  func.func @transform_18(%arg0: i32) -> (i32, i32) {
    %c0_i32 = arith.constant 0 : i32
    %c0_i32_0 = arith.constant 0 : i32
    return %arg0, %c0_i32 : i32, i32
  }
}

</mosaic_0001>

<bundles_post_ra>
// kernel: seres2net_block.1
= control target key start
LH: loop header
LB: loop body
LE: loop exit
PB: predicated region body
PF: predicated region fallthrough
CT: control target
= control target key end

     0   :  { %s10280_s0 = inlined_call_operand.vmem [shape: bf16[512,256], index: 0, kind: input, shape index: {}]   ;;  %s10281_s1 = inlined_call_operand.vmem [shape: bf16[256,1024], index: 1, kind: input, shape index: {}]   ;;  %s10282_s2 = inlined_call_operand.vmem [shape: f32[1,512], index: 2, kind: input, shape index: {}]   ;;  %s10283_s3 = inlined_call_operand.vmem [shape: f32[1,512], index: 3, kind: input, shape index: {}]   ;;  %s10284_s4 = inlined_call_operand.vmem [shape: f32[1,512], index: 4, kind: input, shape index: {}]   ;;  %s10285_s5 = inlined_call_operand.vmem [shape: f32[1,512], index: 5, kind: input, shape index: {}]   ;;  %s10286_s6 = inlined_call_operand.vmem [shape: bf16[3,128,128], index: 6, kind: input, shape index: {}]   ;;  %s10287_s7 = inlined_call_operand.vmem [shape: f32[3,1,128], index: 7, kind: input, shape index: {}]   ;;  %s10288_s8 = inlined_call_operand.vmem [shape: f32[3,1,128], index: 8, kind: input, shape index: {}]   ;;  %s10289_s9 = inlined_call_operand.vmem [shape: f32[3,1,128], index: 9, kind: input, shape index: {}]   ;;  %s10290_s10 = inlined_call_operand.vmem [shape: bf16[512,512], index: 10, kind: input, shape index: {}]   ;;  %s10291_s11 = inlined_call_operand.vmem [shape: f32[1,512], index: 11, kind: input, shape index: {}]   ;;  %s10292_s12 = inlined_call_operand.vmem [shape: f32[1,512], index: 12, kind: input, shape index: {}]   ;;  %s10293_s13 = inlined_call_operand.vmem [shape: f32[1,512], index: 13, kind: input, shape index: {}]   ;;  %s10294_s14 = inlined_call_operand.vmem [shape: bf16[512,128], index: 14, kind: input, shape index: {}]   ;;  %s10295_s15 = inlined_call_operand.vmem [shape: f32[1,128], index: 15, kind: input, shape index: {}]   ;;  %s10296_s16 = inlined_call_operand.vmem [shape: bf16[128,512], index: 16, kind: input, shape index: {}]   ;;  %s10297_s17 = inlined_call_operand.vmem [shape: f32[1,512], index: 17, kind: input, shape index: {}]   ;;  %s10298_s18 = inlined_call_operand.hbm [shape: f32[512,512], index: 18, kind: output, shape index: {}]  }
   0x1   :  { %10357 = sst [smem:[#allocation117_spill]] %s10280_s0 }
   0x2   :  { %10358 = sst [smem:[#allocation118_spill]] %s10281_s1 }
   0x3   :  { %10359 = sst [smem:[#allocation119_spill]] %s10282_s2 }
   0x4   :  { %10360 = sst [smem:[#allocation120_spill]] %s10283_s3 }
   0x5   :  { %23 = vsyncpa [#allocation4], 0 }
   0x6   :  { %25 = vsyncpa [#allocation4 + $0x1], 0  ;;  %s7093_s27 = smov 0   ;;  %s7095_s28 = smov 0  }
   0x7   :  { %s7097_s29 = smov 0   ;;  %s7099_s30 = smov 0  }
   0x8 LB: > { %10361 = sst [smem:[#allocation6_spill]] %s6979_s27  ;;  %s7114_s0 = sadd.s32 4294967295, %s6991_s30   ;;  %s6991_s30 = sphi %s7099_s30, %s10744_s30   ;;  %s6987_s29 = sphi %s7097_s29, %s10746_s29   ;;  %s6983_s28 = sphi %s7095_s28, %s10748_s28   ;;  %s6979_s27 = sphi %s7093_s27, %s10747_s27  }
   0x9   : > { %10362 = sst [smem:[#allocation7_spill]] %s6987_s29  ;;  %s5793_s19 = sadd.s32 4294967294, %s6991_s30  }
   0xa   : > { %10363 = sst [smem:[#allocation8_spill]] %s6991_s30  ;;  %s7118_s1 = sadd.s32 1, %s6991_s30  }
   0xb   : > { %10364 = sst [smem:[#allocation9_spill]] %s7118_s1  ;;  %s421_s20 = sadd.s32 1, %s6987_s29 }
   0xc   : > { %s418_s21 = ssub.s32 %s6991_s30, %s7118_s1  ;;  %p431_p0 = scmp.ne.s32.totalorder %s6987_s29, %s6983_s28 }
   0xd   : > { %p419_p1 = scmp.eq.s32.totalorder %s418_s21, 0  ;;  %p432_p2 = scmp.eq.s32.totalorder %s7114_s0, 3 }
   0xe   : > { %p437_p3 = scmp.ne.s32.totalorder %s6983_s28, %s6979_s27  ;;  %p438_p4 = scmp.eq.s32.totalorder %s5793_s19, 3 }
   0xf   : > { %s7129_s22 = scalar_select %p419_p1, %s6987_s29, %s421_s20  }
  0x10   : > { %p7131_p5 = por %p432_p2, %p431_p0  ;;  %p7135_p6 = por %p438_p4, %p437_p3 }
  0x11   : > { %10365 = sst [smem:[#allocation10_spill]] %s7129_s22  ;;  %p5796_p7 = scmp.ge.s32.totalorder %s6991_s30, 1 }
  0x12   : > { %s10367_s23 = scalar_select %p7135_p6, 1, 0 }
  0x13   : > { %p517_p8 = scmp.lt.s32.totalorder %s6991_s30, 5 }
  0x14   : > { %10368 = sst [smem:[#allocation11_spill]] %s10367_s23 }
  0x15   : > { %p518_p9 = pnand %p5796_p7, %p517_p8 }
  0x17   : > { %521 = sbr.rel (%p518_p9) target bundleno = 1889 (0x761), region = 92 }
  0x1e   : > { %s10369_s26 = sld [smem:[#allocation118_spill]]  ;;  %s5798_s29 = sshll.u32 %s7114_s0, 4  ;;  %vm4841_vm0 = vcmask 1041409  }
  0x1f   : > { %p573_p10 = scmp.lt.s32.totalorder %s5798_s29, 63  ;;  %s10370_s25 = sld [smem:[#allocation117_spill]] }
  0x20   : > { %s10372_s23 = sld [smem:[#allocation119_spill]]  ;;  %s10374_s3 = sld [smem:[#allocation120_spill]] }
  0x21   : > { %s10750_s29 = smov (!%p573_p10, %s5798_s29), 63  ;;  %s6221_s24 = sshll.u32 %s7114_s0, 13 }
  0x22   : > { %s6219_s22 = sshll.u32 %s10750_s29, 3  ;;  %s10213_s27 = scalar_lea.hbm %s10298_s18, %s6221_s24 }
  0x23   : > { %s6995_s20 = smov [#allocation3]  }
  0x24   : > { %v597_v0 = vld [vmem:[%s10369_s26] sm:$0xff]  ;;  %v598_v38 = vld [vmem:[%s10369_s26 + $0x8] sm:$0xff]  ;;  %s6933_s1 = sshll.u32 %s6995_s20, 4  ;;  %s6934_s1 = int_to_ptr.vmem [resolvable:$false] %s6933_s1 }
  0x25   : > { %v601_v1 = vld [vmem:[%s10369_s26 + $0x20] sm:$0xff]  ;;  %s7169_s19 = scalar_lea.vmem %s10370_s25, %s6219_s22  ;;  %v602_v39 = vld [vmem:[%s10369_s26 + $0x28] sm:$0xff]  ;;  %s569_s22 = sand.u32 1, %s6983_s28  }
  0x26   : > { %v605_v2 = vld [vmem:[%s10369_s26 + $0x40] sm:$0xff]  ;;  %v5818_v3 = vcombine.high %v597_v0, %v601_v1  ;;  %v5817_v4 = vcombine.low %v597_v0, %v601_v1  ;;  %v5820_v42 = vcombine.high %v598_v38, %v602_v39  ;;  %v5819_v43 = vcombine.low %v598_v38, %v602_v39  ;;  %v606_v44 = vld [vmem:[%s10369_s26 + $0x48] sm:$0xff]  ;;  %v611_v38 = vld [vmem:[%s10369_s26 + $0x70] sm:$0xff]  ;;  %s5797_s21 = sshll.u32 %s569_s22, 9  ;;  %s10239_s25 = scalar_lea.sflag [#allocation4], %s569_s22 }
  0x27   : > { %v609_v5 = vld [vmem:[%s10369_s26 + $0x60] sm:$0xff]  ;;  %v610_v46 = vld [vmem:[%s10369_s26 + $0x68] sm:$0xff] }
  0x28   : > { %v5826_v6 = vcombine.high %v605_v2, %v609_v5  ;;  %v613_v7 = vld [vmem:[%s10369_s26 + $0x80] sm:$0xff]  ;;  %1445 = vmatprep.subr.bf16.mxu0 %v5818_v3  ;;  %v5825_v9 = vcombine.low %v605_v2, %v609_v5  ;;  %v614_v47 = vld [vmem:[%s10369_s26 + $0x88] sm:$0xff]  ;;  %1558 = vmatprep.subr.bf16.mxu1 %v5820_v42  ;;  %v5828_v50 = vcombine.high %v606_v44, %v610_v46 }
  0x29   : > { %v617_v8 = vld [vmem:[%s10369_s26 + $0xa0] sm:$0xff]  ;;  %1446 = vmatpush1.bf16.msra.mxu0 %v5817_v4  ;;  %v618_v48 = vld [vmem:[%s10369_s26 + $0xa8] sm:$0xff]  ;;  %1559 = vmatpush1.bf16.msra.mxu1 %v5819_v43  ;;  %v5827_v51 = vcombine.low %v606_v44, %v610_v46  ;;  %v7320_v44 = vld [vmem:[%s7169_s19 + $0x14] ss:$8 sps:$4 sm:$0xff]  }
  0x2a   : > { %1447 = vmatprep.subr.bf16.mxu0 %v5826_v6  ;;  %v5834_v10 = vcombine.high %v613_v7, %v617_v8  ;;  %v621_v11 = vld [vmem:[%s10369_s26 + $0xc0] sm:$0xff]  ;;  %v5833_v13 = vcombine.low %v613_v7, %v617_v8  ;;  %1560 = vmatprep.subr.bf16.mxu1 %v5828_v50  ;;  %v5836_v53 = vcombine.high %v614_v47, %v618_v48  ;;  %v622_v55 = vld [vmem:[%s10369_s26 + $0xc8] sm:$0xff]  ;;  %v619_v50 = vld [vmem:[%s10369_s26 + $0xb0] sm:$0xff] }
  0x2b   : > { %v625_v12 = vld [vmem:[%s10369_s26 + $0xe0] sm:$0xff]  ;;  %v626_v56 = vld [vmem:[%s10369_s26 + $0xe8] sm:$0xff]  ;;  %v5835_v59 = vcombine.low %v614_v47, %v618_v48 }
  0x2c   : > { %v5842_v14 = vcombine.high %v621_v11, %v625_v12  ;;  %v629_v15 = vld [vmem:[%s10369_s26 + $0x100] sm:$0xff]  ;;  %v5841_v18 = vcombine.low %v621_v11, %v625_v12  ;;  %v5844_v61 = vcombine.high %v622_v55, %v626_v56  ;;  %v630_v62 = vld [vmem:[%s10369_s26 + $0x108] sm:$0xff]  ;;  %v5843_v3 = vcombine.low %v622_v55, %v626_v56  ;;  %v623_v55 = vld [vmem:[%s10369_s26 + $0xd0] sm:$0xff] }
  0x2d   : > { %1448 = vmatpush1.bf16.msra.mxu0 %v5825_v9  ;;  %v633_v16 = vld [vmem:[%s10369_s26 + $0x120] sm:$0xff]  ;;  %1561 = vmatpush1.bf16.msra.mxu1 %v5827_v51  ;;  %v634_v0 = vld [vmem:[%s10369_s26 + $0x128] sm:$0xff]  ;;  %v627_v56 = vld [vmem:[%s10369_s26 + $0xf0] sm:$0xff] }
  0x2e   : > { %1449 = vmatprep.subr.bf16.mxu0 %v5834_v10  ;;  %v6581_v17 = vld [vmem:[%s7169_s19 + $0x4] ss:$8 sps:$4 sm:$0xff]   ;;  %v5850_v19 = vcombine.high %v629_v15, %v633_v16  ;;  %v5849_v22 = vcombine.low %v629_v15, %v633_v16  ;;  %1562 = vmatprep.subr.bf16.mxu1 %v5836_v53  ;;  %v5852_v6 = vcombine.high %v630_v62, %v634_v0  ;;  %v7317_v42 = vld [vmem:[%s7169_s19] ss:$8 sps:$4 sm:$0xff]  }
  0x2f   : > { %1477 = vmatprep.mubr.bf16.mxu0 %v6581_v17  ;;  %v637_v20 = vld [vmem:[%s10369_s26 + $0x140] sm:$0xff]  ;;  %1590 = vmatprep.mubr.bf16.mxu1 %v6581_v17  ;;  %v638_v8 = vld [vmem:[%s10369_s26 + $0x148] sm:$0xff]  ;;  %v5851_v11 = vcombine.low %v630_v62, %v634_v0 }
  0x30   : > { %v641_v21 = vld [vmem:[%s10369_s26 + $0x160] sm:$0xff]  ;;  %v642_v9 = vld [vmem:[%s10369_s26 + $0x168] sm:$0xff] }
  0x31   : > { %1450 = vmatpush1.bf16.msra.mxu0 %v5833_v13  ;;  %v5858_v23 = vcombine.high %v637_v20, %v641_v21  ;;  %v645_v24 = vld [vmem:[%s10369_s26 + $0x180] sm:$0xff]  ;;  %v5857_v26 = vcombine.low %v637_v20, %v641_v21  ;;  %1563 = vmatpush1.bf16.msra.mxu1 %v5835_v59  ;;  %v646_v12 = vld [vmem:[%s10369_s26 + $0x188] sm:$0xff]  ;;  %v5860_v17 = vcombine.high %v638_v8, %v642_v9 }
  0x32   : > { %1451 = vmatprep.subr.bf16.mxu0 %v5842_v14  ;;  %v649_v25 = vld [vmem:[%s10369_s26 + $0x1a0] sm:$0xff]  ;;  %1564 = vmatprep.subr.bf16.mxu1 %v5844_v61  ;;  %v650_v13 = vld [vmem:[%s10369_s26 + $0x1a8] sm:$0xff] }
  0x33   : > { %v5866_v27 = vcombine.high %v645_v24, %v649_v25  ;;  %v653_v28 = vld [vmem:[%s10369_s26 + $0x1c0] sm:$0xff]  ;;  %v5865_v30 = vcombine.low %v645_v24, %v649_v25  ;;  %v654_v20 = vld [vmem:[%s10369_s26 + $0x1c8] sm:$0xff]  ;;  %v5868_v25 = vcombine.high %v646_v12, %v650_v13 }
  0x34   : > { %v657_v29 = vld [vmem:[%s10369_s26 + $0x1e0] sm:$0xff]  ;;  %v658_v21 = vld [vmem:[%s10369_s26 + $0x1e8] sm:$0xff] }
  0x35   : > { %1452 = vmatpush1.bf16.msra.mxu0 %v5841_v18  ;;  %v5874_v31 = vcombine.high %v653_v28, %v657_v29  ;;  %v661_v32 = vld [vmem:[%s10369_s26 + $0x200] sm:$0xff]  ;;  %v5873_v34 = vcombine.low %v653_v28, %v657_v29  ;;  %1565 = vmatpush1.bf16.msra.mxu1 %v5843_v3  ;;  %v662_v28 = vld [vmem:[%s10369_s26 + $0x208] sm:$0xff]  ;;  %v631_v3 = vld [vmem:[%s10369_s26 + $0x110] sm:$0xff] }
  0x36   : > { %1453 = vmatprep.subr.bf16.mxu0 %v5850_v19  ;;  %v665_v33 = vld [vmem:[%s10369_s26 + $0x220] sm:$0xff]  ;;  %1566 = vmatprep.subr.bf16.mxu1 %v5852_v6  ;;  %v5859_v19 = vcombine.low %v638_v8, %v642_v9  ;;  %v666_v29 = vld [vmem:[%s10369_s26 + $0x228] sm:$0xff]  ;;  %v5845_v8 = vcombine.low %v623_v55, %v627_v56  ;;  %v639_v9 = vld [vmem:[%s10369_s26 + $0x150] sm:$0xff] }
  0x37   : > { %v5882_v35 = vcombine.high %v661_v32, %v665_v33  ;;  %v669_v36 = vld [vmem:[%s10369_s26 + $0x240] sm:$0xff]  ;;  %v5881_v40 = vcombine.low %v661_v32, %v665_v33  ;;  %v603_v32 = vld [vmem:[%s10369_s26 + $0x30] sm:$0xff]  ;;  %v5876_v33 = vcombine.high %v654_v20, %v658_v21  ;;  %v5884_v39 = vcombine.high %v662_v28, %v666_v29  ;;  %v678_v46 = vld [vmem:[%s10369_s26 + $0x288] sm:$0xff] }
  0x38   : > { %v673_v37 = vld [vmem:[%s10369_s26 + $0x260] sm:$0xff]  ;;  %v682_v47 = vld [vmem:[%s10369_s26 + $0x2a8] sm:$0xff] }
  0x39   : > { %1454 = vmatpush1.bf16.msra.mxu0 %v5849_v22  ;;  %v677_v41 = vld [vmem:[%s10369_s26 + $0x280] sm:$0xff]  ;;  %v5890_v45 = vcombine.high %v669_v36, %v673_v37  ;;  %v5889_v52 = vcombine.low %v669_v36, %v673_v37  ;;  %1567 = vmatpush1.bf16.msra.mxu1 %v5851_v11  ;;  %v607_v37 = vld [vmem:[%s10369_s26 + $0x50] sm:$0xff]  ;;  %v690_v59 = vld [vmem:[%s10369_s26 + $0x2e8] sm:$0xff] }
  0x3a   : > { %1455 = vmatprep.subr.bf16.mxu0 %v5858_v23  ;;  %v681_v49 = vld [vmem:[%s10369_s26 + $0x2a0] sm:$0xff]  ;;  %1568 = vmatprep.subr.bf16.mxu1 %v5860_v17  ;;  %v5830_v51 = vcombine.high %v607_v37, %v611_v38  ;;  %v694_v0 = vld [vmem:[%s10369_s26 + $0x308] sm:$0xff]  ;;  %v647_v17 = vld [vmem:[%s10369_s26 + $0x190] sm:$0xff] }
  0x3b   : > { %v5898_v54 = vcombine.high %v677_v41, %v681_v49  ;;  %v685_v57 = vld [vmem:[%s10369_s26 + $0x2c0] sm:$0xff]  ;;  %v5897_v60 = vcombine.low %v677_v41, %v681_v49  ;;  %v674_v41 = vld [vmem:[%s10369_s26 + $0x268] sm:$0xff]  ;;  %v615_v49 = vld [vmem:[%s10369_s26 + $0x90] sm:$0xff] }
  0x3c   : > { %v689_v58 = vld [vmem:[%s10369_s26 + $0x2e0] sm:$0xff]  ;;  %v5838_v61 = vcombine.high %v615_v49, %v619_v50 }
  0x3d   : > { %1456 = vmatpush1.bf16.msra.mxu0 %v5857_v26  ;;  %v5906_v63 = vcombine.high %v685_v57, %v689_v58  ;;  %v693_v1 = vld [vmem:[%s10369_s26 + $0x300] sm:$0xff]  ;;  %v5905_v4 = vcombine.low %v685_v57, %v689_v58  ;;  %1569 = vmatpush1.bf16.msra.mxu1 %v5859_v19  ;;  %v5900_v57 = vcombine.high %v678_v46, %v682_v47  ;;  %v686_v58 = vld [vmem:[%s10369_s26 + $0x2c8] sm:$0xff] }
  0x3e   : > { %1457 = vmatprep.subr.bf16.mxu0 %v5866_v27  ;;  %v697_v2 = vld [vmem:[%s10369_s26 + $0x320] sm:$0xff]  ;;  %v5867_v27 = vcombine.low %v646_v12, %v650_v13  ;;  %1570 = vmatprep.subr.bf16.mxu1 %v5868_v25  ;;  %v5908_v6 = vcombine.high %v686_v58, %v690_v59 }
  0x3f   : > { %v701_v5 = vld [vmem:[%s10369_s26 + $0x340] sm:$0xff]  ;;  %v5914_v7 = vcombine.high %v693_v1, %v697_v2  ;;  %v5913_v14 = vcombine.low %v693_v1, %v697_v2  ;;  %v698_v1 = vld [vmem:[%s10369_s26 + $0x328] sm:$0xff]  ;;  %v5837_v2 = vcombine.low %v615_v49, %v619_v50  ;;  %v695_v49 = vld [vmem:[%s10369_s26 + $0x310] sm:$0xff] }
  0x40   : > { %v705_v10 = vld [vmem:[%s10369_s26 + $0x360] sm:$0xff]  ;;  %v5916_v11 = vcombine.high %v694_v0, %v698_v1  ;;  %v699_v50 = vld [vmem:[%s10369_s26 + $0x330] sm:$0xff] }
  0x41   : > { %1458 = vmatpush1.bf16.msra.mxu0 %v5865_v30  ;;  %v709_v15 = vld [vmem:[%s10369_s26 + $0x380] sm:$0xff]  ;;  %v5922_v18 = vcombine.high %v701_v5, %v705_v10  ;;  %v5921_v22 = vcombine.low %v701_v5, %v705_v10  ;;  %1571 = vmatpush1.bf16.msra.mxu1 %v5867_v27  ;;  %v5846_v5 = vcombine.high %v623_v55, %v627_v56  ;;  %v643_v10 = vld [vmem:[%s10369_s26 + $0x170] sm:$0xff] }
  0x42   : > { %1459 = vmatprep.subr.bf16.mxu0 %v5874_v31  ;;  %v713_v16 = vld [vmem:[%s10369_s26 + $0x3a0] sm:$0xff]  ;;  %v599_v31 = vld [vmem:[%s10369_s26 + $0x10] sm:$0xff]  ;;  %1572 = vmatprep.subr.bf16.mxu1 %v5876_v33  ;;  %v5862_v19 = vcombine.high %v639_v9, %v643_v10  ;;  %v5918_v56 = vcombine.high %v695_v49, %v699_v50 }
  0x43   : > { %v717_v23 = vld [vmem:[%s10369_s26 + $0x3c0] sm:$0xff]  ;;  %v5930_v26 = vcombine.high %v709_v15, %v713_v16  ;;  %v5929_v30 = vcombine.low %v709_v15, %v713_v16  ;;  %v5822_v43 = vcombine.high %v599_v31, %v603_v32  ;;  %v5821_v48 = vcombine.low %v599_v31, %v603_v32  ;;  %v663_v27 = vld [vmem:[%s10369_s26 + $0x210] sm:$0xff] }
  0x44   : > { %v721_v24 = vld [vmem:[%s10369_s26 + $0x3e0] sm:$0xff]  ;;  %v5915_v15 = vcombine.low %v694_v0, %v698_v1  ;;  %v671_v31 = vld [vmem:[%s10369_s26 + $0x250] sm:$0xff] }
  0x45   : > { %1460 = vmatpush1.bf16.msra.mxu0 %v5873_v34  ;;  %v5938_v34 = vcombine.high %v717_v23, %v721_v24  ;;  %v5937_v36 = vcombine.low %v717_v23, %v721_v24  ;;  %v7352_v62 = vld [vmem:[%s7169_s19 + $0x24] ss:$8 sps:$4 sm:$0xff]   ;;  %v7375_v12 = vld [vmem:[%s7169_s19 + $0x20] ss:$8 sps:$4 sm:$0xff]   ;;  %v7395_v23 = vld [vmem:[%s7169_s19 + $0x30] ss:$8 sps:$4 sm:$0xff]  }
  0x46   : > { %1461 = vmatprep.subr.bf16.mxu0 %v5882_v35  ;;  %v5875_v35 = vcombine.low %v654_v20, %v658_v21  ;;  %v5861_v20 = vcombine.low %v639_v9, %v643_v10  ;;  %v655_v21 = vld [vmem:[%s10369_s26 + $0x1d0] sm:$0xff]  ;;  %v7398_v25 = vld [vmem:[%s7169_s19 + $0x44] ss:$8 sps:$4 sm:$0xff]   ;;  %v7415_v33 = vld [vmem:[%s7169_s19 + $0x40] ss:$8 sps:$4 sm:$0xff]  }
  0x47   : > { %v675_v32 = vld [vmem:[%s10369_s26 + $0x270] sm:$0xff]  ;;  %v7455_v55 = vld [vmem:[%s7169_s19 + $0x60] ss:$8 sps:$4 sm:$0xff]   ;;  %v7482_v9 = vld [vmem:[%s7169_s19 + $0x4] ss:$8 sps:$4 sm:$0xff]  }
  0x48   : > { %1573 = vmatpush1.bf16.msra.mxu1 %v5875_v35  ;;  %v7418_v35 = vld [vmem:[%s7169_s19 + $0x54] ss:$8 sps:$4 sm:$0xff]   ;;  %v6606_v10 = vld [vmem:[%s10286_s6 + $0x8] sm:$0xff]  }
  0x49   : > { %1462 = vmatpush1.bf16.msra.mxu0 %v5881_v40  ;;  %v670_v40 = vld [vmem:[%s10369_s26 + $0x248] sm:$0xff]  ;;  %1574 = vmatprep.subr.bf16.mxu1 %v5884_v39  ;;  %v5894_v39 = vcombine.high %v671_v31, %v675_v32  ;;  %v719_v1 = vld [vmem:[%s10369_s26 + $0x3d0] sm:$0xff] }
  0x4a   : > { %1463 = vmatprep.subr.bf16.mxu0 %v5890_v45  ;;  %v5883_v45 = vcombine.low %v662_v28, %v666_v29  ;;  %v5891_v53 = vcombine.low %v670_v40, %v674_v41  ;;  %v667_v28 = vld [vmem:[%s10369_s26 + $0x230] sm:$0xff] }
  0x4c   : > { %1575 = vmatpush1.bf16.msra.mxu1 %v5883_v45  ;;  %v7435_v45 = vld [vmem:[%s7169_s19 + $0x50] ss:$8 sps:$4 sm:$0xff]  }
  0x4d   : > { %1464 = vmatpush1.bf16.msra.mxu0 %v5889_v52  ;;  %v5892_v52 = vcombine.high %v670_v40, %v674_v41  ;;  %v5893_v40 = vcombine.low %v671_v31, %v675_v32  ;;  %v687_v41 = vld [vmem:[%s10369_s26 + $0x2d0] sm:$0xff]  ;;  %v6612_v32 = vld [vmem:[%s10286_s6 + $0x38] sm:$0xff]  }
  0x4e   : > { %1465 = vmatprep.subr.bf16.mxu0 %v5898_v54  ;;  %v5829_v54 = vcombine.low %v607_v37, %v611_v38  ;;  %v679_v37 = vld [vmem:[%s10369_s26 + $0x290] sm:$0xff] }
  0x4f   : > { %1576 = vmatprep.subr.bf16.mxu1 %v5892_v52  ;;  %v683_v38 = vld [vmem:[%s10369_s26 + $0x2b0] sm:$0xff] }
  0x50   : > { %1577 = vmatpush1.bf16.msra.mxu1 %v5891_v53  ;;  %v703_v53 = vld [vmem:[%s10369_s26 + $0x350] sm:$0xff] }
  0x51   : > { %1466 = vmatpush1.bf16.msra.mxu0 %v5897_v60  ;;  %v7349_v60 = vld [vmem:[%s7169_s19 + $0x10] ss:$8 sps:$4 sm:$0xff]   ;;  %1578 = vmatprep.subr.bf16.mxu1 %v5900_v57  ;;  %v7458_v57 = vld [vmem:[%s7169_s19 + $0x74] ss:$8 sps:$4 sm:$0xff]  }
  0x52   : > { %1467 = vmatprep.subr.bf16.mxu0 %v5906_v63  ;;  %v5899_v63 = vcombine.low %v678_v46, %v682_v47  ;;  %v5902_v46 = vcombine.high %v679_v37, %v683_v38  ;;  %v7438_v47 = vld [vmem:[%s7169_s19 + $0x64] ss:$8 sps:$4 sm:$0xff]   ;;  %v6611_v31 = vld [vmem:[%s10286_s6 + $0x30] sm:$0xff]  }
  0x54   : > { %1579 = vmatpush1.bf16.msra.mxu1 %v5899_v63 }
  0x55   : > { %1468 = vmatpush1.bf16.msra.mxu0 %v5905_v4  ;;  %v635_v4 = vld [vmem:[%s10369_s26 + $0x130] sm:$0xff]  ;;  %1580 = vmatprep.subr.bf16.mxu1 %v5908_v6 }
  0x56   : > { %1469 = vmatprep.subr.bf16.mxu0 %v5914_v7  ;;  %v5907_v7 = vcombine.low %v686_v58, %v690_v59  ;;  %v5854_v13 = vcombine.high %v631_v3, %v635_v4  ;;  %v5853_v16 = vcombine.low %v631_v3, %v635_v4  ;;  %v5917_v58 = vcombine.low %v695_v49, %v699_v50  ;;  %v711_v59 = vld [vmem:[%s10369_s26 + $0x390] sm:$0xff]  ;;  %v640_v50 = vld [vmem:[%s10369_s26 + $0x158] sm:$0xff] }
  0x57   : > { %v7475_v3 = vld [vmem:[%s7169_s19 + $0x70] ss:$8 sps:$4 sm:$0xff]  }
  0x58   : > { %1581 = vmatpush1.bf16.msra.mxu1 %v5907_v7  ;;  %v6605_v7 = vld [vmem:[%s10286_s6] sm:$0xff]  }
  0x59   : > { %1470 = vmatpush1.bf16.msra.mxu0 %v5913_v14  ;;  %v7378_v14 = vld [vmem:[%s7169_s19 + $0x34] ss:$8 sps:$4 sm:$0xff]   ;;  %1582 = vmatprep.subr.bf16.mxu1 %v5916_v11 }
  0x5a   : > { %1471 = vmatprep.subr.bf16.mxu0 %v5922_v18  ;;  %v651_v18 = vld [vmem:[%s10369_s26 + $0x1b0] sm:$0xff] }
  0x5b   : > { %v5870_v24 = vcombine.high %v647_v17, %v651_v18  ;;  %v6607_v11 = vld [vmem:[%s10286_s6 + $0x10] sm:$0xff]  }
  0x5c   : > { %1583 = vmatpush1.bf16.msra.mxu1 %v5915_v15  ;;  %v6609_v15 = vld [vmem:[%s10286_s6 + $0x20] sm:$0xff]  }
  0x5d   : > { %1472 = vmatpush1.bf16.msra.mxu0 %v5921_v22  ;;  %v659_v22 = vld [vmem:[%s10369_s26 + $0x1f0] sm:$0xff] }
  0x5e   : > { %1473 = vmatprep.subr.bf16.mxu0 %v5930_v26  ;;  %v5869_v26 = vcombine.low %v647_v17, %v651_v18  ;;  %v5878_v29 = vcombine.high %v655_v21, %v659_v22  ;;  %v702_v17 = vld [vmem:[%s10369_s26 + $0x348] sm:$0xff] }
  0x5f   : > { %v706_v18 = vld [vmem:[%s10369_s26 + $0x368] sm:$0xff] }
  0x61   : > { %1474 = vmatpush1.bf16.msra.mxu0 %v5929_v30  ;;  %v5877_v30 = vcombine.low %v655_v21, %v659_v22  ;;  %v710_v21 = vld [vmem:[%s10369_s26 + $0x388] sm:$0xff] }
  0x62   : > { %1475 = vmatprep.subr.bf16.mxu0 %v5938_v34  ;;  %v5886_v34 = vcombine.high %v663_v27, %v667_v28  ;;  %v714_v22 = vld [vmem:[%s10369_s26 + $0x3a8] sm:$0xff] }
  0x65   : > { %1476 = vmatpush1.bf16.msra.mxu0 %v5937_v36  ;;  %v5885_v36 = vcombine.low %v663_v27, %v667_v28  ;;  %v718_v27 = vld [vmem:[%s10369_s26 + $0x3c8] sm:$0xff] }
  0x66   : > { %1671 = vmatprep.subr.bf16.mxu0 %v5822_v43  ;;  %v691_v43 = vld [vmem:[%s10369_s26 + $0x2f0] sm:$0xff]  ;;  %v722_v28 = vld [vmem:[%s10369_s26 + $0x3e8] sm:$0xff] }
  0x67   : > { %v5909_v52 = vcombine.low %v687_v41, %v691_v43 }
  0x68   : > { %1478 = vmatmul.mubr.bf16.vlgmr.msra.gmra.mrb[0].mxu0 %v7317_v42 }
  0x69   : > { %1487 = vmatprep.mubr.bf16.mxu0 %v7320_v44  ;;  %1672 = vmatpush1.bf16.msra.mxu0 %v5821_v48  ;;  %v5901_v48 = vcombine.low %v679_v37, %v683_v38  ;;  %v624_v38 = vld [vmem:[%s10369_s26 + $0xd8] sm:$0xff] }
  0x6a   : > { %1673 = vmatprep.subr.bf16.mxu0 %v5830_v51  ;;  %v5910_v51 = vcombine.high %v687_v41, %v691_v43  ;;  %v632_v43 = vld [vmem:[%s10369_s26 + $0x118] sm:$0xff] }
  0x6d   : > { %1674 = vmatpush1.bf16.msra.mxu0 %v5829_v54  ;;  %v707_v54 = vld [vmem:[%s10369_s26 + $0x370] sm:$0xff] }
  0x6e   : > { %1675 = vmatprep.subr.bf16.mxu0 %v5838_v61  ;;  %v715_v61 = vld [vmem:[%s10369_s26 + $0x3b0] sm:$0xff]  ;;  %v5926_v63 = vcombine.high %v703_v53, %v707_v54  ;;  %v5925_v0 = vcombine.low %v703_v53, %v707_v54  ;;  %v648_v54 = vld [vmem:[%s10369_s26 + $0x198] sm:$0xff] }
  0x6f   : > { %v5934_v4 = vcombine.high %v711_v59, %v715_v61 }
  0x70   : > { %1488 = vmatmul.mubr.bf16.gmra.mrb[4].mxu0 %v7349_v60 }
  0x71   : > { %1497 = vmatprep.mubr.bf16.mxu0 %v7352_v62  ;;  %1676 = vmatpush1.bf16.msra.mxu0 %v5837_v2  ;;  %v723_v2 = vld [vmem:[%s10369_s26 + $0x3f0] sm:$0xff] }
  0x72   : > { %1677 = vmatprep.subr.bf16.mxu0 %v5846_v5  ;;  %v5933_v5 = vcombine.low %v711_v59, %v715_v61  ;;  %v5942_v6 = vcombine.high %v719_v1, %v723_v2  ;;  %v656_v61 = vld [vmem:[%s10369_s26 + $0x1d8] sm:$0xff] }
  0x75   : > { %1678 = vmatpush1.bf16.msra.mxu0 %v5845_v8  ;;  %v5941_v8 = vcombine.low %v719_v1, %v723_v2  ;;  %v664_v2 = vld [vmem:[%s10369_s26 + $0x218] sm:$0xff] }
  0x76   : > { %1679 = vmatprep.subr.bf16.mxu0 %v5854_v13  ;;  %v6608_v13 = vld [vmem:[%s10286_s6 + $0x18] sm:$0xff]  }
  0x78   : > { %1498 = vmatmul.mubr.bf16.gmra.mrb[8].mxu0 %v7375_v12 }
  0x79   : > { %1507 = vmatprep.mubr.bf16.mxu0 %v7378_v14  ;;  %1680 = vmatpush1.bf16.msra.mxu0 %v5853_v16  ;;  %v6610_v16 = vld [vmem:[%s10286_s6 + $0x28] sm:$0xff]  }
  0x7a   : > { %1681 = vmatprep.subr.bf16.mxu0 %v5862_v19  ;;  %v5924_v19 = vcombine.high %v702_v17, %v706_v18 }
  0x7c   : > { %1584 = vmatprep.subr.bf16.mxu1 %v5924_v19 }
  0x7d   : > { %1682 = vmatpush1.bf16.msra.mxu0 %v5861_v20  ;;  %v5923_v20 = vcombine.low %v702_v17, %v706_v18  ;;  %v688_v17 = vld [vmem:[%s10369_s26 + $0x2d8] sm:$0xff] }
  0x7e   : > { %1683 = vmatprep.subr.bf16.mxu0 %v5870_v24  ;;  %v5932_v24 = vcombine.high %v710_v21, %v714_v22  ;;  %v692_v18 = vld [vmem:[%s10369_s26 + $0x2f8] sm:$0xff] }
  0x7f   : > { %1585 = vmatpush1.bf16.msra.mxu1 %v5923_v20  ;;  %v5912_v20 = vcombine.high %v688_v17, %v692_v18 }
  0x80   : > { %1508 = vmatmul.mubr.bf16.gmra.mrb[12].mxu0 %v7395_v23  ;;  %1586 = vmatprep.subr.bf16.mxu1 %v5932_v24  ;;  %v1899_v24 = vlaneseq }
  0x81   : > { %1517 = vmatprep.mubr.bf16.mxu0 %v7398_v25  ;;  %1684 = vmatpush1.bf16.msra.mxu0 %v5869_v26  ;;  %v5931_v26 = vcombine.low %v710_v21, %v714_v22  ;;  %v696_v21 = vld [vmem:[%s10369_s26 + $0x318] sm:$0xff] }
  0x82   : > { %1685 = vmatprep.subr.bf16.mxu0 %v5878_v29  ;;  %v5940_v29 = vcombine.high %v718_v27, %v722_v28  ;;  %v700_v22 = vld [vmem:[%s10369_s26 + $0x338] sm:$0xff] }
  0x83   : > { %1587 = vmatpush1.bf16.msra.mxu1 %v5931_v26  ;;  %v5911_v26 = vcombine.low %v688_v17, %v692_v18  ;;  %v6918_v17 = vld [vmem:[%s7169_s19] ss:$8 sps:$4 sm:$0xff]  }
  0x84   : > { %1588 = vmatprep.subr.bf16.mxu1 %v5940_v29  ;;  %v708_v29 = vld [vmem:[%s10369_s26 + $0x378] sm:$0xff] }
  0x85   : > { %1686 = vmatpush1.bf16.msra.mxu0 %v5877_v30  ;;  %v5939_v30 = vcombine.low %v718_v27, %v722_v28  ;;  %v5920_v27 = vcombine.high %v696_v21, %v700_v22  ;;  %v704_v28 = vld [vmem:[%s10369_s26 + $0x358] sm:$0xff] }
  0x86   : > { %1687 = vmatprep.subr.bf16.mxu0 %v5886_v34  ;;  %v620_v34 = vld [vmem:[%s10369_s26 + $0xb8] sm:$0xff] }
  0x87   : > { %1589 = vmatpush1.bf16.msra.mxu1 %v5939_v30  ;;  %v7639_v30 = vshrl.u32 %v1899_v24, 7 }
  0x88   : > { %1518 = vmatmul.mubr.bf16.gmra.mrb[16].mxu0 %v7415_v33 }
  0x89   : > { %1527 = vmatprep.mubr.bf16.mxu0 %v7418_v35  ;;  %1688 = vmatpush1.bf16.msra.mxu0 %v5885_v36 }
  0x8a   : > { %1689 = vmatprep.subr.bf16.mxu0 %v5894_v39  ;;  %1591 = vmatmul.mubr.bf16.vlgmr.msra.gmra.mrb[0].mxu1 %v7317_v42  ;;  %v628_v39 = vld [vmem:[%s10369_s26 + $0xf8] sm:$0xff] }
  0x8b   : > { %1600 = vmatprep.mubr.bf16.mxu1 %v7320_v44  ;;  %v5848_v41 = vcombine.high %v624_v38, %v628_v39 }
  0x8d   : > { %1690 = vmatpush1.bf16.msra.mxu0 %v5893_v40 }
  0x8e   : > { %1691 = vmatprep.subr.bf16.mxu0 %v5902_v46  ;;  %v636_v46 = vld [vmem:[%s10369_s26 + $0x138] sm:$0xff] }
  0x8f   : > { %v5856_v49 = vcombine.high %v632_v43, %v636_v46 }
  0x90   : > { %1528 = vmatmul.mubr.bf16.gmra.mrb[20].mxu0 %v7435_v45 }
  0x91   : > { %1537 = vmatprep.mubr.bf16.mxu0 %v7438_v47  ;;  %1692 = vmatpush1.bf16.msra.mxu0 %v5901_v48  ;;  %v5847_v48 = vcombine.low %v624_v38, %v628_v39 }
  0x92   : > { %1693 = vmatprep.subr.bf16.mxu0 %v5910_v51  ;;  %1601 = vmatmul.mubr.bf16.gmra.mrb[4].mxu1 %v7349_v60  ;;  %v644_v51 = vld [vmem:[%s10369_s26 + $0x178] sm:$0xff] }
  0x93   : > { %1610 = vmatprep.mubr.bf16.mxu1 %v7352_v62  ;;  %v5864_v53 = vcombine.high %v640_v50, %v644_v51 }
  0x95   : > { %1694 = vmatpush1.bf16.msra.mxu0 %v5909_v52  ;;  %v5855_v52 = vcombine.low %v632_v43, %v636_v46 }
  0x96   : > { %1695 = vmatprep.subr.bf16.mxu0 %v5918_v56  ;;  %v652_v56 = vld [vmem:[%s10369_s26 + $0x1b8] sm:$0xff] }
  0x97   : > { %v5872_v59 = vcombine.high %v648_v54, %v652_v56 }
  0x98   : > { %1538 = vmatmul.mubr.bf16.gmra.mrb[24].mxu0 %v7455_v55 }
  0x99   : > { %1547 = vmatprep.mubr.bf16.mxu0 %v7458_v57  ;;  %1696 = vmatpush1.bf16.msra.mxu0 %v5917_v58  ;;  %v5863_v58 = vcombine.low %v640_v50, %v644_v51 }
  0x9a   : > { %1697 = vmatprep.subr.bf16.mxu0 %v5926_v63  ;;  %1611 = vmatmul.mubr.bf16.gmra.mrb[8].mxu1 %v7375_v12  ;;  %v660_v63 = vld [vmem:[%s10369_s26 + $0x1f8] sm:$0xff] }
  0x9b   : > { %1620 = vmatprep.mubr.bf16.mxu1 %v7378_v14  ;;  %v5880_v1 = vcombine.high %v656_v61, %v660_v63 }
  0x9d   : > { %1698 = vmatpush1.bf16.msra.mxu0 %v5925_v0  ;;  %v5871_v0 = vcombine.low %v648_v54, %v652_v56 }
  0x9e   : > { %1699 = vmatprep.subr.bf16.mxu0 %v5934_v4  ;;  %v668_v4 = vld [vmem:[%s10369_s26 + $0x238] sm:$0xff] }
  0xa0   : > { %1548 = vmatmul.mubr.bf16.gmra.mrb[28].mxu0 %v7475_v3 }
  0xa1   : > { %1700 = vmatpush1.bf16.msra.mxu0 %v5933_v5  ;;  %1703 = vmatprep.mubr.bf16.mxu0 %v7482_v9  ;;  %v5879_v5 = vcombine.low %v656_v61, %v660_v63 }
  0xa2   : > { %1701 = vmatprep.subr.bf16.mxu0 %v5942_v6  ;;  %1621 = vmatmul.mubr.bf16.gmra.mrb[12].mxu1 %v7395_v23  ;;  %v5888_v6 = vcombine.high %v664_v2, %v668_v4 }
  0xa3   : > { %1630 = vmatprep.mubr.bf16.mxu1 %v7398_v25 }
  0xa5   : > { %1702 = vmatpush1.bf16.msra.mxu0 %v5941_v8  ;;  %v676_v8 = vld [vmem:[%s10369_s26 + $0x278] sm:$0xff] }
  0xa6   : > { %6314 = vmatprep.subr.bf16.mxu0 %v6605_v7 }
  0xa8   : > { %1704 = vmatmul.mubr.bf16.vlgmr.msra.gmra.mrb[32].mxu0 %v7317_v42  ;;  %v600_v42 = vld [vmem:[%s10369_s26 + $0x18] sm:$0xff] }
  0xa9   : > { %6315 = vmatpush3.bf16.msra.mxu0 %v6605_v7  ;;  %1713 = vmatprep.mubr.bf16.mxu0 %v7320_v44  ;;  %v604_v44 = vld [vmem:[%s10369_s26 + $0x38] sm:$0xff] }
  0xaa   : > { %6316 = vmatprep.subr.bf16.mxu0 %v6606_v10  ;;  %1631 = vmatmul.mubr.bf16.gmra.mrb[16].mxu1 %v7415_v33  ;;  %v672_v7 = vld [vmem:[%s10369_s26 + $0x258] sm:$0xff] }
  0xab   : > { %1640 = vmatprep.mubr.bf16.mxu1 %v7418_v35 }
  0xad   : > { %6317 = vmatpush3.bf16.msra.mxu0 %v6606_v10  ;;  %v5896_v10 = vcombine.high %v672_v7, %v676_v8 }
  0xae   : > { %6318 = vmatprep.subr.bf16.mxu0 %v6607_v11 }
  0xb0   : > { %1714 = vmatmul.mubr.bf16.gmra.mrb[36].mxu0 %v7349_v60  ;;  %v608_v60 = vld [vmem:[%s10369_s26 + $0x58] sm:$0xff] }
  0xb1   : > { %1723 = vmatprep.mubr.bf16.mxu0 %v7352_v62  ;;  %6319 = vmatpush3.bf16.msra.mxu0 %v6607_v11  ;;  %v5823_v62 = vcombine.low %v600_v42, %v604_v44  ;;  %v680_v11 = vld [vmem:[%s10369_s26 + $0x298] sm:$0xff] }
  0xb2   : > { %6320 = vmatprep.subr.bf16.mxu0 %v6608_v13  ;;  %1641 = vmatmul.mubr.bf16.gmra.mrb[20].mxu1 %v7435_v45 }
  0xb3   : > { %1650 = vmatprep.mubr.bf16.mxu1 %v7438_v47 }
  0xb5   : > { %6321 = vmatpush3.bf16.msra.mxu0 %v6608_v13  ;;  %v684_v13 = vld [vmem:[%s10369_s26 + $0x2b8] sm:$0xff] }
  0xb6   : > { %6322 = vmatprep.subr.bf16.mxu0 %v6609_v15  ;;  %v5903_v19 = vcombine.low %v680_v11, %v684_v13 }
  0xb8   : > { %1724 = vmatmul.mubr.bf16.gmra.mrb[40].mxu0 %v7375_v12  ;;  %v5824_v12 = vcombine.high %v600_v42, %v604_v44  ;;  %v712_v42 = vld [vmem:[%s10369_s26 + $0x398] sm:$0xff] }
  0xb9   : > { %1733 = vmatprep.mubr.bf16.mxu0 %v7378_v14  ;;  %6323 = vmatpush3.bf16.msra.mxu0 %v6609_v15  ;;  %v612_v14 = vld [vmem:[%s10369_s26 + $0x78] sm:$0xff]  ;;  %v5895_v15 = vcombine.low %v672_v7, %v676_v8  ;;  %v6614_v8 = vld [vmem:[%s10286_s6 + $0x48] sm:$0xff]  }
  0xba   : > { %6324 = vmatprep.subr.bf16.mxu0 %v6610_v16  ;;  %1651 = vmatmul.mubr.bf16.gmra.mrb[24].mxu1 %v7455_v55  ;;  %v5831_v36 = vcombine.low %v608_v60, %v612_v14  ;;  %v716_v44 = vld [vmem:[%s10369_s26 + $0x3b8] sm:$0xff] }
  0xbb   : > { %1660 = vmatprep.mubr.bf16.mxu1 %v7458_v57  ;;  %1784 = vmatprep.subr.bf16.mxu1 %v5824_v12  ;;  %v7656_v12 = vsub.s32 1, %v7639_v30  ;;  %v5935_v39 = vcombine.low %v712_v42, %v716_v44 }
  0xbc   : > { %1785 = vmatpush1.bf16.msra.mxu1 %v5823_v62  ;;  %v7653_v62 = vld [vmem:[%s10372_s23] sm:$0xf] }
  0xbd   : > { %6325 = vmatpush3.bf16.msra.mxu0 %v6610_v16  ;;  %v5904_v16 = vcombine.high %v680_v11, %v684_v13  ;;  %10373 = vst [vmem:[#allocation13_spill] sm:$0xff] %v7656_v12  ;;  %v7675_v38 = vrot.slane %v7653_v62, %v7656_v12 }
  0xbe   : > { %6326 = vmatprep.subr.bf16.mxu0 %v6611_v31 }
  0xc0   : > { %1734 = vmatmul.mubr.bf16.gmra.mrb[44].mxu0 %v7395_v23  ;;  %v5832_v23 = vcombine.high %v608_v60, %v612_v14  ;;  %v7648_v60 = vsub.s32 0, %v7639_v30  ;;  %v5927_v14 = vcombine.low %v704_v28, %v708_v29 }
  0xc1   : > { %1743 = vmatprep.mubr.bf16.mxu0 %v7398_v25  ;;  %6327 = vmatpush3.bf16.msra.mxu0 %v6611_v31  ;;  %v616_v25 = vld [vmem:[%s10369_s26 + $0x98] sm:$0xff]  ;;  %v5919_v31 = vcombine.low %v696_v21, %v700_v22 }
  0xc2   : > { %6328 = vmatprep.subr.bf16.mxu0 %v6612_v32  ;;  %1661 = vmatmul.mubr.bf16.gmra.mrb[28].mxu1 %v7475_v3  ;;  %v5840_v37 = vcombine.high %v616_v25, %v620_v34  ;;  %v5839_v40 = vcombine.low %v616_v25, %v620_v34  ;;  %10371 = vst [vmem:[#allocation12_spill] sm:$0xff] %v7648_v60  ;;  %v720_v25 = vld [vmem:[%s10369_s26 + $0x3d8] sm:$0xff] }
  0xc3   : > { %1816 = vmatprep.mubr.bf16.mxu1 %v7482_v9  ;;  %1786 = vmatprep.subr.bf16.mxu1 %v5832_v23  ;;  %v5887_v9 = vcombine.low %v664_v2, %v668_v4  ;;  %v5936_v23 = vcombine.high %v712_v42, %v716_v44  ;;  %v724_v34 = vld [vmem:[%s10369_s26 + $0x3f8] sm:$0xff] }
  0xc4   : > { %1787 = vmatpush1.bf16.msra.mxu1 %v5831_v36  ;;  %v7666_v36 = vrot.slane %v7653_v62, %v7648_v60  ;;  %v6919_v22 = vld [vmem:[%s7169_s19 + $0x14] ss:$8 sps:$4 sm:$0xff]  }
  0xc5   : > { %6329 = vmatpush3.bf16.msra.mxu0 %v6612_v32  ;;  %1788 = vmatprep.subr.bf16.mxu1 %v5840_v37  ;;  %v5928_v32 = vcombine.high %v704_v28, %v708_v29  ;;  %v7671_v37 = vld [vmem:[%s10374_s3] sm:$0xf]  ;;  %v6615_v29 = vld [vmem:[%s10286_s6 + $0x50] sm:$0xff]  }
  0xc6   : > { %v7680_v46 = vrot.slane %v7671_v37, %v7648_v60  ;;  %v7690_v51 = vrot.slane %v7671_v37, %v7656_v12 }
  0xc8   : > { %1744 = vmatmul.mubr.bf16.gmra.mrb[48].mxu0 %v7415_v33  ;;  %1789 = vmatpush1.bf16.msra.mxu1 %v5839_v40  ;;  %v5944_v40 = vcombine.high %v720_v25, %v724_v34 }
  0xc9   : > { %1753 = vmatprep.mubr.bf16.mxu0 %v7418_v35  ;;  %1790 = vmatprep.subr.bf16.mxu1 %v5848_v41 }
  0xcc   : > { %1791 = vmatpush1.bf16.msra.mxu1 %v5847_v48 }
  0xcd   : > { %1792 = vmatprep.subr.bf16.mxu1 %v5856_v49  ;;  %v7685_v49 = vld [vmem:[%s10284_s4] sm:$0xf] }
  0xd0   : > { %1754 = vmatmul.mubr.bf16.gmra.mrb[52].mxu0 %v7435_v45  ;;  %1793 = vmatpush1.bf16.msra.mxu1 %v5855_v52 }
  0xd1   : > { %1763 = vmatprep.mubr.bf16.mxu0 %v7438_v47  ;;  %1794 = vmatprep.subr.bf16.mxu1 %v5864_v53  ;;  %v5943_v53 = vcombine.low %v720_v25, %v724_v34 }
  0xd4   : > { %1795 = vmatpush1.bf16.msra.mxu1 %v5863_v58 }
  0xd5   : > { %1796 = vmatprep.subr.bf16.mxu1 %v5872_v59  ;;  %v6613_v59 = vld [vmem:[%s10286_s6 + $0x40] sm:$0xff]  }
  0xd8   : > { %1764 = vmatmul.mubr.bf16.gmra.mrb[56].mxu0 %v7455_v55  ;;  %1797 = vmatpush1.bf16.msra.mxu1 %v5871_v0 }
  0xd9   : > { %1773 = vmatprep.mubr.bf16.mxu0 %v7458_v57  ;;  %1798 = vmatprep.subr.bf16.mxu1 %v5880_v1  ;;  %v7700_v1 = vrot.slane %v7685_v49, %v7648_v60 }
  0xdc   : > { %1799 = vmatpush1.bf16.msra.mxu1 %v5879_v5  ;;  %v7705_v5 = vrot.slane %v7685_v49, %v7656_v12 }
  0xdd   : > { %1800 = vmatprep.subr.bf16.mxu1 %v5888_v6 }
  0xe0   : > { %1774 = vmatmul.mubr.bf16.gmra.mrb[60].mxu0 %v7475_v3  ;;  %1801 = vmatpush1.bf16.msra.mxu1 %v5887_v9 }
  0xe1   : > { %1802 = vmatprep.subr.bf16.mxu1 %v5896_v10 }
  0xe4   : > { %1803 = vmatpush1.bf16.msra.mxu1 %v5895_v15 }
  0xe5   : > { %1804 = vmatprep.subr.bf16.mxu1 %v5904_v16 }
  0xe8   : > { %1805 = vmatpush1.bf16.msra.mxu1 %v5903_v19 }
  0xe9   : > { %1806 = vmatprep.subr.bf16.mxu1 %v5912_v20 }
  0xec   : > { %1807 = vmatpush1.bf16.msra.mxu1 %v5911_v26 }
  0xed   : > { %1808 = vmatprep.subr.bf16.mxu1 %v5920_v27 }
  0xf0   : > { %1809 = vmatpush1.bf16.msra.mxu1 %v5919_v31 }
  0xf1   : > { %1810 = vmatprep.subr.bf16.mxu1 %v5928_v32 }
  0xf4   : > { %1811 = vmatpush1.bf16.msra.mxu1 %v5927_v14 }
  0xf5   : > { %1812 = vmatprep.subr.bf16.mxu1 %v5936_v23 }
  0xf8   : > { %1813 = vmatpush1.bf16.msra.mxu1 %v5935_v39  ;;  %v6616_v39 = vld [vmem:[%s10286_s6 + $0x58] sm:$0xff]  }
  0xf9   : > { %1814 = vmatprep.subr.bf16.mxu1 %v5944_v40 }
  0xfc   : > { %1815 = vmatpush1.bf16.msra.mxu1 %v5943_v53  ;;  %v6920_v53 = vld [vmem:[%s7169_s19 + $0x10] ss:$8 sps:$4 sm:$0xff]  }
  0xfd   : > { %6346 = vmatprep.subr.bf16.mxu1 %v6613_v59 }
  0xff   : > { %1817 = vmatmul.mubr.bf16.vlgmr.msra.gmra.mrb[32].mxu1 %v6918_v17  ;;  %v6618_v17 = vld [vmem:[%s10286_s6 + $0x68] sm:$0xff]  }
 0x100   : > { %6347 = vmatpush3.bf16.msra.mxu1 %v6613_v59  ;;  %1826 = vmatprep.mubr.bf16.mxu1 %v6919_v22 }
 0x101   : > { %6348 = vmatprep.subr.bf16.mxu1 %v6614_v8 }
 0x104   : > { %6349 = vmatpush3.bf16.msra.mxu1 %v6614_v8 }
 0x105   : > { %6350 = vmatprep.subr.bf16.mxu1 %v6615_v29 }
 0x107   : > { %1827 = vmatmul.mubr.bf16.gmra.mrb[36].mxu1 %v6920_v53 }
 0x108   : > { %6351 = vmatpush3.bf16.msra.mxu1 %v6615_v29 }
 0x109   : > { %6352 = vmatprep.subr.bf16.mxu1 %v6616_v39 }
 0x10c   : > { %6353 = vmatpush3.bf16.msra.mxu1 %v6616_v39 }
 0x13b   : > { %v1479_v41 = vpop.f32.mrb[0].mxu0 }
 0x13c   : > { %v1919_v43 = vadd.f32 %v7666_v36, %v1479_v41  ;;  %v1481_v48 = vpop.f32.mrb[1].mxu0 }
 0x13d   : > { %v1920_v50 = vadd.f32 %v7675_v38, %v1481_v48  ;;  %v1483_v52 = vpop.f32.mrb[2].mxu0 }
 0x13e   : > { %v1983_v54 = vmax.f32 %v1919_v43, 0.0  ;;  %v1923_v56 = vadd.f32 %v7666_v36, %v1483_v52  ;;  %v1485_v58 = vpop.f32.mrb[3].mxu0 }
 0x13f   : > { %v1984_v61 = vmax.f32 %v1920_v50, 0.0  ;;  %v1924_v63 = vadd.f32 %v7675_v38, %v1485_v58 }
 0x140   : > { %v2069_v0 = vmul.f32 %v7680_v46, %v1983_v54  ;;  %v1987_v2 = vmax.f32 %v1923_v56, 0.0 }
 0x141   : > { %v2070_v4 = vmul.f32 %v7690_v51, %v1984_v61  ;;  %v1988_v6 = vmax.f32 %v1924_v63, 0.0  ;;  %v6921_v61 = vld [vmem:[%s7169_s19 + $0x24] ss:$8 sps:$4 sm:$0xff]  }
 0x142   : > { %v2073_v7 = vmul.f32 %v7680_v46, %v1987_v2  ;;  %v2155_v11 = vadd.f32 %v7700_v1, %v2069_v0  ;;  %1836 = vmatprep.mubr.bf16.mxu1 %v6921_v61 }
 0x143   : > { %v2074_v9 = vmul.f32 %v7690_v51, %v1988_v6  ;;  %v1489_v10 = vpop.f32.mrb[4].mxu0  ;;  %v2156_v18 = vadd.f32 %v7705_v5, %v2070_v4  ;;  %v6617_v4 = vld [vmem:[%s10286_s6 + $0x60] sm:$0xff]  }
 0x144   : > { %v2159_v13 = vadd.f32 %v7700_v1, %v2073_v7  ;;  %v1927_v15 = vadd.f32 %v7666_v36, %v1489_v10  ;;  %v1491_v16 = vpop.f32.mrb[5].mxu0  ;;  %6354 = vmatprep.subr.bf16.mxu1 %v6617_v4 }
 0x145   : > { %v2160_v19 = vadd.f32 %v7705_v5, %v2074_v9  ;;  %v1928_v20 = vadd.f32 %v7675_v38, %v1491_v16  ;;  %v1493_v21 = vpop.f32.mrb[6].mxu0  ;;  %6355 = vmatpush3.bf16.msra.mxu1 %v6617_v4 }
 0x146   : > { %v7720_v24 = vpack.c.bf16 %v2159_v13, %v2155_v11  ;;  %v1991_v26 = vmax.f32 %v1927_v15, 0.0  ;;  %v1931_v27 = vadd.f32 %v7666_v36, %v1493_v21  ;;  %v1495_v28 = vpop.f32.mrb[7].mxu0  ;;  %6356 = vmatprep.subr.bf16.mxu1 %v6618_v17 }
 0x147   : > { %v1992_v31 = vmax.f32 %v1928_v20, 0.0  ;;  %v1932_v32 = vadd.f32 %v7675_v38, %v1495_v28  ;;  %v2321_v42 = vpack.c.bf16 %v2160_v19, %v2156_v18 }
 0x148   : > { %v2077_v44 = vmul.f32 %v7680_v46, %v1991_v26  ;;  %v1995_v14 = vmax.f32 %v1931_v27, 0.0  ;;  %v6922_v27 = vld [vmem:[%s7169_s19 + $0x20] ss:$8 sps:$4 sm:$0xff]  }
 0x149   : > { %v2078_v23 = vmul.f32 %v7690_v51, %v1992_v31  ;;  %v1996_v25 = vmax.f32 %v1932_v32, 0.0  ;;  %6330 = vmatprep.mubr.bf16.mxu0 %v2321_v42  ;;  %1837 = vmatmul.mubr.bf16.gmra.mrb[40].mxu1 %v6922_v27  ;;  %v6923_v42 = vld [vmem:[%s7169_s19 + $0x34] ss:$8 sps:$4 sm:$0xff]  }
 0x14a   : > { %v2081_v34 = vmul.f32 %v7680_v46, %v1995_v14  ;;  %v2163_v43 = vadd.f32 %v7700_v1, %v2077_v44  ;;  %1846 = vmatprep.mubr.bf16.mxu1 %v6923_v42  ;;  %6357 = vmatpush3.bf16.msra.mxu1 %v6618_v17 }
 0x14b   : > { %v2082_v40 = vmul.f32 %v7690_v51, %v1996_v25  ;;  %v1499_v41 = vpop.f32.mrb[8].mxu0  ;;  %v2164_v54 = vadd.f32 %v7705_v5, %v2078_v23 }
 0x14c   : > { %v2167_v48 = vadd.f32 %v7700_v1, %v2081_v34  ;;  %v1935_v50 = vadd.f32 %v7666_v36, %v1499_v41  ;;  %v1501_v52 = vpop.f32.mrb[9].mxu0 }
 0x14d   : > { %v2168_v56 = vadd.f32 %v7705_v5, %v2082_v40  ;;  %v1936_v58 = vadd.f32 %v7675_v38, %v1501_v52  ;;  %v1503_v59 = vpop.f32.mrb[10].mxu0 }
 0x14e   : > { %v1999_v63 = vmax.f32 %v1935_v50, 0.0  ;;  %v1939_v0 = vadd.f32 %v7666_v36, %v1503_v59  ;;  %v1505_v2 = vpop.f32.mrb[11].mxu0  ;;  %v7746_v6 = vpack.c.bf16 %v2167_v48, %v2163_v43 }
 0x14f   : > { %v2322_v7 = vpack.c.bf16 %v2168_v56, %v2164_v54  ;;  %v2000_v8 = vmax.f32 %v1936_v58, 0.0  ;;  %v1940_v9 = vadd.f32 %v7675_v38, %v1505_v2 }
 0x150   : > { %v2085_v10 = vmul.f32 %v7680_v46, %v1999_v63  ;;  %v2003_v11 = vmax.f32 %v1939_v0, 0.0  ;;  %v6924_v63 = vld [vmem:[%s7169_s19 + $0x30] ss:$8 sps:$4 sm:$0xff]  }
 0x151   : > { %v2086_v13 = vmul.f32 %v7690_v51, %v2000_v8  ;;  %v2004_v15 = vmax.f32 %v1940_v9, 0.0  ;;  %6331 = vmatmul.mubr.bf16.vlgmr.msra.gmra.mrb[64].mxu0 %v2322_v7  ;;  %1847 = vmatmul.mubr.bf16.gmra.mrb[44].mxu1 %v6924_v63  ;;  %v6925_v8 = vld [vmem:[%s7169_s19 + $0x44] ss:$8 sps:$4 sm:$0xff]   ;;  %s10058_s19 = scalar_lea.vmem [#allocation3], %s5797_s21  ;;  %s6935_s21 = scalar_lea.vmem %s6934_s1, 16384 }
 0x152   : > { %v2089_v16 = vmul.f32 %v7680_v46, %v2003_v11  ;;  %v2171_v20 = vadd.f32 %v7700_v1, %v2085_v10  ;;  %1856 = vmatprep.mubr.bf16.mxu1 %v6925_v8  ;;  %s5731_s30 = sshll.u32 %s10058_s19, 4  ;;  %s10215_s30 = int_to_ptr.vmem [resolvable:$true] %s5731_s30 }
 0x153   : > { %v2090_v18 = vmul.f32 %v7690_v51, %v2004_v15  ;;  %v1509_v19 = vpop.f32.mrb[12].mxu0  ;;  %v2172_v28 = vadd.f32 %v7705_v5, %v2086_v13  ;;  %s6929_s29 = scalar_lea.vmem %s10215_s30, 8192  ;;  %p6936_p0 = scmp.lt.s32.totalorder %s10215_s30, %s6934_s1 }
 0x154   : > { %v2175_v21 = vadd.f32 %v7700_v1, %v2089_v16  ;;  %v1943_v22 = vadd.f32 %v7666_v36, %v1509_v19  ;;  %v1511_v26 = vpop.f32.mrb[13].mxu0  ;;  %p6930_p11 = scmp.ne.s32.totalorder %s10215_s30, %s6929_s29  ;;  %p6937_p1 = scmp.lt.s32.totalorder %s6935_s21, %s6929_s29 }
 0x155   : > { %v2176_v29 = vadd.f32 %v7705_v5, %v2090_v18  ;;  %v1944_v31 = vadd.f32 %v7675_v38, %v1511_v26  ;;  %v1513_v32 = vpop.f32.mrb[14].mxu0 }
 0x156   : > { %v2007_v44 = vmax.f32 %v1943_v22, 0.0  ;;  %v1947_v14 = vadd.f32 %v7666_v36, %v1513_v32  ;;  %v1515_v23 = vpop.f32.mrb[15].mxu0  ;;  %v7765_v25 = vpack.c.bf16 %v2175_v21, %v2171_v20  ;;  %p6931_p12 = pnand %p6930_p11, %p7131_p5  ;;  %p6938_p2 = por %p6937_p1, %p6936_p0 }
 0x157   : > { %v2008_v34 = vmax.f32 %v1944_v31, 0.0  ;;  %v1948_v39 = vadd.f32 %v7675_v38, %v1515_v23  ;;  %v2323_v40 = vpack.c.bf16 %v2176_v29, %v2172_v28 }
 0x158   : > { %v2093_v41 = vmul.f32 %v7680_v46, %v2007_v44  ;;  %v2011_v43 = vmax.f32 %v1947_v14, 0.0  ;;  %p6932_p13 = pneg %p6931_p12 }
 0x159   : > { %v2094_v48 = vmul.f32 %v7690_v51, %v2008_v34  ;;  %v2012_v50 = vmax.f32 %v1948_v39, 0.0  ;;  %6334 = vmatprep.mubr.bf16.mxu0 %v2323_v40  ;;  %1857 = vmatmul.mubr.bf16.gmra.mrb[48].mxu1 %v7415_v33 }
 0x15a   : > { %v2097_v52 = vmul.f32 %v7680_v46, %v2011_v43  ;;  %v2179_v56 = vadd.f32 %v7700_v1, %v2093_v41  ;;  %1866 = vmatprep.mubr.bf16.mxu1 %v7418_v35  ;;  %p6939_p3 = pnand %p6938_p2, %p6932_p13 }
 0x15b   : > { %v2098_v53 = vmul.f32 %v7690_v51, %v2012_v50  ;;  %v1519_v54 = vpop.f32.mrb[16].mxu0  ;;  %v2180_v0 = vadd.f32 %v7705_v5, %v2094_v48 }
 0x15c   : > { %v2183_v58 = vadd.f32 %v7700_v1, %v2097_v52  ;;  %v1951_v59 = vadd.f32 %v7666_v36, %v1519_v54  ;;  %v1521_v61 = vpop.f32.mrb[17].mxu0 }
 0x15d   : > { %v2184_v2 = vadd.f32 %v7705_v5, %v2098_v53  ;;  %v1952_v4 = vadd.f32 %v7675_v38, %v1521_v61  ;;  %v1523_v7 = vpop.f32.mrb[18].mxu0 }
 0x15e   : > { %v2015_v9 = vmax.f32 %v1951_v59, 0.0  ;;  %v1955_v10 = vadd.f32 %v7666_v36, %v1523_v7  ;;  %v1525_v11 = vpop.f32.mrb[19].mxu0  ;;  %v7781_v13 = vpack.c.bf16 %v2183_v58, %v2179_v56 }
 0x15f   : > { %v2016_v15 = vmax.f32 %v1952_v4, 0.0  ;;  %v1956_v16 = vadd.f32 %v7675_v38, %v1525_v11  ;;  %v2324_v17 = vpack.c.bf16 %v2184_v2, %v2180_v0 }
 0x160   : > { %v2101_v18 = vmul.f32 %v7680_v46, %v2015_v9  ;;  %v2019_v19 = vmax.f32 %v1955_v10, 0.0 }
 0x161   : > { %v2102_v20 = vmul.f32 %v7690_v51, %v2016_v15  ;;  %v2020_v21 = vmax.f32 %v1956_v16, 0.0  ;;  %6335 = vmatmul.mubr.bf16.gmra.mrb[68].mxu0 %v2324_v17  ;;  %1867 = vmatmul.mubr.bf16.gmra.mrb[52].mxu1 %v7435_v45 }
 0x162   : > { %v2105_v22 = vmul.f32 %v7680_v46, %v2019_v19  ;;  %v2187_v28 = vadd.f32 %v7700_v1, %v2101_v18  ;;  %1876 = vmatprep.mubr.bf16.mxu1 %v7438_v47 }
 0x163   : > { %v2106_v26 = vmul.f32 %v7690_v51, %v2020_v21  ;;  %v1529_v27 = vpop.f32.mrb[20].mxu0  ;;  %v2188_v42 = vadd.f32 %v7705_v5, %v2102_v20 }
 0x164   : > { %v2191_v29 = vadd.f32 %v7700_v1, %v2105_v22  ;;  %v1959_v31 = vadd.f32 %v7666_v36, %v1529_v27  ;;  %v1531_v32 = vpop.f32.mrb[21].mxu0 }
 0x165   : > { %v2192_v44 = vadd.f32 %v7705_v5, %v2106_v26  ;;  %v1960_v14 = vadd.f32 %v7675_v38, %v1531_v32  ;;  %v1533_v23 = vpop.f32.mrb[22].mxu0 }
 0x166   : > { %v2023_v34 = vmax.f32 %v1959_v31, 0.0  ;;  %v1963_v39 = vadd.f32 %v7666_v36, %v1533_v23  ;;  %v1535_v40 = vpop.f32.mrb[23].mxu0  ;;  %v7797_v41 = vpack.c.bf16 %v2191_v29, %v2187_v28 }
 0x167   : > { %v2024_v43 = vmax.f32 %v1960_v14, 0.0  ;;  %v1964_v48 = vadd.f32 %v7675_v38, %v1535_v40  ;;  %v2325_v50 = vpack.c.bf16 %v2192_v44, %v2188_v42 }
 0x168   : > { %v2109_v33 = vmul.f32 %v7680_v46, %v2023_v34  ;;  %v2027_v52 = vmax.f32 %v1963_v39, 0.0 }
 0x169   : > { %v2110_v53 = vmul.f32 %v7690_v51, %v2024_v43  ;;  %v2028_v54 = vmax.f32 %v1964_v48, 0.0  ;;  %6338 = vmatprep.mubr.bf16.mxu0 %v2325_v50  ;;  %1877 = vmatmul.mubr.bf16.gmra.mrb[56].mxu1 %v7455_v55 }
 0x16a   : > { %v2113_v56 = vmul.f32 %v7680_v46, %v2027_v52  ;;  %v2195_v59 = vadd.f32 %v7700_v1, %v2109_v33  ;;  %1886 = vmatprep.mubr.bf16.mxu1 %v7458_v57 }
 0x16b   : > { %v2114_v35 = vmul.f32 %v7690_v51, %v2028_v54  ;;  %v1539_v58 = vpop.f32.mrb[24].mxu0  ;;  %v2196_v2 = vadd.f32 %v7705_v5, %v2110_v53 }
 0x16c   : > { %v2199_v61 = vadd.f32 %v7700_v1, %v2113_v56  ;;  %v1967_v63 = vadd.f32 %v7666_v36, %v1539_v58  ;;  %v1541_v0 = vpop.f32.mrb[25].mxu0 }
 0x16d   : > { %v2200_v4 = vadd.f32 %v7705_v5, %v2114_v35  ;;  %v1968_v7 = vadd.f32 %v7675_v38, %v1541_v0  ;;  %v1543_v8 = vpop.f32.mrb[26].mxu0 }
 0x16e   : > { %v2031_v9 = vmax.f32 %v1967_v63, 0.0  ;;  %v1971_v10 = vadd.f32 %v7666_v36, %v1543_v8  ;;  %v1545_v11 = vpop.f32.mrb[27].mxu0  ;;  %v7813_v15 = vpack.c.bf16 %v2199_v61, %v2195_v59 }
 0x16f   : > { %v2032_v16 = vmax.f32 %v1968_v7, 0.0  ;;  %v1972_v17 = vadd.f32 %v7675_v38, %v1545_v11  ;;  %v2326_v18 = vpack.c.bf16 %v2200_v4, %v2196_v2 }
 0x170   : > { %v2117_v45 = vmul.f32 %v7680_v46, %v2031_v9  ;;  %v2035_v19 = vmax.f32 %v1971_v10, 0.0 }
 0x171   : > { %v2118_v20 = vmul.f32 %v7690_v51, %v2032_v16  ;;  %v2036_v21 = vmax.f32 %v1972_v17, 0.0  ;;  %6339 = vmatmul.mubr.bf16.gmra.mrb[72].mxu0 %v2326_v18  ;;  %1887 = vmatmul.mubr.bf16.gmra.mrb[60].mxu1 %v7475_v3 }
 0x172   : > { %v2121_v22 = vmul.f32 %v7680_v46, %v2035_v19  ;;  %v2203_v27 = vadd.f32 %v7700_v1, %v2117_v45  ;;  %v1592_v19 = vpop.f32.mrb[0].mxu1 }
 0x173   : > { %v2122_v47 = vmul.f32 %v7690_v51, %v2036_v21  ;;  %v1549_v26 = vpop.f32.mrb[28].mxu0  ;;  %v2204_v32 = vadd.f32 %v7705_v5, %v2118_v20  ;;  %v7883_v21 = vpop.f32.mrb[1].mxu1 }
 0x174   : > { %v2207_v28 = vadd.f32 %v7700_v1, %v2121_v22  ;;  %v1975_v29 = vadd.f32 %v7666_v36, %v1549_v26  ;;  %v1551_v31 = vpop.f32.mrb[29].mxu0  ;;  %v1596_v22 = vpop.f32.mrb[2].mxu1 }
 0x175   : > { %v2208_v42 = vadd.f32 %v7705_v5, %v2122_v47  ;;  %v1976_v44 = vadd.f32 %v7675_v38, %v1551_v31  ;;  %v1553_v14 = vpop.f32.mrb[30].mxu0  ;;  %v7885_v47 = vpop.f32.mrb[3].mxu1 }
 0x176   : > { %v2039_v23 = vmax.f32 %v1975_v29, 0.0  ;;  %v1979_v34 = vadd.f32 %v7666_v36, %v1553_v14  ;;  %v1555_v39 = vpop.f32.mrb[31].mxu0  ;;  %v7829_v40 = vpack.c.bf16 %v2207_v28, %v2203_v27  ;;  %v1602_v29 = vpop.f32.mrb[4].mxu1  ;;  %v6619_v14 = vld [vmem:[%s10286_s6 + $0x70] sm:$0xff]  }
 0x177   : > { %v2040_v43 = vmax.f32 %v1976_v44, 0.0  ;;  %v1980_v48 = vadd.f32 %v7675_v38, %v1555_v39  ;;  %v2327_v50 = vpack.c.bf16 %v2208_v42, %v2204_v32  ;;  %v7895_v32 = vpop.f32.mrb[5].mxu1  ;;  %6358 = vmatprep.subr.bf16.mxu1 %v6619_v14 }
 0x178   : > { %v2125_v55 = vmul.f32 %v7680_v46, %v2039_v23  ;;  %v2043_v33 = vmax.f32 %v1979_v34, 0.0  ;;  %v1606_v42 = vpop.f32.mrb[6].mxu1  ;;  %6359 = vmatpush3.bf16.msra.mxu1 %v6619_v14 }
 0x179   : > { %v2126_v52 = vmul.f32 %v7690_v51, %v2040_v43  ;;  %v2044_v53 = vmax.f32 %v1980_v48, 0.0  ;;  %6342 = vmatprep.mubr.bf16.mxu0 %v2327_v50  ;;  %v7897_v44 = vpop.f32.mrb[7].mxu1 }
 0x17a   : > { %v2129_v54 = vmul.f32 %v7680_v46, %v2043_v33  ;;  %v2211_v36 = vadd.f32 %v7700_v1, %v2125_v55  ;;  %v7908_v43 = vpop.f32.mrb[8].mxu1  ;;  %v6620_v55 = vld [vmem:[%s10286_s6 + $0x78] sm:$0xff]  }
 0x17b   : > { %v2130_v57 = vmul.f32 %v7690_v51, %v2044_v53  ;;  %v7836_v56 = vpop.f32.mrb[32].mxu0  ;;  %v2212_v38 = vadd.f32 %v7705_v5, %v2126_v52  ;;  %v7912_v50 = vpop.f32.mrb[9].mxu1  ;;  %6360 = vmatprep.subr.bf16.mxu1 %v6620_v55  ;;  %v6623_v53 = vld [vmem:[%s10290_s10 + $0x4] ss:$16 sps:$4 sm:$0xff]  }
 0x17c   : > { %10375 = vst [vmem:[#allocation14_spill] sm:$0xff] %v7836_v56  ;;  %v2215_v35 = vadd.f32 %v7700_v1, %v2129_v54  ;;  %v7840_v58 = vpop.f32.mrb[33].mxu0  ;;  %v7917_v33 = vpop.f32.mrb[10].mxu1  ;;  %6361 = vmatpush3.bf16.msra.mxu1 %v6620_v55 }
 0x17d   : > { %10376 = vst [vmem:[#allocation15_spill] sm:$0xff] %v7840_v58  ;;  %v2216_v59 = vadd.f32 %v7705_v5, %v2130_v57  ;;  %v7845_v61 = vpop.f32.mrb[34].mxu0  ;;  %v7919_v52 = vpop.f32.mrb[11].mxu1  ;;  %3945 = vmatprep.subr.bf16.mxu1 %v6623_v53 }
 0x17e   : > { %10377 = vst [vmem:[#allocation16_spill] sm:$0xff] %v7845_v61  ;;  %v7847_v63 = vpop.f32.mrb[35].mxu0  ;;  %v7849_v46 = vpack.c.bf16 %v2215_v35, %v2211_v36  ;;  %v7930_v35 = vpop.f32.mrb[12].mxu1 }
 0x17f   : > { %10378 = vst [vmem:[#allocation17_spill] sm:$0xff] %v7847_v63  ;;  %v2328_v51 = vpack.c.bf16 %v2216_v59, %v2212_v38  ;;  %v7934_v59 = vpop.f32.mrb[13].mxu1 }
 0x181   : > { %6343 = vmatmul.mubr.bf16.gmra.mrb[76].mxu0 %v2328_v51  ;;  %v7936_v51 = vpop.f32.mrb[14].mxu1 }
 0x182   : > { %v7938_v14 = vpop.f32.mrb[15].mxu1 }
 0x183   : > { %v7851_v0 = vpop.f32.mrb[36].mxu0  ;;  %v7940_v55 = vpop.f32.mrb[16].mxu1 }
 0x184   : > { %10379 = vst [vmem:[#allocation18_spill] sm:$0xff] %v7851_v0  ;;  %v7853_v2 = vpop.f32.mrb[37].mxu0  ;;  %v8010_v0 = vld [vmem:[%s10289_s9] ss:$0 sm:$0xff] }
 0x185   : > { %10380 = vst [vmem:[#allocation19_spill] sm:$0xff] %v7853_v2  ;;  %v7855_v1 = vpop.f32.mrb[38].mxu0 }
 0x186   : > { %10381 = vst [vmem:[#allocation20_spill] sm:$0xff] %v7855_v1  ;;  %v7857_v4 = vpop.f32.mrb[39].mxu0 }
 0x187   : > { %10382 = vst [vmem:[#allocation21_spill] sm:$0xff] %v7857_v4 }
 0x18b   : > { %v7859_v3 = vpop.f32.mrb[40].mxu0 }
 0x18c   : > { %10383 = vst [vmem:[#allocation22_spill] sm:$0xff] %v7859_v3  ;;  %v7861_v7 = vpop.f32.mrb[41].mxu0 }
 0x18d   : > { %10384 = vst [vmem:[#allocation23_spill] sm:$0xff] %v7861_v7  ;;  %v7863_v5 = vpop.f32.mrb[42].mxu0 }
 0x18e   : > { %10385 = vst [vmem:[#allocation24_spill] sm:$0xff] %v7863_v5  ;;  %v7865_v8 = vpop.f32.mrb[43].mxu0  ;;  %v7986_v5 = vld [vmem:[%s10287_s7] ss:$0 sm:$0xff] }
 0x18f   : > { %10386 = vst [vmem:[#allocation25_spill] sm:$0xff] %v7865_v8 }
 0x193   : > { %v7867_v9 = vpop.f32.mrb[44].mxu0 }
 0x194   : > { %10387 = vst [vmem:[#allocation26_spill] sm:$0xff] %v7867_v9  ;;  %v7869_v10 = vpop.f32.mrb[45].mxu0 }
 0x195   : > { %10388 = vst [vmem:[#allocation27_spill] sm:$0xff] %v7869_v10  ;;  %v7871_v11 = vpop.f32.mrb[46].mxu0 }
 0x196   : > { %10389 = vst [vmem:[#allocation28_spill] sm:$0xff] %v7871_v11  ;;  %v7873_v16 = vpop.f32.mrb[47].mxu0 }
 0x197   : > { %10390 = vst [vmem:[#allocation29_spill] sm:$0xff] %v7873_v16 }
 0x19b   : > { %v7875_v17 = vpop.f32.mrb[48].mxu0 }
 0x19c   : > { %10391 = vst [vmem:[#allocation30_spill] sm:$0xff] %v7875_v17  ;;  %v7877_v18 = vpop.f32.mrb[49].mxu0 }
 0x19d   : > { %10392 = vst [vmem:[#allocation31_spill] sm:$0xff] %v7877_v18  ;;  %v7879_v45 = vpop.f32.mrb[50].mxu0  ;;  %v7973_v18 = vsub.s32 2, %v7639_v30 }
 0x19e   : > { %10393 = vst [vmem:[#allocation32_spill] sm:$0xff] %v7879_v45  ;;  %v7881_v20 = vpop.f32.mrb[51].mxu0 }
 0x19f   : > { %10394 = vst [vmem:[#allocation33_spill] sm:$0xff] %v7881_v20  ;;  %10407 = vst [vmem:[#allocation46_spill] sm:$0xff] %v7973_v18  ;;  %v7977_v17 = vrot.slane %v7653_v62, %v7973_v18  ;;  %v7990_v7 = vrot.slane %v7671_v37, %v7973_v18  ;;  %v8002_v37 = vrot.slane %v7685_v49, %v7973_v18 }
 0x1a1   : > { %v1929_v16 = vadd.f32 %v7977_v17, %v1602_v29  ;;  %v1933_v11 = vadd.f32 %v7977_v17, %v1606_v42  ;;  %v1921_v10 = vadd.f32 %v7977_v17, %v1592_v19  ;;  %v1925_v8 = vadd.f32 %v7977_v17, %v1596_v22  ;;  %v7997_v22 = vld [vmem:[%s10288_s8] ss:$0 sm:$0xff] }
 0x1a3   : > { %v7887_v26 = vpop.f32.mrb[52].mxu0  ;;  %v1993_v9 = vmax.f32 %v1929_v16, 0.0  ;;  %v1997_v62 = vmax.f32 %v1933_v11, 0.0  ;;  %v1985_v3 = vmax.f32 %v1921_v10, 0.0  ;;  %v1989_v16 = vmax.f32 %v1925_v8, 0.0 }
 0x1a4   : > { %10395 = vst [vmem:[#allocation34_spill] sm:$0xff] %v7887_v26  ;;  %v7889_v27 = vpop.f32.mrb[53].mxu0 }
 0x1a5   : > { %10396 = vst [vmem:[#allocation35_spill] sm:$0xff] %v7889_v27  ;;  %v7891_v28 = vpop.f32.mrb[54].mxu0  ;;  %v2079_v29 = vmul.f32 %v7990_v7, %v1993_v9  ;;  %v2083_v11 = vmul.f32 %v7990_v7, %v1997_v62  ;;  %v2071_v8 = vmul.f32 %v7990_v7, %v1985_v3  ;;  %v2075_v62 = vmul.f32 %v7990_v7, %v1989_v16 }
 0x1a6   : > { %10397 = vst [vmem:[#allocation36_spill] sm:$0xff] %v7891_v28  ;;  %v7893_v31 = vpop.f32.mrb[55].mxu0  ;;  %v1945_v16 = vadd.f32 %v7977_v17, %v7930_v35  ;;  %v1949_v35 = vadd.f32 %v7977_v17, %v7936_v51  ;;  %v6671_v51 = vld [vmem:[%s10286_s6 + $0x90] sm:$0xff]  }
 0x1a7   : > { %10398 = vst [vmem:[#allocation37_spill] sm:$0xff] %v7893_v31  ;;  %v2165_v61 = vadd.f32 %v8002_v37, %v2079_v29  ;;  %v2169_v56 = vadd.f32 %v8002_v37, %v2083_v11  ;;  %v6669_v11 = vld [vmem:[%s10286_s6 + $0x80] sm:$0xff]  }
 0x1a8   : > { %6378 = vmatprep.subr.bf16.mxu0 %v6669_v11 }
 0x1a9   : > { %6379 = vmatpush3.bf16.msra.mxu0 %v6669_v11  ;;  %v2013_v11 = vmax.f32 %v1949_v35, 0.0  ;;  %v6672_v35 = vld [vmem:[%s10286_s6 + $0x98] sm:$0xff]  }
 0x1ab   : > { %v7902_v23 = vpop.f32.mrb[56].mxu0 }
 0x1ac   : > { %10399 = vst [vmem:[#allocation38_spill] sm:$0xff] %v7902_v23  ;;  %v7904_v34 = vpop.f32.mrb[57].mxu0 }
 0x1ad   : > { %10400 = vst [vmem:[#allocation39_spill] sm:$0xff] %v7904_v34  ;;  %v7906_v39 = vpop.f32.mrb[58].mxu0 }
 0x1ae   : > { %10401 = vst [vmem:[#allocation40_spill] sm:$0xff] %v7906_v39  ;;  %v7910_v48 = vpop.f32.mrb[59].mxu0 }
 0x1af   : > { %10402 = vst [vmem:[#allocation41_spill] sm:$0xff] %v7910_v48  ;;  %v7942_v48 = vpop.f32.mrb[17].mxu1 }
 0x1b3   : > { %v7924_v54 = vpop.f32.mrb[60].mxu0 }
 0x1b4   : > { %10403 = vst [vmem:[#allocation42_spill] sm:$0xff] %v7924_v54  ;;  %v7926_v57 = vpop.f32.mrb[61].mxu0  ;;  %v7944_v54 = vpop.f32.mrb[18].mxu1 }
 0x1b5   : > { %10404 = vst [vmem:[#allocation43_spill] sm:$0xff] %v7926_v57  ;;  %v7928_v36 = vpop.f32.mrb[62].mxu0  ;;  %v7946_v57 = vpop.f32.mrb[19].mxu1 }
 0x1b6   : > { %10405 = vst [vmem:[#allocation44_spill] sm:$0xff] %v7928_v36  ;;  %v7932_v38 = vpop.f32.mrb[63].mxu0  ;;  %v7948_v53 = vpop.f32.mrb[20].mxu1 }
 0x1b7   : > { %10406 = vst [vmem:[#allocation45_spill] sm:$0xff] %v7932_v38  ;;  %v7950_v36 = vpop.f32.mrb[21].mxu1 }
 0x1b8   : > { %v7952_v39 = vpop.f32.mrb[22].mxu1 }
 0x1b9   : > { %v7954_v38 = vpop.f32.mrb[23].mxu1 }
 0x1ba   : > { %v7956_v34 = vpop.f32.mrb[24].mxu1 }
 0x1bb   : > { %v7958_v23 = vpop.f32.mrb[25].mxu1 }
 0x1bc   : > { %v7960_v31 = vpop.f32.mrb[26].mxu1 }
 0x1bd   : > { %v7962_v28 = vpop.f32.mrb[27].mxu1 }
 0x1be   : > { %v7964_v27 = vpop.f32.mrb[28].mxu1 }
 0x1bf   : > { %v7966_v26 = vpop.f32.mrb[29].mxu1 }
 0x1c0   : > { %v7968_v20 = vpop.f32.mrb[30].mxu1 }
 0x1c1   : > { %v7970_v45 = vpop.f32.mrb[31].mxu1 }
 0x224   : > { %v6332_v4 = vpop.f32.mrb[64].mxu0 }
 0x225   : > { %v2443_v42 = vadd.f32 %v6332_v4, %v7986_v5  ;;  %v2434_v19 = vpop.f32.mrb[65].mxu0 }
 0x226   : > { %v2435_v1 = vadd.f32 %v7986_v5, %v2434_v19  ;;  %v6333_v2 = vpop.f32.mrb[66].mxu0 }
 0x227   : > { %v2499_v10 = vmax.f32 %v2443_v42, 0.0  ;;  %v2446_v9 = vadd.f32 %v6333_v2, %v7986_v5  ;;  %v2437_v4 = vpop.f32.mrb[67].mxu0 }
 0x228   : > { %v2497_v63 = vmax.f32 %v2435_v1, 0.0  ;;  %v2438_v19 = vadd.f32 %v7986_v5, %v2437_v4  ;;  %v2157_v1 = vadd.f32 %v8002_v37, %v2071_v8  ;;  %v2161_v8 = vadd.f32 %v8002_v37, %v2075_v62 }
 0x229   : > { %v2522_v49 = vmul.f32 %v7997_v22, %v2499_v10  ;;  %v2500_v42 = vmax.f32 %v2446_v9, 0.0  ;;  %v6670_v9 = vld [vmem:[%s10286_s6 + $0x88] sm:$0xff]  }
 0x22a   : > { %v2520_v2 = vmul.f32 %v7997_v22, %v2497_v63  ;;  %v2498_v58 = vmax.f32 %v2438_v19, 0.0  ;;  %v8026_v63 = vpop.f32.mrb[32].mxu1  ;;  %6380 = vmatprep.subr.bf16.mxu0 %v6670_v9 }
 0x22b   : > { %v2545_v3 = vadd.f32 %v8010_v0, %v2522_v49  ;;  %v2523_v12 = vmul.f32 %v7997_v22, %v2500_v42  ;;  %10408 = vst [vmem:[#allocation47_spill] sm:$0xff] %v8026_v63  ;;  %v8036_v19 = vpop.f32.mrb[33].mxu1  ;;  %6381 = vmatpush3.bf16.msra.mxu0 %v6670_v9  ;;  %v6624_v9 = vld [vmem:[%s10290_s10 + $0x20] ss:$16 sps:$4 sm:$0xff]  }
 0x22c   : > { %v2543_v4 = vadd.f32 %v8010_v0, %v2520_v2  ;;  %v2521_v29 = vmul.f32 %v7997_v22, %v2498_v58  ;;  %10409 = vst [vmem:[#allocation48_spill] sm:$0xff] %v8036_v19  ;;  %v8042_v42 = vpop.f32.mrb[34].mxu1  ;;  %v1937_v2 = vadd.f32 %v7977_v17, %v7908_v43  ;;  %v6621_v43 = vld [vmem:[%s10290_s10] ss:$16 sps:$4 sm:$0xff]   ;;  %6382 = vmatprep.subr.bf16.mxu0 %v6671_v51 }
 0x22d   : > { %v2577_v18 = vadd.f32 %v2545_v3, %v2165_v61  ;;  %v2546_v10 = vadd.f32 %v8010_v0, %v2523_v12  ;;  %10410 = vst [vmem:[#allocation49_spill] sm:$0xff] %v8042_v42  ;;  %v8048_v62 = vpop.f32.mrb[35].mxu1 }
 0x22e   : > { %v2544_v58 = vadd.f32 %v8010_v0, %v2521_v29  ;;  %v2575_v61 = vadd.f32 %v2543_v4, %v2157_v1  ;;  %10411 = vst [vmem:[#allocation50_spill] sm:$0xff] %v8048_v62  ;;  %v2009_v29 = vmax.f32 %v1945_v16, 0.0 }
 0x22f   : > { %v2578_v12 = vadd.f32 %v2546_v10, %v2169_v56  ;;  %v8040_v49 = vpack.c.bf16 %v2546_v10, %v2545_v3  ;;  %v8050_v56 = vpop.f32.mrb[36].mxu1  ;;  %v1941_v3 = vadd.f32 %v7977_v17, %v7917_v33  ;;  %6383 = vmatpush3.bf16.msra.mxu0 %v6671_v51 }
 0x230   : > { %v2576_v63 = vadd.f32 %v2544_v58, %v2161_v8  ;;  %v8046_v60 = vpack.c.bf16 %v2544_v58, %v2543_v4  ;;  %10412 = vst [vmem:[#allocation51_spill] sm:$0xff] %v8050_v56  ;;  %v8060_v4 = vpop.f32.mrb[37].mxu1  ;;  %v2001_v8 = vmax.f32 %v1937_v2, 0.0  ;;  %v2095_v33 = vmul.f32 %v7990_v7, %v2009_v29  ;;  %6384 = vmatprep.subr.bf16.mxu0 %v6672_v35 }
 0x231   : > { %v2592_v1 = vpack.c.bf16 %v2578_v12, %v2577_v18  ;;  %10413 = vst [vmem:[#allocation52_spill] sm:$0xff] %v8060_v4  ;;  %v6626_v18 = vld [vmem:[%s10290_s10 + $0x24] ss:$16 sps:$4 sm:$0xff]   ;;  %v8065_v16 = vpop.f32.mrb[38].mxu1 }
 0x232   : > { %v2591_v10 = vpack.c.bf16 %v2576_v63, %v2575_v61  ;;  %10414 = vst [vmem:[#allocation53_spill] sm:$0xff] %v8065_v16  ;;  %v8067_v12 = vpop.f32.mrb[39].mxu1  ;;  %v2005_v16 = vmax.f32 %v1941_v3, 0.0  ;;  %v6629_v3 = vld [vmem:[%s10290_s10 + $0x44] ss:$16 sps:$4 sm:$0xff]  }
 0x233   : > { %10415 = vst [vmem:[#allocation54_spill] sm:$0xff] %v8067_v12  ;;  %v8071_v4 = vpop.f32.mrb[40].mxu1  ;;  %6385 = vmatpush3.bf16.msra.mxu0 %v6672_v35  ;;  %v1965_v35 = vadd.f32 %v7977_v17, %v7952_v39  ;;  %v1957_v39 = vadd.f32 %v7977_v17, %v7944_v54 }
 0x234   : > { %v6336_v58 = vpop.f32.mrb[68].mxu0  ;;  %6362 = vmatprep.mubr.bf16.mxu1 %v2591_v10  ;;  %10416 = vst [vmem:[#allocation55_spill] sm:$0xff] %v8071_v4  ;;  %v8080_v29 = vpop.f32.mrb[41].mxu1 }
 0x235   : > { %v2459_v63 = vadd.f32 %v6336_v58, %v7986_v5  ;;  %v2450_v61 = vpop.f32.mrb[69].mxu0  ;;  %6363 = vmatmul.mubr.bf16.vlgmr.msra.gmra.mrb[64].mxu1 %v2592_v1  ;;  %10417 = vst [vmem:[#allocation56_spill] sm:$0xff] %v8080_v29  ;;  %v2099_v1 = vmul.f32 %v7990_v7, %v2013_v11  ;;  %v2181_v11 = vadd.f32 %v8002_v37, %v2095_v33 }
 0x236   : > { %v2451_v2 = vadd.f32 %v7986_v5, %v2450_v61  ;;  %3946 = vmatpush1.bf16.msra.mxu1 %v6621_v43  ;;  %v6337_v10 = vpop.f32.mrb[70].mxu0  ;;  %v8087_v61 = vpop.f32.mrb[42].mxu1  ;;  %v2087_v43 = vmul.f32 %v7990_v7, %v2001_v8  ;;  %v2091_v29 = vmul.f32 %v7990_v7, %v2005_v16  ;;  %v6627_v8 = vld [vmem:[%s10290_s10 + $0x40] ss:$16 sps:$4 sm:$0xff]   ;;  %v6632_v16 = vld [vmem:[%s10290_s10 + $0x64] ss:$16 sps:$4 sm:$0xff]  }
 0x237   : > { %v2503_v58 = vmax.f32 %v2459_v63, 0.0  ;;  %v2462_v4 = vadd.f32 %v6337_v10, %v7986_v5  ;;  %v2453_v12 = vpop.f32.mrb[71].mxu0  ;;  %3947 = vmatprep.subr.bf16.mxu1 %v6626_v18  ;;  %10418 = vst [vmem:[#allocation57_spill] sm:$0xff] %v8087_v61  ;;  %v8091_v42 = vpop.f32.mrb[43].mxu1  ;;  %v2185_v33 = vadd.f32 %v8002_v37, %v2099_v1 }
 0x238   : > { %v2501_v56 = vmax.f32 %v2451_v2, 0.0  ;;  %v2454_v62 = vadd.f32 %v7986_v5, %v2453_v12  ;;  %v8095_v18 = vpop.f32.mrb[44].mxu1 }
 0x239   : > { %v2526_v63 = vmul.f32 %v7997_v22, %v2503_v58  ;;  %v2504_v10 = vmax.f32 %v2462_v4, 0.0  ;;  %v8102_v12 = vpop.f32.mrb[45].mxu1 }
 0x23a   : > { %v2524_v61 = vmul.f32 %v7997_v22, %v2501_v56  ;;  %v2502_v19 = vmax.f32 %v2454_v62, 0.0  ;;  %3948 = vmatpush1.bf16.msra.mxu1 %v6624_v9  ;;  %10419 = vst [vmem:[#allocation58_spill] sm:$0xff] %v8102_v12  ;;  %v8110_v56 = vpop.f32.mrb[46].mxu1  ;;  %v2173_v62 = vadd.f32 %v8002_v37, %v2087_v43  ;;  %v2177_v12 = vadd.f32 %v8002_v37, %v2091_v29 }
 0x23b   : > { %v2549_v51 = vadd.f32 %v8010_v0, %v2526_v63  ;;  %v2527_v4 = vmul.f32 %v7997_v22, %v2504_v10  ;;  %3949 = vmatprep.subr.bf16.mxu1 %v6629_v3  ;;  %10420 = vst [vmem:[#allocation59_spill] sm:$0xff] %v8110_v56  ;;  %v8115_v58 = vpop.f32.mrb[47].mxu1  ;;  %v1961_v3 = vadd.f32 %v7977_v17, %v7948_v53  ;;  %v6635_v53 = vld [vmem:[%s10290_s10 + $0x84] ss:$16 sps:$4 sm:$0xff]  }
 0x23c   : > { %v2547_v2 = vadd.f32 %v8010_v0, %v2524_v61  ;;  %v2525_v9 = vmul.f32 %v7997_v22, %v2502_v19  ;;  %10421 = vst [vmem:[#allocation60_spill] sm:$0xff] %v8115_v58  ;;  %v8120_v10 = vpop.f32.mrb[48].mxu1  ;;  %v6630_v19 = vld [vmem:[%s10290_s10 + $0x60] ss:$16 sps:$4 sm:$0xff]  }
 0x23d   : > { %v2550_v1 = vadd.f32 %v8010_v0, %v2527_v4  ;;  %v2581_v63 = vadd.f32 %v2549_v51, %v2181_v11  ;;  %10422 = vst [vmem:[#allocation61_spill] sm:$0xff] %v8120_v10  ;;  %v8127_v43 = vpop.f32.mrb[49].mxu1 }
 0x23e   : > { %v2548_v56 = vadd.f32 %v8010_v0, %v2525_v9  ;;  %3950 = vmatpush1.bf16.msra.mxu1 %v6627_v8  ;;  %v2579_v61 = vadd.f32 %v2547_v2, %v2173_v62  ;;  %10423 = vst [vmem:[#allocation62_spill] sm:$0xff] %v8127_v43  ;;  %v8136_v4 = vpop.f32.mrb[50].mxu1  ;;  %v1953_v8 = vadd.f32 %v7977_v17, %v7940_v55  ;;  %v2029_v55 = vmax.f32 %v1965_v35, 0.0 }
 0x23f   : > { %3951 = vmatprep.subr.bf16.mxu1 %v6632_v16  ;;  %v2582_v11 = vadd.f32 %v2550_v1, %v2185_v33  ;;  %v8134_v29 = vpack.c.bf16 %v2550_v1, %v2549_v51  ;;  %v8142_v43 = vpop.f32.mrb[51].mxu1  ;;  %v2025_v16 = vmax.f32 %v1961_v3, 0.0  ;;  %v6633_v33 = vld [vmem:[%s10290_s10 + $0x80] ss:$16 sps:$4 sm:$0xff]  }
 0x240   : > { %v2580_v9 = vadd.f32 %v2548_v56, %v2177_v12  ;;  %v8140_v62 = vpack.c.bf16 %v2548_v56, %v2547_v2  ;;  %10424 = vst [vmem:[#allocation63_spill] sm:$0xff] %v8142_v43  ;;  %v8144_v58 = vpop.f32.mrb[52].mxu1  ;;  %v6638_v12 = vld [vmem:[%s10290_s10 + $0xa4] ss:$16 sps:$4 sm:$0xff]   ;;  %v2017_v2 = vmax.f32 %v1953_v8, 0.0 }
 0x241   : > { %v2594_v10 = vpack.c.bf16 %v2582_v11, %v2581_v63  ;;  %10425 = vst [vmem:[#allocation64_spill] sm:$0xff] %v8144_v58  ;;  %v8151_v1 = vpop.f32.mrb[53].mxu1  ;;  %v2111_v63 = vmul.f32 %v7990_v7, %v2025_v16  ;;  %v2021_v11 = vmax.f32 %v1957_v39, 0.0 }
 0x242   : > { %3952 = vmatpush1.bf16.msra.mxu1 %v6630_v19  ;;  %v2593_v51 = vpack.c.bf16 %v2580_v9, %v2579_v61  ;;  %10426 = vst [vmem:[#allocation65_spill] sm:$0xff] %v8151_v1  ;;  %v8156_v56 = vpop.f32.mrb[54].mxu1  ;;  %v6636_v9 = vld [vmem:[%s10290_s10 + $0xa0] ss:$16 sps:$4 sm:$0xff]   ;;  %v2103_v39 = vmul.f32 %v7990_v7, %v2017_v2 }
 0x243   : > { %3953 = vmatprep.subr.bf16.mxu1 %v6635_v53  ;;  %10427 = vst [vmem:[#allocation66_spill] sm:$0xff] %v8156_v56  ;;  %v8158_v54 = vpop.f32.mrb[55].mxu1  ;;  %v6639_v2 = vld [vmem:[%s10290_s10 + $0xc0] ss:$16 sps:$4 sm:$0xff]  }
 0x244   : > { %v6340_v3 = vpop.f32.mrb[72].mxu0  ;;  %6366 = vmatprep.mubr.bf16.mxu1 %v2593_v51  ;;  %10428 = vst [vmem:[#allocation67_spill] sm:$0xff] %v8158_v54  ;;  %v2115_v51 = vmul.f32 %v7990_v7, %v2029_v55  ;;  %v8171_v16 = vpop.f32.mrb[56].mxu1 }
 0x245   : > { %v2475_v19 = vadd.f32 %v6340_v3, %v7986_v5  ;;  %v2466_v61 = vpop.f32.mrb[73].mxu0  ;;  %6367 = vmatmul.mubr.bf16.gmra.mrb[68].mxu1 %v2594_v10  ;;  %v6641_v10 = vld [vmem:[%s10290_s10 + $0xc4] ss:$16 sps:$4 sm:$0xff]   ;;  %10429 = vst [vmem:[#allocation68_spill] sm:$0xff] %v8171_v16 }
 0x246   : > { %v2467_v53 = vadd.f32 %v7986_v5, %v2466_v61  ;;  %3954 = vmatpush1.bf16.msra.mxu1 %v6633_v33  ;;  %v6341_v35 = vpop.f32.mrb[74].mxu0  ;;  %v8175_v61 = vpop.f32.mrb[57].mxu1 }
 0x247   : > { %v2507_v8 = vmax.f32 %v2475_v19, 0.0  ;;  %v2478_v54 = vadd.f32 %v6341_v35, %v7986_v5  ;;  %v2469_v56 = vpop.f32.mrb[75].mxu0  ;;  %3955 = vmatprep.subr.bf16.mxu1 %v6638_v12  ;;  %10430 = vst [vmem:[#allocation69_spill] sm:$0xff] %v8175_v61  ;;  %v2197_v19 = vadd.f32 %v8002_v37, %v2111_v63  ;;  %v8179_v1 = vpop.f32.mrb[58].mxu1  ;;  %v2107_v12 = vmul.f32 %v7990_v7, %v2021_v11  ;;  %v6644_v11 = vld [vmem:[%s10290_s10 + $0xe4] ss:$16 sps:$4 sm:$0xff]  }
 0x248   : > { %v2505_v33 = vmax.f32 %v2467_v53, 0.0  ;;  %v2470_v3 = vadd.f32 %v7986_v5, %v2469_v56  ;;  %10431 = vst [vmem:[#allocation70_spill] sm:$0xff] %v8179_v1  ;;  %v8186_v56 = vpop.f32.mrb[59].mxu1  ;;  %v2201_v63 = vadd.f32 %v8002_v37, %v2115_v51 }
 0x249   : > { %v2530_v55 = vmul.f32 %v7997_v22, %v2507_v8  ;;  %v2508_v35 = vmax.f32 %v2478_v54, 0.0  ;;  %10432 = vst [vmem:[#allocation71_spill] sm:$0xff] %v8186_v56  ;;  %v2189_v8 = vadd.f32 %v8002_v37, %v2103_v39  ;;  %v2193_v51 = vadd.f32 %v8002_v37, %v2107_v12  ;;  %v8212_v12 = vpop.f32.mrb[60].mxu1 }
 0x24a   : > { %v2528_v58 = vmul.f32 %v7997_v22, %v2505_v33  ;;  %v2506_v43 = vmax.f32 %v2470_v3, 0.0  ;;  %3956 = vmatpush1.bf16.msra.mxu1 %v6636_v9  ;;  %10433 = vst [vmem:[#allocation72_spill] sm:$0xff] %v8212_v12 }
 0x24b   : > { %v2553_v53 = vadd.f32 %v8010_v0, %v2530_v55  ;;  %v2531_v54 = vmul.f32 %v7997_v22, %v2508_v35  ;;  %3957 = vmatprep.subr.bf16.mxu1 %v6641_v10  ;;  %v1977_v55 = vadd.f32 %v7977_v17, %v7964_v27  ;;  %v6642_v35 = vld [vmem:[%s10290_s10 + $0xe0] ss:$16 sps:$4 sm:$0xff]  }
 0x24c   : > { %v2551_v9 = vadd.f32 %v8010_v0, %v2528_v58  ;;  %v2529_v33 = vmul.f32 %v7997_v22, %v2506_v43  ;;  %v6647_v58 = vld [vmem:[%s10290_s10 + $0x104] ss:$16 sps:$4 sm:$0xff]   ;;  %v1981_v43 = vadd.f32 %v7977_v17, %v7968_v20  ;;  %v1973_v20 = vadd.f32 %v7977_v17, %v7960_v31 }
 0x24d   : > { %v2554_v3 = vadd.f32 %v8010_v0, %v2531_v54  ;;  %v2585_v56 = vadd.f32 %v2553_v53, %v2197_v19 }
 0x24e   : > { %v2552_v10 = vadd.f32 %v8010_v0, %v2529_v33  ;;  %3958 = vmatpush1.bf16.msra.mxu1 %v6639_v2  ;;  %v2583_v39 = vadd.f32 %v2551_v9, %v2189_v8  ;;  %v1969_v2 = vadd.f32 %v7977_v17, %v7956_v34  ;;  %v8218_v8 = vpop.f32.mrb[61].mxu1  ;;  %v2045_v34 = vmax.f32 %v1981_v43, 0.0 }
 0x24f   : > { %3959 = vmatprep.subr.bf16.mxu1 %v6644_v11  ;;  %v2586_v27 = vadd.f32 %v2554_v3, %v2201_v63  ;;  %v8210_v19 = vpack.c.bf16 %v2554_v3, %v2553_v53  ;;  %10434 = vst [vmem:[#allocation73_spill] sm:$0xff] %v8218_v8  ;;  %v2041_v11 = vmax.f32 %v1977_v55, 0.0  ;;  %v8220_v61 = vpop.f32.mrb[62].mxu1  ;;  %v6645_v63 = vld [vmem:[%s10290_s10 + $0x100] ss:$16 sps:$4 sm:$0xff]  }
 0x250   : > { %v2584_v54 = vadd.f32 %v2552_v10, %v2193_v51  ;;  %v8216_v33 = vpack.c.bf16 %v2552_v10, %v2551_v9  ;;  %10435 = vst [vmem:[#allocation74_spill] sm:$0xff] %v8220_v61  ;;  %v8227_v3 = vpop.f32.mrb[63].mxu1  ;;  %v6650_v9 = vld [vmem:[%s10290_s10 + $0x124] ss:$16 sps:$4 sm:$0xff]   ;;  %v2037_v10 = vmax.f32 %v1973_v20, 0.0 }
 0x251   : > { %v2596_v1 = vpack.c.bf16 %v2586_v27, %v2585_v56  ;;  %10436 = vst [vmem:[#allocation75_spill] sm:$0xff] %v8227_v3  ;;  %v2033_v56 = vmax.f32 %v1969_v2, 0.0  ;;  %v2127_v51 = vmul.f32 %v7990_v7, %v2041_v11  ;;  %v2131_v27 = vmul.f32 %v7990_v7, %v2045_v34 }
 0x252   : > { %3960 = vmatpush1.bf16.msra.mxu1 %v6642_v35  ;;  %v2595_v53 = vpack.c.bf16 %v2584_v54, %v2583_v39  ;;  %v2123_v34 = vmul.f32 %v7990_v7, %v2037_v10 }
 0x253   : > { %3961 = vmatprep.subr.bf16.mxu1 %v6647_v58  ;;  %v6648_v58 = vld [vmem:[%s10290_s10 + $0x120] ss:$16 sps:$4 sm:$0xff]   ;;  %v2119_v11 = vmul.f32 %v7990_v7, %v2033_v56 }
 0x254   : > { %v6344_v55 = vpop.f32.mrb[76].mxu0  ;;  %6370 = vmatprep.mubr.bf16.mxu1 %v2595_v53 }
 0x255   : > { %v2491_v17 = vadd.f32 %v6344_v55, %v7986_v5  ;;  %v2482_v31 = vpop.f32.mrb[77].mxu0  ;;  %6371 = vmatmul.mubr.bf16.gmra.mrb[72].mxu1 %v2596_v1  ;;  %v6653_v1 = vld [vmem:[%s10290_s10 + $0x144] ss:$16 sps:$4 sm:$0xff]   ;;  %v2205_v7 = vadd.f32 %v8002_v37, %v2119_v11 }
 0x256   : > { %v2483_v35 = vadd.f32 %v7986_v5, %v2482_v31  ;;  %3962 = vmatpush1.bf16.msra.mxu1 %v6645_v63  ;;  %v6345_v39 = vpop.f32.mrb[78].mxu0  ;;  %v2213_v63 = vadd.f32 %v8002_v37, %v2127_v51  ;;  %v6656_v51 = vld [vmem:[%s10290_s10 + $0x164] ss:$16 sps:$4 sm:$0xff]  }
 0x257   : > { %v2511_v43 = vmax.f32 %v2491_v17, 0.0  ;;  %v2494_v2 = vadd.f32 %v6345_v39, %v7986_v5  ;;  %v2485_v54 = vpop.f32.mrb[79].mxu0  ;;  %3963 = vmatprep.subr.bf16.mxu1 %v6650_v9  ;;  %v6651_v9 = vld [vmem:[%s10290_s10 + $0x140] ss:$16 sps:$4 sm:$0xff]   ;;  %v6659_v11 = vld [vmem:[%s10290_s10 + $0x184] ss:$16 sps:$4 sm:$0xff]  }
 0x258   : > { %v2509_v20 = vmax.f32 %v2483_v35, 0.0  ;;  %v2486_v53 = vadd.f32 %v7986_v5, %v2485_v54  ;;  %v2217_v35 = vadd.f32 %v8002_v37, %v2131_v27  ;;  %v2209_v54 = vadd.f32 %v8002_v37, %v2123_v34  ;;  %v6662_v34 = vld [vmem:[%s10290_s10 + $0x1a4] ss:$16 sps:$4 sm:$0xff]  }
 0x259   : > { %v2534_v55 = vmul.f32 %v7997_v22, %v2511_v43  ;;  %v2512_v17 = vmax.f32 %v2494_v2, 0.0 }
 0x25a   : > { %v2532_v31 = vmul.f32 %v7997_v22, %v2509_v20  ;;  %v2510_v39 = vmax.f32 %v2486_v53, 0.0  ;;  %3964 = vmatpush1.bf16.msra.mxu1 %v6648_v58 }
 0x25b   : > { %v2557_v56 = vadd.f32 %v8010_v0, %v2534_v55  ;;  %v2535_v5 = vmul.f32 %v7997_v22, %v2512_v17  ;;  %3965 = vmatprep.subr.bf16.mxu1 %v6653_v1  ;;  %v6654_v1 = vld [vmem:[%s10290_s10 + $0x160] ss:$16 sps:$4 sm:$0xff]  }
 0x25c   : > { %v2555_v10 = vadd.f32 %v8010_v0, %v2532_v31  ;;  %v2533_v58 = vmul.f32 %v7997_v22, %v2510_v39  ;;  %v6657_v17 = vld [vmem:[%s10290_s10 + $0x180] ss:$16 sps:$4 sm:$0xff]   ;;  %v6665_v39 = vld [vmem:[%s10290_s10 + $0x1c4] ss:$16 sps:$4 sm:$0xff]  }
 0x25d   : > { %v2558_v43 = vadd.f32 %v8010_v0, %v2535_v5  ;;  %v2589_v2 = vadd.f32 %v2557_v56, %v2213_v63  ;;  %v6660_v31 = vld [vmem:[%s10290_s10 + $0x1a0] ss:$16 sps:$4 sm:$0xff]  }
 0x25e   : > { %v2556_v27 = vadd.f32 %v8010_v0, %v2533_v58  ;;  %3966 = vmatpush1.bf16.msra.mxu1 %v6651_v9  ;;  %v2587_v20 = vadd.f32 %v2555_v10, %v2205_v7  ;;  %v6663_v9 = vld [vmem:[%s10290_s10 + $0x1c0] ss:$16 sps:$4 sm:$0xff]   ;;  %v6679_v58 = vld [vmem:[%s10290_s10 + $0xc] ss:$16 sps:$4 sm:$0xff]  }
 0x25f   : > { %3967 = vmatprep.subr.bf16.mxu1 %v6656_v51  ;;  %v2590_v53 = vadd.f32 %v2558_v43, %v2217_v35  ;;  %v8270_v22 = vpack.c.bf16 %v2558_v43, %v2557_v56  ;;  %v6668_v56 = vld [vmem:[%s10290_s10 + $0x1e4] ss:$16 sps:$4 sm:$0xff]   ;;  %v6666_v35 = vld [vmem:[%s10290_s10 + $0x1e0] ss:$16 sps:$4 sm:$0xff]   ;;  %v6674_v51 = vld [vmem:[%s10286_s6 + $0xa8] sm:$0xff]   ;;  %v8327_v43 = vsub.s32 3, %v7639_v30 }
 0x260   : > { %v2588_v55 = vadd.f32 %v2556_v27, %v2209_v54  ;;  %v8272_v63 = vpack.c.bf16 %v2556_v27, %v2555_v10  ;;  %v6673_v5 = vld [vmem:[%s10286_s6 + $0xa0] sm:$0xff]   ;;  %v6675_v7 = vld [vmem:[%s10286_s6 + $0xb0] sm:$0xff]   ;;  %v6676_v10 = vld [vmem:[%s10286_s6 + $0xb8] sm:$0xff]  }
 0x261   : > { %v2598_v37 = vpack.c.bf16 %v2590_v53, %v2589_v2  ;;  %6386 = vmatprep.subr.bf16.mxu0 %v6673_v5  ;;  %v6926_v2 = vld [vmem:[%s10372_s23] sm:$0xf] }
 0x262   : > { %3968 = vmatpush1.bf16.msra.mxu1 %v6654_v1  ;;  %v2597_v0 = vpack.c.bf16 %v2588_v55, %v2587_v20  ;;  %6387 = vmatpush3.bf16.msra.mxu0 %v6673_v5  ;;  %v8333_v54 = vrot.slane %v6926_v2, %v8327_v43  ;;  %v8346_v53 = vld [vmem:[%s10287_s7 + $0x1] ss:$0 sm:$0xff] }
 0x263   : > { %3969 = vmatprep.subr.bf16.mxu1 %v6659_v11  ;;  %6388 = vmatprep.subr.bf16.mxu0 %v6674_v51  ;;  %v8373_v2 = vld [vmem:[%s10289_s9 + $0x1] ss:$0 sm:$0xff] }
 0x264   : > { %6374 = vmatprep.mubr.bf16.mxu1 %v2597_v0  ;;  %v1930_v27 = vadd.f32 %v8333_v54, %v7895_v32  ;;  %v1922_v1 = vadd.f32 %v8333_v54, %v7883_v21  ;;  %v1934_v20 = vadd.f32 %v8333_v54, %v7897_v44  ;;  %v1926_v11 = vadd.f32 %v8333_v54, %v7885_v47  ;;  %v6927_v32 = vld [vmem:[%s10374_s3] sm:$0xf] }
 0x265   : > { %6375 = vmatmul.mubr.bf16.gmra.mrb[76].mxu1 %v2598_v37  ;;  %v8352_v0 = vrot.slane %v6927_v32, %v8327_v43 }
 0x266   : > { %3970 = vmatpush1.bf16.msra.mxu1 %v6657_v17  ;;  %3977 = vmatprep.mubr.bf16.mxu1 %v8046_v60  ;;  %v1994_v55 = vmax.f32 %v1930_v27, 0.0  ;;  %v1986_v37 = vmax.f32 %v1922_v1, 0.0  ;;  %v1998_v17 = vmax.f32 %v1934_v20, 0.0  ;;  %v1990_v47 = vmax.f32 %v1926_v11, 0.0 }
 0x267   : > { %3971 = vmatprep.subr.bf16.mxu1 %v6662_v34  ;;  %6389 = vmatpush3.bf16.msra.mxu0 %v6674_v51 }
 0x268   : > { %6390 = vmatprep.subr.bf16.mxu0 %v6675_v7  ;;  %v2084_v20 = vmul.f32 %v8352_v0, %v1998_v17 }
 0x26a   : > { %3972 = vmatpush1.bf16.msra.mxu1 %v6660_v31  ;;  %v8358_v31 = vld [vmem:[%s10288_s8 + $0x1] ss:$0 sm:$0xff] }
 0x26b   : > { %3973 = vmatprep.subr.bf16.mxu1 %v6665_v39  ;;  %6391 = vmatpush3.bf16.msra.mxu0 %v6675_v7  ;;  %v2072_v7 = vmul.f32 %v8352_v0, %v1986_v37  ;;  %v2076_v37 = vmul.f32 %v8352_v0, %v1990_v47 }
 0x26c   : > { %6392 = vmatprep.subr.bf16.mxu0 %v6676_v10 }
 0x26e   : > { %3974 = vmatpush1.bf16.msra.mxu1 %v6663_v9 }
 0x26f   : > { %3975 = vmatprep.subr.bf16.mxu1 %v6668_v56  ;;  %6393 = vmatpush3.bf16.msra.mxu0 %v6676_v10  ;;  %v2080_v56 = vmul.f32 %v8352_v0, %v1994_v55  ;;  %v6928_v10 = vld [vmem:[%s10284_s4] sm:$0xf] }
 0x270   : > { %4171 = vmatprep.subr.bf16.mxu0 %v6679_v58  ;;  %v8368_v58 = vrot.slane %v6928_v10, %v8327_v43  ;;  %v6725_v10 = vld [vmem:[%s10290_s10 + $0x200] ss:$16 sps:$4 sm:$0xff]  }
 0x272   : > { %3976 = vmatpush1.bf16.msra.mxu1 %v6666_v35 }
 0x275   : > { %3978 = vmatmul.mubr.bf16.vlgmr.msra.gmra.mrb[80].mxu1 %v7720_v24 }
 0x276   : > { %3987 = vmatprep.mubr.bf16.mxu1 %v8040_v49 }
 0x27d   : > { %3988 = vmatmul.mubr.bf16.gmra.mrb[84].mxu1 %v7746_v6 }
 0x27e   : > { %3997 = vmatprep.mubr.bf16.mxu1 %v8140_v62 }
 0x285   : > { %3998 = vmatmul.mubr.bf16.gmra.mrb[88].mxu1 %v7765_v25 }
 0x286   : > { %4007 = vmatprep.mubr.bf16.mxu1 %v8134_v29 }
 0x28d   : > { %4008 = vmatmul.mubr.bf16.gmra.mrb[92].mxu1 %v7781_v13 }
 0x28e   : > { %4017 = vmatprep.mubr.bf16.mxu1 %v8216_v33 }
 0x295   : > { %4018 = vmatmul.mubr.bf16.gmra.mrb[96].mxu1 %v7797_v41 }
 0x296   : > { %4027 = vmatprep.mubr.bf16.mxu1 %v8210_v19 }
 0x29d   : > { %4028 = vmatmul.mubr.bf16.gmra.mrb[100].mxu1 %v7813_v15 }
 0x29e   : > { %4037 = vmatprep.mubr.bf16.mxu1 %v8272_v63 }
 0x2a5   : > { %4038 = vmatmul.mubr.bf16.gmra.mrb[104].mxu1 %v7829_v40 }
 0x2a6   : > { %4047 = vmatprep.mubr.bf16.mxu1 %v8270_v22 }
 0x2ad   : > { %4048 = vmatmul.mubr.bf16.gmra.mrb[108].mxu1 %v7849_v46 }
 0x308   : > { %v6364_v21 = vpop.f32.mrb[64].mxu1 }
 0x309   : > { %v2715_v44 = vadd.f32 %v6364_v21, %v8346_v53  ;;  %v2706_v34 = vpop.f32.mrb[65].mxu1 }
 0x30a   : > { %v2707_v39 = vadd.f32 %v8346_v53, %v2706_v34  ;;  %v6365_v9 = vpop.f32.mrb[66].mxu1 }
 0x30b   : > { %v2771_v35 = vmax.f32 %v2715_v44, 0.0  ;;  %v2718_v5 = vadd.f32 %v6365_v9, %v8346_v53  ;;  %v2709_v51 = vpop.f32.mrb[67].mxu1  ;;  %v2166_v44 = vadd.f32 %v8368_v58, %v2080_v56  ;;  %v6727_v56 = vld [vmem:[%s10290_s10 + $0x204] ss:$16 sps:$4 sm:$0xff]  }
 0x30c   : > { %v2769_v27 = vmax.f32 %v2707_v39, 0.0  ;;  %v2710_v1 = vadd.f32 %v8346_v53, %v2709_v51  ;;  %v2158_v39 = vadd.f32 %v8368_v58, %v2072_v7  ;;  %4058 = vmatprep.subr.bf16.mxu1 %v6727_v56 }
 0x30d   : > { %v2795_v11 = vmul.f32 %v8358_v31, %v2771_v35  ;;  %v2772_v55 = vmax.f32 %v2718_v5, 0.0  ;;  %v2170_v35 = vadd.f32 %v8368_v58, %v2084_v20  ;;  %v6733_v20 = vld [vmem:[%s10290_s10 + $0x224] ss:$16 sps:$4 sm:$0xff]   ;;  %4059 = vmatpush1.bf16.msra.mxu1 %v6725_v10  ;;  %v6737_v10 = vld [vmem:[%s10290_s10 + $0x240] ss:$16 sps:$4 sm:$0xff]  }
 0x30e   : > { %v2793_v32 = vmul.f32 %v8358_v31, %v2769_v27  ;;  %v2770_v21 = vmax.f32 %v2710_v1, 0.0  ;;  %v2162_v27 = vadd.f32 %v8368_v58, %v2076_v37  ;;  %4060 = vmatprep.subr.bf16.mxu1 %v6733_v20 }
 0x30f   : > { %v2819_v34 = vadd.f32 %v8373_v2, %v2795_v11  ;;  %v2796_v9 = vmul.f32 %v8358_v31, %v2772_v55  ;;  %v1946_v11 = vadd.f32 %v8333_v54, %v7934_v59  ;;  %v6739_v59 = vld [vmem:[%s10290_s10 + $0x244] ss:$16 sps:$4 sm:$0xff]  }
 0x310   : > { %v2817_v51 = vadd.f32 %v8373_v2, %v2793_v32  ;;  %v2794_v17 = vmul.f32 %v8358_v31, %v2770_v21  ;;  %v1938_v21 = vadd.f32 %v8333_v54, %v7912_v50  ;;  %v1942_v50 = vadd.f32 %v8333_v54, %v7919_v52 }
 0x311   : > { %v2851_v5 = vadd.f32 %v2819_v34, %v2166_v44  ;;  %v2820_v47 = vadd.f32 %v8373_v2, %v2796_v9  ;;  %v6731_v9 = vld [vmem:[%s10290_s10 + $0x220] ss:$16 sps:$4 sm:$0xff]  }
 0x312   : > { %v2818_v7 = vadd.f32 %v8373_v2, %v2794_v17  ;;  %v2849_v1 = vadd.f32 %v2817_v51, %v2158_v39  ;;  %v1950_v39 = vadd.f32 %v8333_v54, %v7938_v14  ;;  %v2002_v14 = vmax.f32 %v1938_v21, 0.0  ;;  %4061 = vmatpush1.bf16.msra.mxu1 %v6731_v9 }
 0x313   : > { %v2852_v55 = vadd.f32 %v2820_v47, %v2170_v35  ;;  %v8401_v32 = vpack.c.bf16 %v2820_v47, %v2819_v34  ;;  %v2010_v35 = vmax.f32 %v1946_v11, 0.0  ;;  %v6682_v47 = vld [vmem:[%s10290_s10 + $0x2c] ss:$16 sps:$4 sm:$0xff]   ;;  %4062 = vmatprep.subr.bf16.mxu1 %v6739_v59 }
 0x314   : > { %v8405_v44 = vpack.c.bf16 %v2818_v7, %v2817_v51  ;;  %v2850_v37 = vadd.f32 %v2818_v7, %v2162_v27  ;;  %v6677_v51 = vld [vmem:[%s10290_s10 + $0x8] ss:$16 sps:$4 sm:$0xff]   ;;  %v2014_v56 = vmax.f32 %v1950_v39, 0.0  ;;  %v6745_v7 = vld [vmem:[%s10290_s10 + $0x264] ss:$16 sps:$4 sm:$0xff]   ;;  %v2088_v59 = vmul.f32 %v8352_v0, %v2002_v14 }
 0x315   : > { %v2866_v17 = vpack.c.bf16 %v2852_v55, %v2851_v5  ;;  %v6680_v55 = vld [vmem:[%s10290_s10 + $0x28] ss:$16 sps:$4 sm:$0xff]   ;;  %v2096_v21 = vmul.f32 %v8352_v0, %v2010_v35 }
 0x316   : > { %v2865_v34 = vpack.c.bf16 %v2850_v37, %v2849_v1  ;;  %v2006_v1 = vmax.f32 %v1942_v50, 0.0  ;;  %4063 = vmatpush1.bf16.msra.mxu1 %v6737_v10  ;;  %v2100_v35 = vmul.f32 %v8352_v0, %v2014_v56  ;;  %v6683_v10 = vld [vmem:[%s10290_s10 + $0x48] ss:$16 sps:$4 sm:$0xff]  }
 0x317   : > { %4064 = vmatprep.subr.bf16.mxu1 %v6745_v7  ;;  %v2182_v56 = vadd.f32 %v8368_v58, %v2096_v21  ;;  %v6749_v21 = vld [vmem:[%s10290_s10 + $0x280] ss:$16 sps:$4 sm:$0xff]  }
 0x318   : > { %v6368_v5 = vpop.f32.mrb[68].mxu1  ;;  %6394 = vmatprep.mubr.bf16.mxu0 %v2865_v34  ;;  %v2092_v14 = vmul.f32 %v8352_v0, %v2006_v1  ;;  %v2174_v1 = vadd.f32 %v8368_v58, %v2088_v59 }
 0x319   : > { %v2731_v52 = vadd.f32 %v6368_v5, %v8346_v53  ;;  %v2722_v27 = vpop.f32.mrb[69].mxu1  ;;  %6395 = vmatmul.mubr.bf16.vlgmr.msra.gmra.mrb[80].mxu0 %v2866_v17  ;;  %v6685_v17 = vld [vmem:[%s10290_s10 + $0x4c] ss:$16 sps:$4 sm:$0xff]  }
 0x31a   : > { %v2723_v20 = vadd.f32 %v8346_v53, %v2722_v27  ;;  %4172 = vmatpush1.bf16.msra.mxu0 %v6677_v51  ;;  %v6369_v11 = vpop.f32.mrb[70].mxu1  ;;  %v6743_v51 = vld [vmem:[%s10290_s10 + $0x260] ss:$16 sps:$4 sm:$0xff]   ;;  %v2178_v59 = vadd.f32 %v8368_v58, %v2092_v14  ;;  %v1954_v14 = vadd.f32 %v8333_v54, %v7942_v48  ;;  %v1958_v48 = vadd.f32 %v8333_v54, %v7946_v57 }
 0x31b   : > { %v2775_v37 = vmax.f32 %v2731_v52, 0.0  ;;  %v2734_v9 = vadd.f32 %v6369_v11, %v8346_v53  ;;  %v2725_v39 = vpop.f32.mrb[71].mxu1  ;;  %4173 = vmatprep.subr.bf16.mxu0 %v6682_v47  ;;  %v6751_v47 = vld [vmem:[%s10290_s10 + $0x284] ss:$16 sps:$4 sm:$0xff]   ;;  %4065 = vmatpush1.bf16.msra.mxu1 %v6743_v51  ;;  %v6686_v51 = vld [vmem:[%s10290_s10 + $0x68] ss:$16 sps:$4 sm:$0xff]  }
 0x31c   : > { %v2773_v50 = vmax.f32 %v2723_v20, 0.0  ;;  %v2726_v34 = vadd.f32 %v8346_v53, %v2725_v39  ;;  %v2186_v39 = vadd.f32 %v8368_v58, %v2100_v35  ;;  %4066 = vmatprep.subr.bf16.mxu1 %v6751_v47  ;;  %v1962_v35 = vadd.f32 %v8333_v54, %v7950_v36  ;;  %v6691_v47 = vld [vmem:[%s10290_s10 + $0x8c] ss:$16 sps:$4 sm:$0xff]   ;;  %v6761_v57 = vld [vmem:[%s10290_s10 + $0x2c0] ss:$16 sps:$4 sm:$0xff]  }
 0x31d   : > { %v2799_v5 = vmul.f32 %v8358_v31, %v2775_v37  ;;  %v2776_v52 = vmax.f32 %v2734_v9, 0.0  ;;  %v6688_v37 = vld [vmem:[%s10290_s10 + $0x6c] ss:$16 sps:$4 sm:$0xff]   ;;  %v1966_v36 = vadd.f32 %v8333_v54, %v7954_v38 }
 0x31e   : > { %v2797_v27 = vmul.f32 %v8358_v31, %v2773_v50  ;;  %v2774_v20 = vmax.f32 %v2726_v34, 0.0  ;;  %4174 = vmatpush1.bf16.msra.mxu0 %v6680_v55  ;;  %v6757_v34 = vld [vmem:[%s10290_s10 + $0x2a4] ss:$16 sps:$4 sm:$0xff]   ;;  %v6694_v38 = vld [vmem:[%s10290_s10 + $0xac] ss:$16 sps:$4 sm:$0xff]  }
 0x31f   : > { %v2823_v11 = vadd.f32 %v8373_v2, %v2799_v5  ;;  %v2800_v7 = vmul.f32 %v8358_v31, %v2776_v52  ;;  %4175 = vmatprep.subr.bf16.mxu0 %v6685_v17  ;;  %4067 = vmatpush1.bf16.msra.mxu1 %v6749_v21  ;;  %v2018_v21 = vmax.f32 %v1954_v14, 0.0 }
 0x320   : > { %v2821_v9 = vadd.f32 %v8373_v2, %v2797_v27  ;;  %v2798_v55 = vmul.f32 %v8358_v31, %v2774_v20  ;;  %4068 = vmatprep.subr.bf16.mxu1 %v6757_v34 }
 0x321   : > { %v2824_v50 = vadd.f32 %v8373_v2, %v2800_v7  ;;  %v2855_v17 = vadd.f32 %v2823_v11, %v2182_v56  ;;  %v6755_v56 = vld [vmem:[%s10290_s10 + $0x2a0] ss:$16 sps:$4 sm:$0xff]  }
 0x322   : > { %v2822_v5 = vadd.f32 %v8373_v2, %v2798_v55  ;;  %4176 = vmatpush1.bf16.msra.mxu0 %v6683_v10  ;;  %v2853_v52 = vadd.f32 %v2821_v9, %v2174_v1  ;;  %v6689_v55 = vld [vmem:[%s10290_s10 + $0x88] ss:$16 sps:$4 sm:$0xff]  }
 0x323   : > { %4177 = vmatprep.subr.bf16.mxu0 %v6688_v37  ;;  %v2856_v27 = vadd.f32 %v2824_v50, %v2186_v39  ;;  %v8481_v20 = vpack.c.bf16 %v2824_v50, %v2823_v11  ;;  %v6763_v11 = vld [vmem:[%s10290_s10 + $0x2c4] ss:$16 sps:$4 sm:$0xff]   ;;  %4069 = vmatpush1.bf16.msra.mxu1 %v6755_v56  ;;  %v2030_v50 = vmax.f32 %v1966_v36, 0.0  ;;  %v6697_v56 = vld [vmem:[%s10290_s10 + $0xcc] ss:$16 sps:$4 sm:$0xff]   ;;  %v2104_v36 = vmul.f32 %v8352_v0, %v2018_v21 }
 0x324   : > { %v2854_v10 = vadd.f32 %v2822_v5, %v2178_v59  ;;  %v8488_v7 = vpack.c.bf16 %v2822_v5, %v2821_v9  ;;  %v2026_v9 = vmax.f32 %v1962_v35, 0.0  ;;  %4070 = vmatprep.subr.bf16.mxu1 %v6763_v11  ;;  %v6769_v59 = vld [vmem:[%s10290_s10 + $0x2e4] ss:$16 sps:$4 sm:$0xff]   ;;  %v2022_v5 = vmax.f32 %v1958_v48, 0.0  ;;  %v6692_v35 = vld [vmem:[%s10290_s10 + $0xa8] ss:$16 sps:$4 sm:$0xff]  }
 0x325   : > { %v2868_v37 = vpack.c.bf16 %v2856_v27, %v2855_v17  ;;  %v6767_v48 = vld [vmem:[%s10290_s10 + $0x2e0] ss:$16 sps:$4 sm:$0xff]  }
 0x326   : > { %4178 = vmatpush1.bf16.msra.mxu0 %v6686_v51  ;;  %v2867_v1 = vpack.c.bf16 %v2854_v10, %v2853_v52  ;;  %v2108_v21 = vmul.f32 %v8352_v0, %v2022_v5  ;;  %v2190_v5 = vadd.f32 %v8368_v58, %v2104_v36 }
 0x327   : > { %4179 = vmatprep.subr.bf16.mxu0 %v6691_v47  ;;  %v2112_v47 = vmul.f32 %v8352_v0, %v2026_v9  ;;  %4071 = vmatpush1.bf16.msra.mxu1 %v6761_v57  ;;  %v6695_v57 = vld [vmem:[%s10290_s10 + $0xc8] ss:$16 sps:$4 sm:$0xff]  }
 0x328   : > { %v6372_v39 = vpop.f32.mrb[72].mxu1  ;;  %6398 = vmatprep.mubr.bf16.mxu0 %v2867_v1  ;;  %v2116_v1 = vmul.f32 %v8352_v0, %v2030_v50  ;;  %4072 = vmatprep.subr.bf16.mxu1 %v6769_v59  ;;  %v2194_v36 = vadd.f32 %v8368_v58, %v2108_v21  ;;  %v1970_v21 = vadd.f32 %v8333_v54, %v7958_v23 }
 0x329   : > { %v2747_v17 = vadd.f32 %v6372_v39, %v8346_v53  ;;  %v2738_v34 = vpop.f32.mrb[73].mxu1  ;;  %6399 = vmatmul.mubr.bf16.gmra.mrb[84].mxu0 %v2868_v37  ;;  %v2198_v50 = vadd.f32 %v8368_v58, %v2112_v47  ;;  %v6773_v47 = vld [vmem:[%s10290_s10 + $0x300] ss:$16 sps:$4 sm:$0xff]   ;;  %v1974_v23 = vadd.f32 %v8333_v54, %v7962_v28 }
 0x32a   : > { %v2739_v51 = vadd.f32 %v8346_v53, %v2738_v34  ;;  %4180 = vmatpush1.bf16.msra.mxu0 %v6689_v55  ;;  %v6373_v52 = vpop.f32.mrb[74].mxu1  ;;  %v6785_v28 = vld [vmem:[%s10290_s10 + $0x340] ss:$16 sps:$4 sm:$0xff]  }
 0x32b   : > { %v2779_v27 = vmax.f32 %v2747_v17, 0.0  ;;  %v2750_v14 = vadd.f32 %v6373_v52, %v8346_v53  ;;  %v2741_v10 = vpop.f32.mrb[75].mxu1  ;;  %4181 = vmatprep.subr.bf16.mxu0 %v6694_v38  ;;  %v6775_v38 = vld [vmem:[%s10290_s10 + $0x304] ss:$16 sps:$4 sm:$0xff]   ;;  %4073 = vmatpush1.bf16.msra.mxu1 %v6767_v48 }
 0x32c   : > { %v2777_v37 = vmax.f32 %v2739_v51, 0.0  ;;  %v2742_v11 = vadd.f32 %v8346_v53, %v2741_v10  ;;  %v6700_v51 = vld [vmem:[%s10290_s10 + $0xec] ss:$16 sps:$4 sm:$0xff]   ;;  %4074 = vmatprep.subr.bf16.mxu1 %v6775_v38 }
 0x32d   : > { %v2803_v55 = vmul.f32 %v8358_v31, %v2779_v27  ;;  %v2780_v9 = vmax.f32 %v2750_v14, 0.0  ;;  %v2202_v27 = vadd.f32 %v8368_v58, %v2116_v1  ;;  %v1978_v1 = vadd.f32 %v8333_v54, %v7966_v26 }
 0x32e   : > { %v2801_v39 = vmul.f32 %v8358_v31, %v2777_v37  ;;  %v2778_v17 = vmax.f32 %v2742_v11, 0.0  ;;  %4182 = vmatpush1.bf16.msra.mxu0 %v6692_v35  ;;  %v6698_v11 = vld [vmem:[%s10290_s10 + $0xe8] ss:$16 sps:$4 sm:$0xff]   ;;  %v1982_v26 = vadd.f32 %v8333_v54, %v7970_v45  ;;  %v6706_v45 = vld [vmem:[%s10290_s10 + $0x12c] ss:$16 sps:$4 sm:$0xff]  }
 0x32f   : > { %v2827_v34 = vadd.f32 %v8373_v2, %v2803_v55  ;;  %v2804_v59 = vmul.f32 %v8358_v31, %v2780_v9  ;;  %4183 = vmatprep.subr.bf16.mxu0 %v6697_v56  ;;  %v6781_v56 = vld [vmem:[%s10290_s10 + $0x324] ss:$16 sps:$4 sm:$0xff]   ;;  %v6703_v55 = vld [vmem:[%s10290_s10 + $0x10c] ss:$16 sps:$4 sm:$0xff]   ;;  %4075 = vmatpush1.bf16.msra.mxu1 %v6773_v47 }
 0x330   : > { %v2825_v52 = vadd.f32 %v8373_v2, %v2801_v39  ;;  %v2802_v35 = vmul.f32 %v8358_v31, %v2778_v17  ;;  %v6779_v17 = vld [vmem:[%s10290_s10 + $0x320] ss:$16 sps:$4 sm:$0xff]   ;;  %4076 = vmatprep.subr.bf16.mxu1 %v6781_v56  ;;  %v2046_v54 = vmax.f32 %v1982_v26, 0.0 }
 0x331   : > { %v2828_v14 = vadd.f32 %v8373_v2, %v2804_v59  ;;  %v2859_v10 = vadd.f32 %v2827_v34, %v2198_v50  ;;  %v6791_v26 = vld [vmem:[%s10290_s10 + $0x360] ss:$16 sps:$4 sm:$0xff]  }
 0x332   : > { %v2826_v37 = vadd.f32 %v8373_v2, %v2802_v35  ;;  %4184 = vmatpush1.bf16.msra.mxu0 %v6695_v57  ;;  %v2857_v48 = vadd.f32 %v2825_v52, %v2190_v5  ;;  %v2042_v5 = vmax.f32 %v1978_v1, 0.0 }
 0x333   : > { %4185 = vmatprep.subr.bf16.mxu0 %v6700_v51  ;;  %v2860_v9 = vadd.f32 %v2828_v14, %v2202_v27  ;;  %v8561_v38 = vpack.c.bf16 %v2828_v14, %v2827_v34  ;;  %v6787_v34 = vld [vmem:[%s10290_s10 + $0x344] ss:$16 sps:$4 sm:$0xff]   ;;  %v6701_v51 = vld [vmem:[%s10290_s10 + $0x108] ss:$16 sps:$4 sm:$0xff]   ;;  %4077 = vmatpush1.bf16.msra.mxu1 %v6779_v17 }
 0x334   : > { %v2858_v39 = vadd.f32 %v2826_v37, %v2194_v36  ;;  %v8568_v57 = vpack.c.bf16 %v2826_v37, %v2825_v52  ;;  %v2034_v52 = vmax.f32 %v1970_v21, 0.0  ;;  %4078 = vmatprep.subr.bf16.mxu1 %v6787_v34  ;;  %v6793_v14 = vld [vmem:[%s10290_s10 + $0x364] ss:$16 sps:$4 sm:$0xff]   ;;  %v6704_v37 = vld [vmem:[%s10290_s10 + $0x128] ss:$16 sps:$4 sm:$0xff]  }
 0x335   : > { %v2870_v50 = vpack.c.bf16 %v2860_v9, %v2859_v10  ;;  %v2038_v10 = vmax.f32 %v1974_v23, 0.0  ;;  %v6709_v9 = vld [vmem:[%s10290_s10 + $0x14c] ss:$16 sps:$4 sm:$0xff]  }
 0x336   : > { %4186 = vmatpush1.bf16.msra.mxu0 %v6698_v11  ;;  %v2869_v59 = vpack.c.bf16 %v2858_v39, %v2857_v48  ;;  %v2128_v11 = vmul.f32 %v8352_v0, %v2042_v5  ;;  %v2120_v21 = vmul.f32 %v8352_v0, %v2034_v52 }
 0x337   : > { %4187 = vmatprep.subr.bf16.mxu0 %v6703_v55  ;;  %4079 = vmatpush1.bf16.msra.mxu1 %v6785_v28 }
 0x338   : > { %v6376_v35 = vpop.f32.mrb[76].mxu1  ;;  %6402 = vmatprep.mubr.bf16.mxu0 %v2869_v59  ;;  %4080 = vmatprep.subr.bf16.mxu1 %v6793_v14  ;;  %v6799_v59 = vld [vmem:[%s10290_s10 + $0x384] ss:$16 sps:$4 sm:$0xff]   ;;  %v2214_v52 = vadd.f32 %v8368_v58, %v2128_v11  ;;  %v6797_v14 = vld [vmem:[%s10290_s10 + $0x380] ss:$16 sps:$4 sm:$0xff]  }
 0x339   : > { %v2763_v47 = vadd.f32 %v6376_v35, %v8346_v53  ;;  %v2754_v27 = vpop.f32.mrb[77].mxu1  ;;  %6403 = vmatmul.mubr.bf16.gmra.mrb[88].mxu0 %v2870_v50  ;;  %v2132_v50 = vmul.f32 %v8352_v0, %v2046_v54  ;;  %v6712_v54 = vld [vmem:[%s10290_s10 + $0x16c] ss:$16 sps:$4 sm:$0xff]  }
 0x33a   : > { %v2755_v56 = vadd.f32 %v8346_v53, %v2754_v27  ;;  %4188 = vmatpush1.bf16.msra.mxu0 %v6701_v51  ;;  %v6377_v36 = vpop.f32.mrb[78].mxu1  ;;  %v2124_v51 = vmul.f32 %v8352_v0, %v2038_v10  ;;  %v2206_v0 = vadd.f32 %v8368_v58, %v2120_v21 }
 0x33b   : > { %v2783_v48 = vmax.f32 %v2763_v47, 0.0  ;;  %v2766_v1 = vadd.f32 %v6377_v36, %v8346_v53  ;;  %v2757_v55 = vpop.f32.mrb[79].mxu1  ;;  %4189 = vmatprep.subr.bf16.mxu0 %v6706_v45  ;;  %v6707_v45 = vld [vmem:[%s10290_s10 + $0x148] ss:$16 sps:$4 sm:$0xff]   ;;  %4081 = vmatpush1.bf16.msra.mxu1 %v6791_v26  ;;  %v2218_v10 = vadd.f32 %v8368_v58, %v2132_v50  ;;  %v6718_v26 = vld [vmem:[%s10290_s10 + $0x1ac] ss:$16 sps:$4 sm:$0xff]  }
 0x33c   : > { %v2781_v39 = vmax.f32 %v2755_v56, 0.0  ;;  %v2758_v17 = vadd.f32 %v8346_v53, %v2757_v55  ;;  %4082 = vmatprep.subr.bf16.mxu1 %v6799_v59  ;;  %v6716_v50 = vld [vmem:[%s10290_s10 + $0x1a8] ss:$16 sps:$4 sm:$0xff]   ;;  %v6724_v59 = vld [vmem:[%s10290_s10 + $0x1ec] ss:$16 sps:$4 sm:$0xff]  }
 0x33d   : > { %v2807_v34 = vmul.f32 %v8358_v31, %v2783_v48  ;;  %v2784_v23 = vmax.f32 %v2766_v1, 0.0  ;;  %v6715_v1 = vld [vmem:[%s10290_s10 + $0x18c] ss:$16 sps:$4 sm:$0xff]  }
 0x33e   : > { %v2805_v5 = vmul.f32 %v8358_v31, %v2781_v39  ;;  %v2782_v53 = vmax.f32 %v2758_v17, 0.0  ;;  %4190 = vmatpush1.bf16.msra.mxu0 %v6704_v37  ;;  %v2210_v37 = vadd.f32 %v8368_v58, %v2124_v51  ;;  %v6713_v17 = vld [vmem:[%s10290_s10 + $0x188] ss:$16 sps:$4 sm:$0xff]   ;;  %v6730_v51 = vld [vmem:[%s10290_s10 + $0x20c] ss:$16 sps:$4 sm:$0xff]  }
 0x33f   : > { %v2831_v35 = vadd.f32 %v8373_v2, %v2807_v34  ;;  %v2808_v28 = vmul.f32 %v8358_v31, %v2784_v23  ;;  %4191 = vmatprep.subr.bf16.mxu0 %v6709_v9  ;;  %4083 = vmatpush1.bf16.msra.mxu1 %v6797_v14  ;;  %v6721_v34 = vld [vmem:[%s10290_s10 + $0x1cc] ss:$16 sps:$4 sm:$0xff]   ;;  %v6719_v23 = vld [vmem:[%s10290_s10 + $0x1c8] ss:$16 sps:$4 sm:$0xff]  }
 0x340   : > { %v2829_v47 = vadd.f32 %v8373_v2, %v2805_v5  ;;  %v2806_v27 = vmul.f32 %v8358_v31, %v2782_v53  ;;  %v6710_v31 = vld [vmem:[%s10290_s10 + $0x168] ss:$16 sps:$4 sm:$0xff]   ;;  %v6736_v53 = vld [vmem:[%s10290_s10 + $0x22c] ss:$16 sps:$4 sm:$0xff]  }
 0x341   : > { %v2832_v56 = vadd.f32 %v8373_v2, %v2808_v28  ;;  %v2863_v36 = vadd.f32 %v2831_v35, %v2214_v52  ;;  %v6728_v5 = vld [vmem:[%s10290_s10 + $0x208] ss:$16 sps:$4 sm:$0xff]   ;;  %v6742_v52 = vld [vmem:[%s10290_s10 + $0x24c] ss:$16 sps:$4 sm:$0xff]  }
 0x342   : > { %v2830_v11 = vadd.f32 %v8373_v2, %v2806_v27  ;;  %4192 = vmatpush1.bf16.msra.mxu0 %v6707_v45  ;;  %v2861_v48 = vadd.f32 %v2829_v47, %v2206_v0  ;;  %v6734_v45 = vld [vmem:[%s10290_s10 + $0x228] ss:$16 sps:$4 sm:$0xff]   ;;  %v6754_v28 = vld [vmem:[%s10290_s10 + $0x28c] ss:$16 sps:$4 sm:$0xff]   ;;  %v6803_v27 = vld [vmem:[%s10290_s10 + $0x3a0] ss:$16 sps:$4 sm:$0xff]  }
 0x343   : > { %4193 = vmatprep.subr.bf16.mxu0 %v6712_v54  ;;  %v2864_v55 = vadd.f32 %v2832_v56, %v2218_v10  ;;  %v8636_v9 = vpack.c.bf16 %v2832_v56, %v2831_v35  ;;  %v6740_v35 = vld [vmem:[%s10290_s10 + $0x248] ss:$16 sps:$4 sm:$0xff]   ;;  %v6766_v0 = vld [vmem:[%s10290_s10 + $0x2cc] ss:$16 sps:$4 sm:$0xff]   ;;  %v6811_v10 = vld [vmem:[%s10290_s10 + $0x3c4] ss:$16 sps:$4 sm:$0xff]  }
 0x344   : > { %v2862_v21 = vadd.f32 %v2830_v11, %v2210_v37  ;;  %v8638_v39 = vpack.c.bf16 %v2830_v11, %v2829_v47  ;;  %v6752_v54 = vld [vmem:[%s10290_s10 + $0x288] ss:$16 sps:$4 sm:$0xff]   ;;  %v6778_v56 = vld [vmem:[%s10290_s10 + $0x30c] ss:$16 sps:$4 sm:$0xff]   ;;  %v6817_v37 = vld [vmem:[%s10290_s10 + $0x3e4] ss:$16 sps:$4 sm:$0xff]  }
 0x345   : > { %v2872_v58 = vpack.c.bf16 %v2864_v55, %v2863_v36  ;;  %v6764_v47 = vld [vmem:[%s10290_s10 + $0x2c8] ss:$16 sps:$4 sm:$0xff]   ;;  %v6815_v36 = vld [vmem:[%s10290_s10 + $0x3e0] ss:$16 sps:$4 sm:$0xff]   ;;  %v6784_v11 = vld [vmem:[%s10290_s10 + $0x32c] ss:$16 sps:$4 sm:$0xff]  }
 0x346   : > { %4194 = vmatpush1.bf16.msra.mxu0 %v6710_v31  ;;  %v2871_v2 = vpack.c.bf16 %v2862_v21, %v2861_v48  ;;  %v6770_v14 = vld [vmem:[%s10290_s10 + $0x2e8] ss:$16 sps:$4 sm:$0xff]   ;;  %v6790_v48 = vld [vmem:[%s10290_s10 + $0x34c] ss:$16 sps:$4 sm:$0xff]  }
 0x347   : > { %4195 = vmatprep.subr.bf16.mxu0 %v6715_v1  ;;  %v6782_v31 = vld [vmem:[%s10290_s10 + $0x328] ss:$16 sps:$4 sm:$0xff]   ;;  %v6802_v55 = vld [vmem:[%s10290_s10 + $0x38c] ss:$16 sps:$4 sm:$0xff]  }
 0x348   : > { %6406 = vmatprep.mubr.bf16.mxu0 %v2871_v2  ;;  %v6788_v1 = vld [vmem:[%s10290_s10 + $0x348] ss:$16 sps:$4 sm:$0xff]  }
 0x349   : > { %6407 = vmatmul.mubr.bf16.gmra.mrb[92].mxu0 %v2872_v58  ;;  %v6800_v21 = vld [vmem:[%s10290_s10 + $0x388] ss:$16 sps:$4 sm:$0xff]   ;;  %v6814_v58 = vld [vmem:[%s10290_s10 + $0x3cc] ss:$16 sps:$4 sm:$0xff]  }
 0x34a   : > { %4196 = vmatpush1.bf16.msra.mxu0 %v6713_v17  ;;  %4203 = vmatprep.mubr.bf16.mxu0 %v8046_v60  ;;  %v6722_v60 = vld [vmem:[%s10290_s10 + $0x1e8] ss:$16 sps:$4 sm:$0xff]   ;;  %v8794_v17 = vld [vmem:[%s10287_s7 + $0x2] ss:$0 sm:$0xff] }
 0x34b   : > { %4197 = vmatprep.subr.bf16.mxu0 %v6718_v26  ;;  %v6812_v2 = vld [vmem:[%s10290_s10 + $0x3c8] ss:$16 sps:$4 sm:$0xff]  }
 0x34e   : > { %4198 = vmatpush1.bf16.msra.mxu0 %v6716_v50 }
 0x34f   : > { %4199 = vmatprep.subr.bf16.mxu0 %v6721_v34 }
 0x352   : > { %4200 = vmatpush1.bf16.msra.mxu0 %v6719_v23 }
 0x353   : > { %4201 = vmatprep.subr.bf16.mxu0 %v6724_v59 }
 0x356   : > { %4202 = vmatpush1.bf16.msra.mxu0 %v6722_v60 }
 0x357   : > { %4284 = vmatprep.subr.bf16.mxu0 %v6730_v51 }
 0x359   : > { %4204 = vmatmul.mubr.bf16.vlgmr.msra.gmra.mrb[96].mxu0 %v7720_v24  ;;  %v6748_v24 = vld [vmem:[%s10290_s10 + $0x26c] ss:$16 sps:$4 sm:$0xff]  }
 0x35a   : > { %4213 = vmatprep.mubr.bf16.mxu0 %v8040_v49  ;;  %4285 = vmatpush1.bf16.msra.mxu0 %v6728_v5  ;;  %v6746_v49 = vld [vmem:[%s10290_s10 + $0x268] ss:$16 sps:$4 sm:$0xff]  }
 0x35b   : > { %4286 = vmatprep.subr.bf16.mxu0 %v6736_v53 }
 0x35e   : > { %4287 = vmatpush1.bf16.msra.mxu0 %v6734_v45 }
 0x35f   : > { %4288 = vmatprep.subr.bf16.mxu0 %v6742_v52 }
 0x361   : > { %4214 = vmatmul.mubr.bf16.gmra.mrb[100].mxu0 %v7746_v6  ;;  %v6760_v6 = vld [vmem:[%s10290_s10 + $0x2ac] ss:$16 sps:$4 sm:$0xff]  }
 0x362   : > { %4223 = vmatprep.mubr.bf16.mxu0 %v8140_v62  ;;  %4289 = vmatpush1.bf16.msra.mxu0 %v6740_v35  ;;  %v6758_v62 = vld [vmem:[%s10290_s10 + $0x2a8] ss:$16 sps:$4 sm:$0xff]  }
 0x363   : > { %4290 = vmatprep.subr.bf16.mxu0 %v6748_v24  ;;  %v8809_v24 = vld [vmem:[%s10289_s9 + $0x2] ss:$0 sm:$0xff] }
 0x366   : > { %4291 = vmatpush1.bf16.msra.mxu0 %v6746_v49 }
 0x367   : > { %4292 = vmatprep.subr.bf16.mxu0 %v6754_v28 }
 0x369   : > { %4224 = vmatmul.mubr.bf16.gmra.mrb[104].mxu0 %v7765_v25  ;;  %v6805_v25 = vld [vmem:[%s10290_s10 + $0x3a4] ss:$16 sps:$4 sm:$0xff]  }
 0x36a   : > { %4233 = vmatprep.mubr.bf16.mxu0 %v8134_v29  ;;  %4293 = vmatpush1.bf16.msra.mxu0 %v6752_v54  ;;  %v6772_v29 = vld [vmem:[%s10290_s10 + $0x2ec] ss:$16 sps:$4 sm:$0xff]  }
 0x36b   : > { %4294 = vmatprep.subr.bf16.mxu0 %v6760_v6  ;;  %4084 = vmatprep.subr.bf16.mxu1 %v6805_v25 }
 0x36c   : > { %4085 = vmatpush1.bf16.msra.mxu1 %v6803_v27 }
 0x36d   : > { %4086 = vmatprep.subr.bf16.mxu1 %v6811_v10 }
 0x36e   : > { %4295 = vmatpush1.bf16.msra.mxu0 %v6758_v62 }
 0x36f   : > { %4296 = vmatprep.subr.bf16.mxu0 %v6766_v0 }
 0x371   : > { %4234 = vmatmul.mubr.bf16.gmra.mrb[108].mxu0 %v7781_v13  ;;  %v6809_v13 = vld [vmem:[%s10290_s10 + $0x3c0] ss:$16 sps:$4 sm:$0xff]  }
 0x372   : > { %4243 = vmatprep.mubr.bf16.mxu0 %v8216_v33  ;;  %4297 = vmatpush1.bf16.msra.mxu0 %v6764_v47  ;;  %v6776_v33 = vld [vmem:[%s10290_s10 + $0x308] ss:$16 sps:$4 sm:$0xff]  }
 0x373   : > { %4298 = vmatprep.subr.bf16.mxu0 %v6772_v29  ;;  %4087 = vmatpush1.bf16.msra.mxu1 %v6809_v13 }
 0x374   : > { %4088 = vmatprep.subr.bf16.mxu1 %v6817_v37 }
 0x376   : > { %4299 = vmatpush1.bf16.msra.mxu0 %v6770_v14 }
 0x377   : > { %4300 = vmatprep.subr.bf16.mxu0 %v6778_v56  ;;  %4089 = vmatpush1.bf16.msra.mxu1 %v6815_v36 }
 0x379   : > { %4244 = vmatmul.mubr.bf16.gmra.mrb[112].mxu0 %v7797_v41  ;;  %v6796_v41 = vld [vmem:[%s10290_s10 + $0x36c] ss:$16 sps:$4 sm:$0xff]  }
 0x37a   : > { %4253 = vmatprep.mubr.bf16.mxu0 %v8210_v19  ;;  %4301 = vmatpush1.bf16.msra.mxu0 %v6776_v33  ;;  %v6794_v19 = vld [vmem:[%s10290_s10 + $0x368] ss:$16 sps:$4 sm:$0xff]  }
 0x37b   : > { %4302 = vmatprep.subr.bf16.mxu0 %v6784_v11 }
 0x37e   : > { %4303 = vmatpush1.bf16.msra.mxu0 %v6782_v31 }
 0x37f   : > { %4304 = vmatprep.subr.bf16.mxu0 %v6790_v48 }
 0x381   : > { %4254 = vmatmul.mubr.bf16.gmra.mrb[116].mxu0 %v7813_v15  ;;  %v6808_v15 = vld [vmem:[%s10290_s10 + $0x3ac] ss:$16 sps:$4 sm:$0xff]  }
 0x382   : > { %4263 = vmatprep.mubr.bf16.mxu0 %v8272_v63  ;;  %4305 = vmatpush1.bf16.msra.mxu0 %v6788_v1  ;;  %v6806_v63 = vld [vmem:[%s10290_s10 + $0x3a8] ss:$16 sps:$4 sm:$0xff]  }
 0x383   : > { %4306 = vmatprep.subr.bf16.mxu0 %v6796_v41 }
 0x386   : > { %4307 = vmatpush1.bf16.msra.mxu0 %v6794_v19 }
 0x387   : > { %4308 = vmatprep.subr.bf16.mxu0 %v6802_v55 }
 0x389   : > { %4264 = vmatmul.mubr.bf16.gmra.mrb[120].mxu0 %v7829_v40  ;;  %v6820_v40 = vld [vmem:[%s10290_s10 + $0x3ec] ss:$16 sps:$4 sm:$0xff]  }
 0x38a   : > { %4273 = vmatprep.mubr.bf16.mxu0 %v8270_v22  ;;  %4309 = vmatpush1.bf16.msra.mxu0 %v6800_v21  ;;  %v6818_v22 = vld [vmem:[%s10290_s10 + $0x3e8] ss:$16 sps:$4 sm:$0xff]  }
 0x38b   : > { %4310 = vmatprep.subr.bf16.mxu0 %v6808_v15 }
 0x38e   : > { %4311 = vmatpush1.bf16.msra.mxu0 %v6806_v63 }
 0x38f   : > { %4312 = vmatprep.subr.bf16.mxu0 %v6814_v58 }
 0x391   : > { %4274 = vmatmul.mubr.bf16.gmra.mrb[124].mxu0 %v7849_v46  ;;  %v8800_v46 = vld [vmem:[%s10288_s8 + $0x2] ss:$0 sm:$0xff] }
 0x392   : > { %4313 = vmatpush1.bf16.msra.mxu0 %v6812_v2 }
 0x393   : > { %4314 = vmatprep.subr.bf16.mxu0 %v6820_v40 }
 0x396   : > { %4315 = vmatpush1.bf16.msra.mxu0 %v6818_v22 }
 0x3ec   : > { %v6396_v26 = vpop.f32.mrb[80].mxu0 }
 0x3ed   : > { %v2989_v50 = vadd.f32 %v6396_v26, %v8794_v17  ;;  %v2980_v34 = vpop.f32.mrb[81].mxu0 }
 0x3ee   : > { %v2981_v23 = vadd.f32 %v8794_v17, %v2980_v34  ;;  %v6397_v59 = vpop.f32.mrb[82].mxu0 }
 0x3ef   : > { %v3045_v60 = vmax.f32 %v2989_v50, 0.0  ;;  %v2992_v51 = vadd.f32 %v6397_v59, %v8794_v17  ;;  %v2983_v5 = vpop.f32.mrb[83].mxu0 }
 0x3f0   : > { %v3043_v53 = vmax.f32 %v2981_v23, 0.0  ;;  %v2984_v45 = vadd.f32 %v8794_v17, %v2983_v5 }
 0x3f1   : > { %v3069_v52 = vmul.f32 %v8800_v46, %v3045_v60  ;;  %v3046_v35 = vmax.f32 %v2992_v51, 0.0 }
 0x3f2   : > { %v3067_v49 = vmul.f32 %v8800_v46, %v3043_v53  ;;  %v3044_v28 = vmax.f32 %v2984_v45, 0.0 }
 0x3f3   : > { %v3070_v54 = vmul.f32 %v8800_v46, %v3046_v35  ;;  %v3093_v62 = vadd.f32 %v8809_v24, %v3069_v52 }
 0x3f4   : > { %v3068_v6 = vmul.f32 %v8800_v46, %v3044_v28  ;;  %v3091_v47 = vadd.f32 %v8809_v24, %v3067_v49 }
 0x3f5   : > { %v3094_v0 = vadd.f32 %v8809_v24, %v3070_v54 }
 0x3f6   : > { %v3092_v25 = vadd.f32 %v8809_v24, %v3068_v6 }
 0x3f7   : > { %v3108_v29 = vpack.c.bf16 %v3094_v0, %v3093_v62 }
 0x3f8   : > { %v3107_v27 = vpack.c.bf16 %v3092_v25, %v3091_v47 }
 0x3fa   : > { %4090 = vmatprep.mubr.bf16.mxu1 %v3107_v27  ;;  %4316 = vmatprep.mubr.bf16.mxu0 %v3107_v27 }
 0x3fb   : > { %4091 = vmatmul.mubr.bf16.vlgmr.msra.gmra.mrb[80].mxu1 %v8405_v44  ;;  %4317 = vmatmul.mubr.bf16.vlgmr.msra.gmra.mrb[96].mxu0 %v8405_v44 }
 0x3fc   : > { %v6400_v14 = vpop.f32.mrb[84].mxu0  ;;  %4100 = vmatprep.mubr.bf16.mxu1 %v3108_v29  ;;  %4326 = vmatprep.mubr.bf16.mxu0 %v3108_v29 }
 0x3fd   : > { %v3005_v10 = vadd.f32 %v6400_v14, %v8794_v17  ;;  %v2996_v56 = vpop.f32.mrb[85].mxu0 }
 0x3fe   : > { %v2997_v13 = vadd.f32 %v8794_v17, %v2996_v56  ;;  %v6401_v33 = vpop.f32.mrb[86].mxu0 }
 0x3ff   : > { %v3049_v36 = vmax.f32 %v3005_v10, 0.0  ;;  %v3008_v37 = vadd.f32 %v6401_v33, %v8794_v17  ;;  %v2999_v11 = vpop.f32.mrb[87].mxu0 }
 0x400   : > { %v3047_v31 = vmax.f32 %v2997_v13, 0.0  ;;  %v3000_v48 = vadd.f32 %v8794_v17, %v2999_v11 }
 0x401   : > { %v3073_v1 = vmul.f32 %v8800_v46, %v3049_v36  ;;  %v3050_v41 = vmax.f32 %v3008_v37, 0.0 }
 0x402   : > { %v3071_v44 = vmul.f32 %v8800_v46, %v3047_v31  ;;  %v3048_v19 = vmax.f32 %v3000_v48, 0.0 }
 0x403   : > { %v3074_v55 = vmul.f32 %v8800_v46, %v3050_v41  ;;  %4101 = vmatmul.mubr.bf16.gmra.mrb[84].mxu1 %v8401_v32  ;;  %4327 = vmatmul.mubr.bf16.gmra.mrb[100].mxu0 %v8401_v32  ;;  %v3097_v15 = vadd.f32 %v8809_v24, %v3073_v1 }
 0x404   : > { %v3072_v21 = vmul.f32 %v8800_v46, %v3048_v19  ;;  %v3095_v58 = vadd.f32 %v8809_v24, %v3071_v44 }
 0x405   : > { %v3098_v63 = vadd.f32 %v8809_v24, %v3074_v55 }
 0x406   : > { %v3096_v2 = vadd.f32 %v8809_v24, %v3072_v21 }
 0x407   : > { %v3110_v40 = vpack.c.bf16 %v3098_v63, %v3097_v15  ;;  %v6827_v63 = vld [vmem:[%s10294_s14 + $0xc8] sm:$0xff]  }
 0x408   : > { %v3109_v22 = vpack.c.bf16 %v3096_v2, %v3095_v58  ;;  %v6826_v58 = vld [vmem:[%s10294_s14 + $0x8] sm:$0xff]  }
 0x409   : > { %v6828_v2 = vld [vmem:[%s10294_s14 + $0x88] sm:$0xff]  }
 0x40a   : > { %4110 = vmatprep.mubr.bf16.mxu1 %v3109_v22  ;;  %4336 = vmatprep.mubr.bf16.mxu0 %v3109_v22  ;;  %v6830_v22 = vld [vmem:[%s10294_s14 + $0x10] sm:$0xff]  }
 0x40b   : > { %4111 = vmatmul.mubr.bf16.gmra.mrb[88].mxu1 %v8488_v7  ;;  %4337 = vmatmul.mubr.bf16.gmra.mrb[104].mxu0 %v8488_v7 }
 0x40c   : > { %v6404_v26 = vpop.f32.mrb[88].mxu0  ;;  %4120 = vmatprep.mubr.bf16.mxu1 %v3110_v40  ;;  %4346 = vmatprep.mubr.bf16.mxu0 %v3110_v40  ;;  %v6829_v40 = vld [vmem:[%s10294_s14 + $0x50] sm:$0xff]  }
 0x40d   : > { %v3021_v32 = vadd.f32 %v6404_v26, %v8794_v17  ;;  %v3012_v50 = vpop.f32.mrb[89].mxu0  ;;  %v6831_v26 = vld [vmem:[%s10294_s14 + $0xd0] sm:$0xff]  }
 0x40e   : > { %v3013_v34 = vadd.f32 %v8794_v17, %v3012_v50  ;;  %v6405_v23 = vpop.f32.mrb[90].mxu0  ;;  %v6833_v50 = vld [vmem:[%s10294_s14 + $0x58] sm:$0xff]  }
 0x40f   : > { %v3053_v59 = vmax.f32 %v3021_v32, 0.0  ;;  %v3024_v60 = vadd.f32 %v6405_v23, %v8794_v17  ;;  %v3015_v51 = vpop.f32.mrb[91].mxu0  ;;  %v6832_v32 = vld [vmem:[%s10294_s14 + $0x90] sm:$0xff]   ;;  %v6835_v23 = vld [vmem:[%s10294_s14 + $0xd8] sm:$0xff]  }
 0x410   : > { %v3051_v5 = vmax.f32 %v3013_v34, 0.0  ;;  %v3016_v53 = vadd.f32 %v8794_v17, %v3015_v51  ;;  %v6834_v34 = vld [vmem:[%s10294_s14 + $0x18] sm:$0xff]   ;;  %v6839_v51 = vld [vmem:[%s10294_s14 + $0xe0] sm:$0xff]  }
 0x411   : > { %v3077_v45 = vmul.f32 %v8800_v46, %v3053_v59  ;;  %v3054_v52 = vmax.f32 %v3024_v60, 0.0  ;;  %v6836_v59 = vld [vmem:[%s10294_s14 + $0x98] sm:$0xff]   ;;  %v6837_v60 = vld [vmem:[%s10294_s14 + $0x60] sm:$0xff]  }
 0x412   : > { %v3075_v7 = vmul.f32 %v8800_v46, %v3051_v5  ;;  %v3052_v35 = vmax.f32 %v3016_v53, 0.0  ;;  %v6838_v5 = vld [vmem:[%s10294_s14 + $0x20] sm:$0xff]  }
 0x413   : > { %v3078_v49 = vmul.f32 %v8800_v46, %v3054_v52  ;;  %4121 = vmatmul.mubr.bf16.gmra.mrb[92].mxu1 %v8481_v20  ;;  %4347 = vmatmul.mubr.bf16.gmra.mrb[108].mxu0 %v8481_v20  ;;  %v3101_v54 = vadd.f32 %v8809_v24, %v3077_v45  ;;  %v6840_v53 = vld [vmem:[%s10294_s14 + $0xa0] sm:$0xff]   ;;  %v6841_v45 = vld [vmem:[%s10294_s14 + $0x68] sm:$0xff]  }
 0x414   : > { %v3076_v28 = vmul.f32 %v8800_v46, %v3052_v35  ;;  %v3099_v62 = vadd.f32 %v8809_v24, %v3075_v7  ;;  %v6843_v52 = vld [vmem:[%s10294_s14 + $0xe8] sm:$0xff]  }
 0x415   : > { %v3102_v6 = vadd.f32 %v8809_v24, %v3078_v49  ;;  %v6842_v7 = vld [vmem:[%s10294_s14 + $0x28] sm:$0xff]   ;;  %v6845_v49 = vld [vmem:[%s10294_s14 + $0x70] sm:$0xff]  }
 0x416   : > { %v3100_v0 = vadd.f32 %v8809_v24, %v3076_v28  ;;  %v6844_v35 = vld [vmem:[%s10294_s14 + $0xa8] sm:$0xff]   ;;  %v6847_v28 = vld [vmem:[%s10294_s14 + $0xf0] sm:$0xff]  }
 0x417   : > { %v3112_v47 = vpack.c.bf16 %v3102_v6, %v3101_v54  ;;  %v6846_v54 = vld [vmem:[%s10294_s14 + $0x30] sm:$0xff]  }
 0x418   : > { %v3111_v25 = vpack.c.bf16 %v3100_v0, %v3099_v62  ;;  %v6848_v6 = vld [vmem:[%s10294_s14 + $0xb0] sm:$0xff]   ;;  %v6849_v62 = vld [vmem:[%s10294_s14 + $0x78] sm:$0xff]  }
 0x419   : > { %v6851_v0 = vld [vmem:[%s10294_s14 + $0xf8] sm:$0xff]  }
 0x41a   : > { %4130 = vmatprep.mubr.bf16.mxu1 %v3111_v25  ;;  %4356 = vmatprep.mubr.bf16.mxu0 %v3111_v25  ;;  %v6852_v25 = vld [vmem:[%s10294_s14 + $0xb8] sm:$0xff]  }
 0x41b   : > { %4131 = vmatmul.mubr.bf16.gmra.mrb[96].mxu1 %v8568_v57  ;;  %4357 = vmatmul.mubr.bf16.gmra.mrb[112].mxu0 %v8568_v57 }
 0x41c   : > { %v6408_v29 = vpop.f32.mrb[92].mxu0  ;;  %4140 = vmatprep.mubr.bf16.mxu1 %v3112_v47  ;;  %4366 = vmatprep.mubr.bf16.mxu0 %v3112_v47  ;;  %v6850_v47 = vld [vmem:[%s10294_s14 + $0x38] sm:$0xff]  }
 0x41d   : > { %v3037_v20 = vadd.f32 %v6408_v29, %v8794_v17  ;;  %v3028_v27 = vpop.f32.mrb[93].mxu0  ;;  %v6855_v29 = vld [vmem:[%s10296_s16 + $0x4] ss:$16 sps:$4 sm:$0xff]  }
 0x41e   : > { %v3029_v14 = vadd.f32 %v8794_v17, %v3028_v27  ;;  %v6409_v10 = vpop.f32.mrb[94].mxu0  ;;  %v3283_v27 = vld [vmem:[%s10291_s11] sm:$0xf] }
 0x41f   : > { %v3057_v56 = vmax.f32 %v3037_v20, 0.0  ;;  %v3040_v13 = vadd.f32 %v6409_v10, %v8794_v17  ;;  %v3031_v33 = vpop.f32.mrb[95].mxu0  ;;  %v6858_v20 = vld [vmem:[%s10296_s16 + $0xc] ss:$16 sps:$4 sm:$0xff]  }
 0x420   : > { %v3055_v36 = vmax.f32 %v3029_v14, 0.0  ;;  %v3032_v37 = vadd.f32 %v8794_v17, %v3031_v33  ;;  %v10437_v14 = vld [vmem:[#allocation12_spill] sm:$0xff] }
 0x421   : > { %v3081_v11 = vmul.f32 %v8800_v46, %v3057_v56  ;;  %v3058_v31 = vmax.f32 %v3040_v13, 0.0  ;;  %v8976_v10 = vrot.slane %v3283_v27, %v10437_v14  ;;  %v4461_v56 = vld [vmem:[%s10292_s12] sm:$0xf]  ;;  %v10438_v13 = vld [vmem:[#allocation46_spill] sm:$0xff] }
 0x422   : > { %v3079_v57 = vmul.f32 %v8800_v46, %v3055_v36  ;;  %v3056_v48 = vmax.f32 %v3032_v37, 0.0  ;;  %v8982_v33 = vrot.slane %v3283_v27, %v10438_v13  ;;  %v4547_v36 = vld [vmem:[%s10293_s13] sm:$0xf]  ;;  %v10439_v37 = vld [vmem:[#allocation13_spill] sm:$0xff] }
 0x423   : > { %v3082_v1 = vmul.f32 %v8800_v46, %v3058_v31  ;;  %4141 = vmatmul.mubr.bf16.gmra.mrb[100].mxu1 %v8561_v38  ;;  %4367 = vmatmul.mubr.bf16.gmra.mrb[116].mxu0 %v8561_v38  ;;  %v3105_v44 = vadd.f32 %v8809_v24, %v3081_v11  ;;  %v6821_v38 = vld [vmem:[%s10294_s14 + $0x40] sm:$0xff]   ;;  %v8988_v11 = vrot.slane %v3283_v27, %v10439_v37 }
 0x424   : > { %v3080_v41 = vmul.f32 %v8800_v46, %v3056_v48  ;;  %v3103_v17 = vadd.f32 %v8809_v24, %v3079_v57  ;;  %v6822_v46 = vld [vmem:[%s10294_s14] sm:$0xff]   ;;  %6270 = vmatprep.subr.bf16.mxu1 %v6821_v38  ;;  %v8991_v31 = vrot.slane %v3283_v27, %v8327_v43  ;;  %v8994_v48 = vrot.slane %v4461_v56, %v10437_v14 }
 0x425   : > { %v3106_v19 = vadd.f32 %v8809_v24, %v3082_v1  ;;  %6271 = vmatpush3.bf16.msra.mxu1 %v6822_v46 }
 0x426   : > { %v3104_v55 = vadd.f32 %v8809_v24, %v3080_v41  ;;  %v6823_v24 = vld [vmem:[%s10294_s14 + $0xc0] sm:$0xff]   ;;  %v8997_v41 = vrot.slane %v4461_v56, %v10438_v13 }
 0x427   : > { %v3114_v21 = vpack.c.bf16 %v3106_v19, %v3105_v44  ;;  %6292 = vmatprep.subr.bf16.mxu0 %v6823_v24  ;;  %v9000_v44 = vrot.slane %v4461_v56, %v10439_v37  ;;  %v9003_v19 = vrot.slane %v4461_v56, %v8327_v43 }
 0x428   : > { %v3113_v15 = vpack.c.bf16 %v3104_v55, %v3103_v17  ;;  %v9007_v55 = vrot.slane %v4547_v36, %v10437_v14 }
 0x42a   : > { %4150 = vmatprep.mubr.bf16.mxu1 %v3113_v15  ;;  %4376 = vmatprep.mubr.bf16.mxu0 %v3113_v15  ;;  %v9011_v15 = vrot.slane %v4547_v36, %v10438_v13 }
 0x42b   : > { %4151 = vmatmul.mubr.bf16.gmra.mrb[104].mxu1 %v8638_v39  ;;  %4377 = vmatmul.mubr.bf16.gmra.mrb[120].mxu0 %v8638_v39  ;;  %v6824_v39 = vld [vmem:[%s10294_s14 + $0x80] sm:$0xff]  }
 0x42c   : > { %4160 = vmatprep.mubr.bf16.mxu1 %v3114_v21  ;;  %4386 = vmatprep.mubr.bf16.mxu0 %v3114_v21 }
 0x42d   : > { %6293 = vmatpush3.bf16.msra.mxu0 %v6824_v39  ;;  %v9015_v39 = vrot.slane %v4547_v36, %v10439_v37 }
 0x42e   : > { %6294 = vmatprep.subr.bf16.mxu0 %v6827_v63  ;;  %v9019_v63 = vrot.slane %v4547_v36, %v8327_v43 }
 0x431   : > { %6295 = vmatpush3.bf16.msra.mxu0 %v6828_v2 }
 0x432   : > { %6296 = vmatprep.subr.bf16.mxu0 %v6831_v26 }
 0x433   : > { %4161 = vmatmul.mubr.bf16.gmra.mrb[108].mxu1 %v8636_v9  ;;  %4387 = vmatmul.mubr.bf16.gmra.mrb[124].mxu0 %v8636_v9  ;;  %v6825_v9 = vld [vmem:[%s10294_s14 + $0x48] sm:$0xff]  }
 0x434   : > { %6272 = vmatprep.subr.bf16.mxu1 %v6825_v9 }
 0x435   : > { %6273 = vmatpush3.bf16.msra.mxu1 %v6826_v58  ;;  %6297 = vmatpush3.bf16.msra.mxu0 %v6832_v32 }
 0x436   : > { %6274 = vmatprep.subr.bf16.mxu1 %v6829_v40  ;;  %6298 = vmatprep.subr.bf16.mxu0 %v6835_v23 }
 0x439   : > { %6275 = vmatpush3.bf16.msra.mxu1 %v6830_v22  ;;  %6299 = vmatpush3.bf16.msra.mxu0 %v6836_v59 }
 0x43a   : > { %6276 = vmatprep.subr.bf16.mxu1 %v6833_v50  ;;  %6300 = vmatprep.subr.bf16.mxu0 %v6839_v51 }
 0x43d   : > { %6277 = vmatpush3.bf16.msra.mxu1 %v6834_v34  ;;  %6301 = vmatpush3.bf16.msra.mxu0 %v6840_v53 }
 0x43e   : > { %6278 = vmatprep.subr.bf16.mxu1 %v6837_v60  ;;  %6302 = vmatprep.subr.bf16.mxu0 %v6843_v52 }
 0x441   : > { %6279 = vmatpush3.bf16.msra.mxu1 %v6838_v5  ;;  %6303 = vmatpush3.bf16.msra.mxu0 %v6844_v35 }
 0x442   : > { %6280 = vmatprep.subr.bf16.mxu1 %v6841_v45  ;;  %6304 = vmatprep.subr.bf16.mxu0 %v6847_v28 }
 0x445   : > { %6281 = vmatpush3.bf16.msra.mxu1 %v6842_v7  ;;  %6305 = vmatpush3.bf16.msra.mxu0 %v6848_v6 }
 0x446   : > { %6282 = vmatprep.subr.bf16.mxu1 %v6845_v49  ;;  %6306 = vmatprep.subr.bf16.mxu0 %v6851_v0 }
 0x449   : > { %6283 = vmatpush3.bf16.msra.mxu1 %v6846_v54  ;;  %6307 = vmatpush3.bf16.msra.mxu0 %v6852_v25 }
 0x44a   : > { %6284 = vmatprep.subr.bf16.mxu1 %v6849_v62  ;;  %5383 = vmatprep.subr.bf16.mxu0 %v6858_v20 }
 0x44d   : > { %6285 = vmatpush3.bf16.msra.mxu1 %v6850_v47 }
 0x44e   : > { %5342 = vmatprep.subr.bf16.mxu1 %v6855_v29 }
 0x4ce   : > { %v4092_v57 = vpop.f32.mrb[80].mxu1  ;;  %v4318_v1 = vpop.f32.mrb[96].mxu0 }
 0x4cf   : > { %v6410_v17 = vadd.f32 %v4092_v57, %v8976_v10  ;;  %v6442_v21 = vadd.f32 %v4318_v1, %v8982_v33  ;;  %v4094_v38 = vpop.f32.mrb[81].mxu1  ;;  %v4320_v46 = vpop.f32.mrb[97].mxu0 }
 0x4d0   : > { %v6411_v24 = vadd.f32 %v4094_v38, %v8988_v11  ;;  %v6443_v9 = vadd.f32 %v4320_v46, %v8991_v31  ;;  %v4096_v58 = vpop.f32.mrb[82].mxu1  ;;  %v4322_v2 = vpop.f32.mrb[98].mxu0 }
 0x4d1   : > { %v4397_v40 = vmax.f32 %v6410_v17, 0.0  ;;  %v4399_v22 = vmax.f32 %v6442_v21, 0.0  ;;  %v6412_v26 = vadd.f32 %v4096_v58, %v8976_v10  ;;  %v6444_v32 = vadd.f32 %v4322_v2, %v8982_v33  ;;  %v4098_v50 = vpop.f32.mrb[83].mxu1  ;;  %v4324_v34 = vpop.f32.mrb[99].mxu0 }
 0x4d2   : > { %v4398_v23 = vmax.f32 %v6411_v24, 0.0  ;;  %v4400_v59 = vmax.f32 %v6443_v9, 0.0  ;;  %v6413_v60 = vadd.f32 %v4098_v50, %v8988_v11  ;;  %v6445_v51 = vadd.f32 %v4324_v34, %v8991_v31 }
 0x4d3   : > { %v4483_v5 = vmul.f32 %v8994_v48, %v4397_v40  ;;  %v4485_v53 = vmul.f32 %v8997_v41, %v4399_v22  ;;  %v4401_v45 = vmax.f32 %v6412_v26, 0.0  ;;  %v4403_v52 = vmax.f32 %v6444_v32, 0.0 }
 0x4d4   : > { %v4484_v7 = vmul.f32 %v9000_v44, %v4398_v23  ;;  %v4486_v35 = vmul.f32 %v9003_v19, %v4400_v59  ;;  %v4402_v49 = vmax.f32 %v6413_v60, 0.0  ;;  %v4404_v28 = vmax.f32 %v6445_v51, 0.0 }
 0x4d5   : > { %v4487_v54 = vmul.f32 %v8994_v48, %v4401_v45  ;;  %v4489_v6 = vmul.f32 %v8997_v41, %v4403_v52  ;;  %v9034_v29 = vadd.f32 %v9007_v55, %v4483_v5  ;;  %v9037_v20 = vadd.f32 %v9011_v15, %v4485_v53 }
 0x4d6   : > { %v4488_v62 = vmul.f32 %v9000_v44, %v4402_v49  ;;  %v4490_v0 = vmul.f32 %v9003_v19, %v4404_v28  ;;  %v4102_v47 = vpop.f32.mrb[84].mxu1  ;;  %v4328_v25 = vpop.f32.mrb[100].mxu0  ;;  %v9042_v1 = vadd.f32 %v9015_v39, %v4484_v7  ;;  %v9045_v17 = vadd.f32 %v9019_v63, %v4486_v35 }
 0x4d7   : > { %10440 = vst [vmem:[#allocation12_spill] sm:$0xff] %v9034_v29  ;;  %10441 = vst [vmem:[#allocation46_spill] sm:$0xff] %v9037_v20  ;;  %v6414_v27 = vadd.f32 %v4102_v47, %v8976_v10  ;;  %v6446_v56 = vadd.f32 %v4328_v25, %v8982_v33  ;;  %v4104_v36 = vpop.f32.mrb[85].mxu1  ;;  %v4330_v57 = vpop.f32.mrb[101].mxu0  ;;  %v9050_v9 = vadd.f32 %v9007_v55, %v4487_v54 }
 0x4d8   : > { %10442 = vst [vmem:[#allocation13_spill] sm:$0xff] %v9042_v1  ;;  %10443 = vst [vmem:[#allocation76_spill] sm:$0xff] %v9045_v17  ;;  %v6415_v21 = vadd.f32 %v4104_v36, %v8988_v11  ;;  %v6447_v38 = vadd.f32 %v4330_v57, %v8991_v31  ;;  %v4106_v46 = vpop.f32.mrb[86].mxu1  ;;  %v4332_v24 = vpop.f32.mrb[102].mxu0  ;;  %v9053_v58 = vadd.f32 %v9011_v15, %v4489_v6 }
 0x4d9   : > { %10444 = vst [vmem:[#allocation77_spill] sm:$0xff] %v9050_v9  ;;  %v4405_v2 = vmax.f32 %v6414_v27, 0.0  ;;  %v4407_v40 = vmax.f32 %v6446_v56, 0.0  ;;  %v4108_v22 = vpop.f32.mrb[87].mxu1  ;;  %v4334_v26 = vpop.f32.mrb[103].mxu0  ;;  %v9056_v32 = vadd.f32 %v9015_v39, %v4488_v62  ;;  %v9059_v50 = vadd.f32 %v9019_v63, %v4490_v0 }
 0x4da   : > { %10445 = vst [vmem:[#allocation78_spill] sm:$0xff] %v9053_v58  ;;  %v4406_v34 = vmax.f32 %v6415_v21, 0.0  ;;  %v4408_v23 = vmax.f32 %v6447_v38, 0.0  ;;  %v6416_v51 = vadd.f32 %v4106_v46, %v8976_v10  ;;  %v6448_v5 = vadd.f32 %v4332_v24, %v8982_v33 }
 0x4db   : > { %10446 = vst [vmem:[#allocation79_spill] sm:$0xff] %v9056_v32  ;;  %10447 = vst [vmem:[#allocation80_spill] sm:$0xff] %v9059_v50  ;;  %v4491_v59 = vmul.f32 %v8994_v48, %v4405_v2  ;;  %v4493_v60 = vmul.f32 %v8997_v41, %v4407_v40  ;;  %v6417_v52 = vadd.f32 %v4108_v22, %v8988_v11 }
 0x4dc   : > { %v4492_v53 = vmul.f32 %v9000_v44, %v4406_v34  ;;  %v4494_v45 = vmul.f32 %v9003_v19, %v4408_v23  ;;  %v6449_v7 = vadd.f32 %v4334_v26, %v8991_v31  ;;  %v4409_v28 = vmax.f32 %v6416_v51, 0.0 }
 0x4dd   : > { %v9070_v35 = vadd.f32 %v9007_v55, %v4491_v59  ;;  %v9073_v49 = vadd.f32 %v9011_v15, %v4493_v60  ;;  %v4411_v54 = vmax.f32 %v6448_v5, 0.0  ;;  %v4410_v0 = vmax.f32 %v6417_v52, 0.0 }
 0x4de   : > { %v9076_v6 = vadd.f32 %v9015_v39, %v4492_v53  ;;  %v9079_v62 = vadd.f32 %v9019_v63, %v4494_v45  ;;  %v4412_v47 = vmax.f32 %v6449_v7, 0.0  ;;  %v4112_v25 = vpop.f32.mrb[88].mxu1  ;;  %v4338_v27 = vpop.f32.mrb[104].mxu0  ;;  %v4633_v56 = vadd.f32 %v9050_v9, %v9034_v29 }
 0x4df   : > { %10448 = vst [vmem:[#allocation81_spill] sm:$0xff] %v9070_v35  ;;  %10449 = vst [vmem:[#allocation82_spill] sm:$0xff] %v9073_v49  ;;  %v4659_v36 = vadd.f32 %v9053_v58, %v9037_v20  ;;  %v4495_v57 = vmul.f32 %v8994_v48, %v4409_v28  ;;  %v4497_v21 = vmul.f32 %v8997_v41, %v4411_v54  ;;  %v4114_v38 = vpop.f32.mrb[89].mxu1  ;;  %v4340_v46 = vpop.f32.mrb[105].mxu0 }
 0x4e0   : > { %10450 = vst [vmem:[#allocation83_spill] sm:$0xff] %v9076_v6  ;;  %10451 = vst [vmem:[#allocation84_spill] sm:$0xff] %v9079_v62  ;;  %v4646_v24 = vadd.f32 %v9056_v32, %v9042_v1  ;;  %v4672_v2 = vadd.f32 %v9059_v50, %v9045_v17  ;;  %v4496_v40 = vmul.f32 %v9000_v44, %v4410_v0  ;;  %v4116_v26 = vpop.f32.mrb[90].mxu1  ;;  %v4342_v34 = vpop.f32.mrb[106].mxu0 }
 0x4e1   : > { %v4498_v22 = vmul.f32 %v9003_v19, %v4412_v47  ;;  %v4634_v23 = vadd.f32 %v4633_v56, %v9070_v35  ;;  %v4660_v59 = vadd.f32 %v4659_v36, %v9073_v49  ;;  %v6418_v60 = vadd.f32 %v4112_v25, %v8976_v10  ;;  %v4118_v5 = vpop.f32.mrb[91].mxu1  ;;  %v4344_v53 = vpop.f32.mrb[107].mxu0 }
 0x4e2   : > { %v6450_v51 = vadd.f32 %v4338_v27, %v8982_v33  ;;  %v4647_v45 = vadd.f32 %v4646_v24, %v9076_v6  ;;  %v4673_v52 = vadd.f32 %v4672_v2, %v9079_v62  ;;  %v6419_v7 = vadd.f32 %v4114_v38, %v8988_v11 }
 0x4e3   : > { %v6451_v28 = vadd.f32 %v4340_v46, %v8991_v31  ;;  %v9102_v54 = vadd.f32 %v9007_v55, %v4495_v57  ;;  %v9105_v0 = vadd.f32 %v9011_v15, %v4497_v21  ;;  %v4413_v47 = vmax.f32 %v6418_v60, 0.0 }
 0x4e4   : > { %v4415_v25 = vmax.f32 %v6450_v51, 0.0  ;;  %v9108_v27 = vadd.f32 %v9015_v39, %v4496_v40  ;;  %v9111_v56 = vadd.f32 %v9019_v63, %v4498_v22  ;;  %v4414_v36 = vmax.f32 %v6419_v7, 0.0 }
 0x4e5   : > { %10452 = vst [vmem:[#allocation85_spill] sm:$0xff] %v9102_v54  ;;  %10453 = vst [vmem:[#allocation86_spill] sm:$0xff] %v9105_v0  ;;  %v4416_v24 = vmax.f32 %v6451_v28, 0.0  ;;  %v4499_v38 = vmul.f32 %v8994_v48, %v4413_v47  ;;  %v6420_v57 = vadd.f32 %v4116_v26, %v8976_v10  ;;  %v6452_v2 = vadd.f32 %v4342_v34, %v8982_v33 }
 0x4e6   : > { %10454 = vst [vmem:[#allocation87_spill] sm:$0xff] %v9108_v27  ;;  %10455 = vst [vmem:[#allocation88_spill] sm:$0xff] %v9111_v56  ;;  %v4501_v46 = vmul.f32 %v8997_v41, %v4415_v25  ;;  %v4500_v21 = vmul.f32 %v9000_v44, %v4414_v36  ;;  %v6421_v40 = vadd.f32 %v4118_v5, %v8988_v11  ;;  %v4122_v22 = vpop.f32.mrb[92].mxu1  ;;  %v4348_v62 = vpop.f32.mrb[108].mxu0 }
 0x4e7   : > { %v4502_v60 = vmul.f32 %v9003_v19, %v4416_v24  ;;  %v6453_v51 = vadd.f32 %v4344_v53, %v8991_v31  ;;  %v9122_v7 = vadd.f32 %v9007_v55, %v4499_v38  ;;  %v4417_v47 = vmax.f32 %v6420_v57, 0.0  ;;  %v4124_v25 = vpop.f32.mrb[93].mxu1  ;;  %v4350_v34 = vpop.f32.mrb[109].mxu0 }
 0x4e8   : > { %v9125_v28 = vadd.f32 %v9011_v15, %v4501_v46  ;;  %v4419_v26 = vmax.f32 %v6452_v2, 0.0  ;;  %v9128_v36 = vadd.f32 %v9015_v39, %v4500_v21  ;;  %v4418_v5 = vmax.f32 %v6421_v40, 0.0  ;;  %v4126_v49 = vpop.f32.mrb[94].mxu1  ;;  %v4352_v6 = vpop.f32.mrb[110].mxu0 }
 0x4e9   : > { %10456 = vst [vmem:[#allocation89_spill] sm:$0xff] %v9122_v7  ;;  %v9131_v24 = vadd.f32 %v9019_v63, %v4502_v60  ;;  %v4420_v53 = vmax.f32 %v6453_v51, 0.0  ;;  %v4635_v38 = vadd.f32 %v4634_v23, %v9102_v54  ;;  %v4661_v35 = vadd.f32 %v4660_v59, %v9105_v0  ;;  %v4128_v2 = vpop.f32.mrb[95].mxu1  ;;  %v4354_v50 = vpop.f32.mrb[111].mxu0 }
 0x4ea   : > { %10457 = vst [vmem:[#allocation90_spill] sm:$0xff] %v9125_v28  ;;  %10458 = vst [vmem:[#allocation91_spill] sm:$0xff] %v9128_v36  ;;  %v4503_v46 = vmul.f32 %v8994_v48, %v4417_v47  ;;  %v4505_v57 = vmul.f32 %v8997_v41, %v4419_v26  ;;  %v4648_v21 = vadd.f32 %v4647_v45, %v9108_v27 }
 0x4eb   : > { %10459 = vst [vmem:[#allocation92_spill] sm:$0xff] %v9131_v24  ;;  %v4674_v58 = vadd.f32 %v4673_v52, %v9111_v56  ;;  %v4504_v60 = vmul.f32 %v9000_v44, %v4418_v5  ;;  %v4506_v40 = vmul.f32 %v9003_v19, %v4420_v53  ;;  %v4636_v51 = vadd.f32 %v4635_v38, %v9122_v7 }
 0x4ec   : > { %v4662_v23 = vadd.f32 %v4661_v35, %v9125_v28  ;;  %v6422_v59 = vadd.f32 %v4122_v22, %v8976_v10  ;;  %v6454_v47 = vadd.f32 %v4348_v62, %v8982_v33  ;;  %v4649_v26 = vadd.f32 %v4648_v21, %v9128_v36 }
 0x4ed   : > { %v4675_v0 = vadd.f32 %v4674_v58, %v9131_v24  ;;  %v6423_v45 = vadd.f32 %v4124_v25, %v8988_v11  ;;  %v6455_v52 = vadd.f32 %v4350_v34, %v8991_v31  ;;  %v9150_v5 = vadd.f32 %v9007_v55, %v4503_v46 }
 0x4ee   : > { %v9153_v53 = vadd.f32 %v9011_v15, %v4505_v57  ;;  %v4421_v38 = vmax.f32 %v6422_v59, 0.0  ;;  %v4423_v35 = vmax.f32 %v6454_v47, 0.0  ;;  %v9156_v22 = vadd.f32 %v9015_v39, %v4504_v60  ;;  %v4132_v24 = vpop.f32.mrb[96].mxu1  ;;  %v4358_v25 = vpop.f32.mrb[112].mxu0 }
 0x4ef   : > { %10460 = vst [vmem:[#allocation93_spill] sm:$0xff] %v9150_v5  ;;  %v9159_v62 = vadd.f32 %v9019_v63, %v4506_v40  ;;  %v4422_v21 = vmax.f32 %v6423_v45, 0.0  ;;  %v4424_v58 = vmax.f32 %v6455_v52, 0.0  ;;  %v6424_v28 = vadd.f32 %v4126_v49, %v8976_v10  ;;  %v4134_v59 = vpop.f32.mrb[97].mxu1  ;;  %v4360_v47 = vpop.f32.mrb[113].mxu0 }
 0x4f0   : > { %10461 = vst [vmem:[#allocation94_spill] sm:$0xff] %v9153_v53  ;;  %10462 = vst [vmem:[#allocation95_spill] sm:$0xff] %v9156_v22  ;;  %v4507_v34 = vmul.f32 %v8994_v48, %v4421_v38  ;;  %v4509_v46 = vmul.f32 %v8997_v41, %v4423_v35  ;;  %v6456_v57 = vadd.f32 %v4352_v6, %v8982_v33  ;;  %v4136_v52 = vpop.f32.mrb[98].mxu1  ;;  %v4362_v7 = vpop.f32.mrb[114].mxu0 }
 0x4f1   : > { %10463 = vst [vmem:[#allocation96_spill] sm:$0xff] %v9159_v62  ;;  %v4508_v60 = vmul.f32 %v9000_v44, %v4422_v21  ;;  %v4510_v36 = vmul.f32 %v9003_v19, %v4424_v58  ;;  %v6425_v40 = vadd.f32 %v4128_v2, %v8988_v11  ;;  %v6457_v45 = vadd.f32 %v4354_v50, %v8991_v31  ;;  %v4138_v56 = vpop.f32.mrb[99].mxu1  ;;  %v4364_v27 = vpop.f32.mrb[115].mxu0 }
 0x4f2   : > { %v9170_v38 = vadd.f32 %v9007_v55, %v4507_v34  ;;  %v9173_v35 = vadd.f32 %v9011_v15, %v4509_v46  ;;  %v4425_v49 = vmax.f32 %v6424_v28, 0.0  ;;  %v4427_v6 = vmax.f32 %v6456_v57, 0.0 }
 0x4f3   : > { %v4637_v21 = vadd.f32 %v4636_v51, %v9150_v5  ;;  %v4663_v58 = vadd.f32 %v4662_v23, %v9153_v53  ;;  %v4426_v54 = vmax.f32 %v6425_v40, 0.0  ;;  %v4428_v2 = vmax.f32 %v6457_v45, 0.0 }
 0x4f4   : > { %10464 = vst [vmem:[#allocation97_spill] sm:$0xff] %v9170_v38  ;;  %10465 = vst [vmem:[#allocation98_spill] sm:$0xff] %v9173_v35  ;;  %v9178_v50 = vadd.f32 %v9015_v39, %v4508_v60  ;;  %v9181_v32 = vadd.f32 %v9019_v63, %v4510_v36  ;;  %v4511_v34 = vmul.f32 %v8994_v48, %v4425_v49 }
 0x4f5   : > { %v4513_v46 = vmul.f32 %v8997_v41, %v4427_v6  ;;  %v4650_v28 = vadd.f32 %v4649_v26, %v9156_v22  ;;  %v4676_v57 = vadd.f32 %v4675_v0, %v9159_v62  ;;  %v4512_v51 = vmul.f32 %v9000_v44, %v4426_v54 }
 0x4f6   : > { %10466 = vst [vmem:[#allocation99_spill] sm:$0xff] %v9178_v50  ;;  %10467 = vst [vmem:[#allocation100_spill] sm:$0xff] %v9181_v32  ;;  %v4514_v23 = vmul.f32 %v9003_v19, %v4428_v2  ;;  %v4638_v40 = vadd.f32 %v4637_v21, %v9170_v38  ;;  %v4664_v60 = vadd.f32 %v4663_v58, %v9173_v35  ;;  %v4142_v6 = vpop.f32.mrb[100].mxu1  ;;  %v4368_v0 = vpop.f32.mrb[116].mxu0 }
 0x4f7   : > { %v9192_v45 = vadd.f32 %v9007_v55, %v4511_v34  ;;  %v9195_v36 = vadd.f32 %v9011_v15, %v4513_v46  ;;  %v6426_v49 = vadd.f32 %v4132_v24, %v8976_v10  ;;  %v6458_v26 = vadd.f32 %v4358_v25, %v8982_v33  ;;  %v9207_v34 = vpop.f32.mrb[101].mxu1  ;;  %v9209_v46 = vpop.f32.mrb[117].mxu0 }
 0x4f8   : > { %v4651_v54 = vadd.f32 %v4650_v28, %v9178_v50  ;;  %v4677_v2 = vadd.f32 %v4676_v57, %v9181_v32  ;;  %v9202_v21 = vadd.f32 %v9015_v39, %v4512_v51  ;;  %v9205_v58 = vadd.f32 %v9019_v63, %v4514_v23  ;;  %v9213_v35 = vpop.f32.mrb[102].mxu1  ;;  %v9215_v38 = vpop.f32.mrb[118].mxu0 }
 0x4f9   : > { %10468 = vst [vmem:[#allocation101_spill] sm:$0xff] %v9192_v45  ;;  %10469 = vst [vmem:[#allocation102_spill] sm:$0xff] %v9195_v36  ;;  %v6427_v24 = vadd.f32 %v4134_v59, %v8988_v11  ;;  %v6459_v25 = vadd.f32 %v4360_v47, %v8991_v31  ;;  %v4639_v28 = vadd.f32 %v4638_v40, %v9192_v45  ;;  %v9219_v51 = vpop.f32.mrb[103].mxu1  ;;  %v9221_v23 = vpop.f32.mrb[119].mxu0  ;;  %v4429_v32 = vmax.f32 %v6426_v49, 0.0 }
 0x4fa   : > { %10470 = vst [vmem:[#allocation103_spill] sm:$0xff] %v9202_v21  ;;  %10471 = vst [vmem:[#allocation104_spill] sm:$0xff] %v9205_v58  ;;  %v4665_v57 = vadd.f32 %v4664_v60, %v9195_v36  ;;  %v4431_v50 = vmax.f32 %v6458_v26, 0.0  ;;  %v4652_v62 = vadd.f32 %v4651_v54, %v9202_v21  ;;  %v4678_v59 = vadd.f32 %v4677_v2, %v9205_v58 }
 0x4fb   : > { %v4430_v53 = vmax.f32 %v6427_v24, 0.0  ;;  %v4432_v47 = vmax.f32 %v6459_v25, 0.0  ;;  %v4640_v22 = vrot.slane %v4639_v28, 4  ;;  %v6428_v9 = vadd.f32 %v4136_v52, %v8976_v10 }
 0x4fc   : > { %v4666_v5 = vrot.slane %v4665_v57, 4  ;;  %v6460_v40 = vadd.f32 %v4362_v7, %v8982_v33  ;;  %v4515_v60 = vmul.f32 %v8994_v48, %v4429_v32  ;;  %v4517_v36 = vmul.f32 %v8997_v41, %v4431_v50 }
 0x4fd   : > { %v6429_v45 = vadd.f32 %v4138_v56, %v8988_v11  ;;  %v6461_v49 = vadd.f32 %v4364_v27, %v8991_v31  ;;  %v4653_v2 = vrot.slane %v4652_v62, 4  ;;  %v4679_v24 = vrot.slane %v4678_v59, 4 }
 0x4fe   : > { %v9231_v26 = vpop.f32.mrb[104].mxu1  ;;  %v9233_v54 = vpop.f32.mrb[120].mxu0  ;;  %v4433_v25 = vmax.f32 %v6428_v9, 0.0  ;;  %v4435_v58 = vmax.f32 %v6460_v40, 0.0  ;;  %v4516_v32 = vmul.f32 %v9000_v44, %v4430_v53  ;;  %v4518_v7 = vmul.f32 %v9003_v19, %v4432_v47 }
 0x4ff   : > { %v9235_v21 = vpop.f32.mrb[105].mxu1  ;;  %v9237_v52 = vpop.f32.mrb[121].mxu0  ;;  %v4434_v50 = vmax.f32 %v6429_v45, 0.0  ;;  %v4436_v56 = vmax.f32 %v6461_v49, 0.0  ;;  %v9245_v20 = vadd.f32 %v4640_v22, %v4639_v28  ;;  %v9247_v1 = vadd.f32 %v4666_v5, %v4665_v57 }
 0x500   : > { %v9241_v17 = vpop.f32.mrb[106].mxu1  ;;  %v9243_v27 = vpop.f32.mrb[122].mxu0  ;;  %v4519_v9 = vmul.f32 %v8994_v48, %v4433_v25  ;;  %v4521_v40 = vmul.f32 %v8997_v41, %v4435_v58  ;;  %v6430_v47 = vadd.f32 %v4142_v6, %v8976_v10  ;;  %v6462_v49 = vadd.f32 %v4368_v0, %v8982_v33 }
 0x501   : > { %v9251_v29 = vpop.f32.mrb[107].mxu1  ;;  %v9253_v3 = vpop.f32.mrb[123].mxu0  ;;  %v4520_v53 = vmul.f32 %v9000_v44, %v4434_v50  ;;  %v4522_v45 = vmul.f32 %v9003_v19, %v4436_v56  ;;  %v9260_v22 = vadd.f32 %v9007_v55, %v4515_v60  ;;  %v9263_v5 = vadd.f32 %v9011_v15, %v4517_v36 }
 0x502   : > { %v9266_v58 = vadd.f32 %v9007_v55, %v4519_v9  ;;  %v9269_v28 = vadd.f32 %v9011_v15, %v4521_v40  ;;  %v9271_v57 = vadd.f32 %v4653_v2, %v4652_v62  ;;  %v9273_v25 = vadd.f32 %v4679_v24, %v4678_v59 }
 0x503   : > { %10472 = vst [vmem:[#allocation105_spill] sm:$0xff] %v9260_v22  ;;  %10473 = vst [vmem:[#allocation106_spill] sm:$0xff] %v9263_v5  ;;  %v4437_v50 = vmax.f32 %v6430_v47, 0.0  ;;  %v4439_v6 = vmax.f32 %v6462_v49, 0.0  ;;  %v9276_v0 = vadd.f32 %v9015_v39, %v4516_v32  ;;  %v9279_v60 = vadd.f32 %v9019_v63, %v4518_v7 }
 0x504   : > { %10474 = vst [vmem:[#allocation107_spill] sm:$0xff] %v9266_v58  ;;  %10475 = vst [vmem:[#allocation108_spill] sm:$0xff] %v9269_v28  ;;  %v9282_v36 = vadd.f32 %v9015_v39, %v4520_v53  ;;  %v9285_v56 = vadd.f32 %v9019_v63, %v4522_v45  ;;  %v4685_v7 = vadd.f32 %v9266_v58, %v9260_v22 }
 0x505   : > { %v4523_v59 = vmul.f32 %v8994_v48, %v4437_v50  ;;  %v4525_v2 = vmul.f32 %v8997_v41, %v4439_v6  ;;  %v4711_v40 = vadd.f32 %v9269_v28, %v9263_v5  ;;  %v6431_v53 = vadd.f32 %v9207_v34, %v8988_v11 }
 0x506   : > { %10476 = vst [vmem:[#allocation109_spill] sm:$0xff] %v9282_v36  ;;  %10477 = vst [vmem:[#allocation110_spill] sm:$0xff] %v9285_v56  ;;  %v9291_v24 = vpop.f32.mrb[108].mxu1  ;;  %v9293_v32 = vpop.f32.mrb[124].mxu0  ;;  %v6463_v45 = vadd.f32 %v9209_v46, %v8991_v31  ;;  %v6432_v62 = vadd.f32 %v9213_v35, %v8976_v10  ;;  %v6464_v9 = vadd.f32 %v9215_v38, %v8982_v33 }
 0x507   : > { %v9303_v47 = vpop.f32.mrb[109].mxu1  ;;  %v9305_v49 = vpop.f32.mrb[125].mxu0  ;;  %v9308_v50 = vadd.f32 %v9007_v55, %v4523_v59  ;;  %v9311_v6 = vadd.f32 %v9011_v15, %v4525_v2  ;;  %v4698_v46 = vadd.f32 %v9282_v36, %v9276_v0  ;;  %v4724_v59 = vadd.f32 %v9285_v56, %v9279_v60 }
 0x508   : > { %v9317_v34 = vpop.f32.mrb[110].mxu1  ;;  %v9319_v28 = vpop.f32.mrb[126].mxu0  ;;  %v4438_v58 = vmax.f32 %v6431_v53, 0.0  ;;  %v4440_v5 = vmax.f32 %v6463_v45, 0.0  ;;  %v4441_v61 = vmax.f32 %v6432_v62, 0.0  ;;  %v4443_v8 = vmax.f32 %v6464_v9, 0.0 }
 0x509   : > { %10478 = vst [vmem:[#allocation111_spill] sm:$0xff] %v9311_v6  ;;  %v9325_v2 = vpop.f32.mrb[111].mxu1  ;;  %v9327_v22 = vpop.f32.mrb[127].mxu0  ;;  %v4686_v35 = vadd.f32 %v4685_v7, %v9308_v50  ;;  %v4712_v38 = vadd.f32 %v4711_v40, %v9311_v6  ;;  %v6433_v36 = vadd.f32 %v9219_v51, %v8988_v11  ;;  %v6465_v53 = vadd.f32 %v9221_v23, %v8991_v31 }
 0x50a   : > { %v4524_v12 = vmul.f32 %v9000_v44, %v4438_v58  ;;  %v4526_v16 = vmul.f32 %v9003_v19, %v4440_v5  ;;  %v4527_v45 = vmul.f32 %v8994_v48, %v4441_v61  ;;  %v4529_v56 = vmul.f32 %v8997_v41, %v4443_v8 }
 0x50b   : > { %v6434_v7 = vadd.f32 %v9231_v26, %v8976_v10  ;;  %v6466_v9 = vadd.f32 %v9233_v54, %v8982_v33  ;;  %v4442_v51 = vmax.f32 %v6433_v36, 0.0  ;;  %v4444_v62 = vmax.f32 %v6465_v53, 0.0 }
 0x50c   : > { %v9344_v58 = vadd.f32 %v9015_v39, %v4524_v12  ;;  %v9347_v5 = vadd.f32 %v9019_v63, %v4526_v16  ;;  %v9350_v23 = vadd.f32 %v9007_v55, %v4527_v45  ;;  %v9353_v61 = vadd.f32 %v9011_v15, %v4529_v56 }
 0x50d   : > { %v4445_v8 = vmax.f32 %v6434_v7, 0.0  ;;  %v4447_v40 = vmax.f32 %v6466_v9, 0.0  ;;  %v4528_v12 = vmul.f32 %v9000_v44, %v4442_v51  ;;  %v4530_v6 = vmul.f32 %v9003_v19, %v4444_v62 }
 0x50e   : > { %v4699_v16 = vadd.f32 %v4698_v46, %v9344_v58  ;;  %v4725_v36 = vadd.f32 %v4724_v59, %v9347_v5  ;;  %v6435_v9 = vadd.f32 %v9235_v21, %v8988_v11  ;;  %v6467_v51 = vadd.f32 %v9237_v52, %v8991_v31 }
 0x50f   : > { %v4531_v53 = vmul.f32 %v8994_v48, %v4445_v8  ;;  %v4533_v45 = vmul.f32 %v8997_v41, %v4447_v40  ;;  %v9364_v56 = vadd.f32 %v9015_v39, %v4528_v12  ;;  %v9367_v7 = vadd.f32 %v9019_v63, %v4530_v6 }
 0x510   : > { %v4687_v46 = vadd.f32 %v4686_v35, %v9350_v23  ;;  %v4713_v59 = vadd.f32 %v4712_v38, %v9353_v61  ;;  %v6436_v62 = vadd.f32 %v9241_v17, %v8976_v10  ;;  %v6468_v8 = vadd.f32 %v9243_v27, %v8982_v33 }
 0x511   : > { %v9380_v40 = vadd.f32 %v9007_v55, %v4531_v53  ;;  %v9383_v6 = vadd.f32 %v9011_v15, %v4533_v45  ;;  %v4446_v21 = vmax.f32 %v6435_v9, 0.0  ;;  %v4448_v12 = vmax.f32 %v6467_v51, 0.0 }
 0x512   : > { %v4700_v52 = vadd.f32 %v4699_v16, %v9364_v56  ;;  %v4726_v35 = vadd.f32 %v4725_v36, %v9367_v7  ;;  %v4449_v54 = vmax.f32 %v6436_v62, 0.0  ;;  %v4451_v38 = vmax.f32 %v6468_v8, 0.0 }
 0x513   : > { %v4532_v26 = vmul.f32 %v9000_v44, %v4446_v21  ;;  %v4534_v17 = vmul.f32 %v9003_v19, %v4448_v12  ;;  %v6437_v27 = vadd.f32 %v9251_v29, %v8988_v11  ;;  %v6469_v53 = vadd.f32 %v9253_v3, %v8991_v31 }
 0x514   : > { %v4535_v45 = vmul.f32 %v8994_v48, %v4449_v54  ;;  %v4537_v9 = vmul.f32 %v8997_v41, %v4451_v38  ;;  %v6438_v16 = vadd.f32 %v9291_v24, %v8976_v10  ;;  %v6470_v36 = vadd.f32 %v9293_v32, %v8982_v33 }
 0x515   : > { %v9400_v51 = vadd.f32 %v9015_v39, %v4532_v26  ;;  %v9403_v62 = vadd.f32 %v9019_v63, %v4534_v17  ;;  %v4450_v29 = vmax.f32 %v6437_v27, 0.0  ;;  %v4452_v8 = vmax.f32 %v6469_v53, 0.0 }
 0x516   : > { %v4688_v3 = vadd.f32 %v4687_v46, %v9380_v40  ;;  %v4714_v54 = vadd.f32 %v4713_v59, %v9383_v6  ;;  %v4453_v21 = vmax.f32 %v6438_v16, 0.0  ;;  %v4455_v12 = vmax.f32 %v6470_v36, 0.0 }
 0x517   : > { %10479 = vst [vmem:[#allocation112_spill] sm:$0xff] %v9403_v62  ;;  %v9408_v38 = vadd.f32 %v9007_v55, %v4535_v45  ;;  %v9411_v24 = vadd.f32 %v9011_v15, %v4537_v9  ;;  %v4536_v32 = vmul.f32 %v9000_v44, %v4450_v29  ;;  %v4538_v26 = vmul.f32 %v9003_v19, %v4452_v8 }
 0x518   : > { %v4701_v17 = vadd.f32 %v4700_v52, %v9400_v51  ;;  %v4727_v27 = vadd.f32 %v4726_v35, %v9403_v62  ;;  %v4539_v46 = vmul.f32 %v8994_v48, %v4453_v21  ;;  %v4541_v59 = vmul.f32 %v8997_v41, %v4455_v12 }
 0x519   : > { %v9420_v53 = vadd.f32 %v9015_v39, %v4536_v32  ;;  %v9423_v45 = vadd.f32 %v9019_v63, %v4538_v26  ;;  %v6439_v9 = vadd.f32 %v9303_v47, %v8988_v11  ;;  %v6471_v16 = vadd.f32 %v9305_v49, %v8991_v31 }
 0x51a   : > { %v9430_v52 = vadd.f32 %v9007_v55, %v4539_v46  ;;  %v9433_v35 = vadd.f32 %v9011_v15, %v4541_v59  ;;  %v6440_v36 = vadd.f32 %v9317_v34, %v8976_v10  ;;  %v6472_v29 = vadd.f32 %v9319_v28, %v8982_v33 }
 0x51b   : > { %v4689_v8 = vadd.f32 %v4688_v3, %v9408_v38  ;;  %v4715_v21 = vadd.f32 %v4714_v54, %v9411_v24  ;;  %v4454_v47 = vmax.f32 %v6439_v9, 0.0  ;;  %v4456_v12 = vmax.f32 %v6471_v16, 0.0 }
 0x51c   : > { %v4702_v49 = vadd.f32 %v4701_v17, %v9420_v53  ;;  %v4728_v32 = vadd.f32 %v4727_v27, %v9423_v45  ;;  %v4457_v26 = vmax.f32 %v6440_v36, 0.0  ;;  %v4459_v46 = vmax.f32 %v6472_v29, 0.0 }
 0x51d   : > { %v4540_v59 = vmul.f32 %v9000_v44, %v4454_v47  ;;  %v4542_v62 = vmul.f32 %v9003_v19, %v4456_v12  ;;  %v6441_v10 = vadd.f32 %v9325_v2, %v8988_v11  ;;  %v6473_v33 = vadd.f32 %v9327_v22, %v8991_v31 }
 0x51e   : > { %v4690_v28 = vadd.f32 %v4689_v8, %v9430_v52  ;;  %v4716_v34 = vadd.f32 %v4715_v21, %v9433_v35  ;;  %v4543_v3 = vmul.f32 %v8994_v48, %v4457_v26  ;;  %v4545_v54 = vmul.f32 %v8997_v41, %v4459_v46 }
 0x51f   : > { %v9454_v17 = vadd.f32 %v9015_v39, %v4540_v59  ;;  %v9457_v27 = vadd.f32 %v9019_v63, %v4542_v62  ;;  %v4458_v9 = vmax.f32 %v6441_v10, 0.0  ;;  %v4460_v16 = vmax.f32 %v6473_v33, 0.0 }
 0x520   : > { %v9460_v11 = vadd.f32 %v9007_v55, %v4543_v3  ;;  %v9463_v31 = vadd.f32 %v9011_v15, %v4545_v54  ;;  %v10482_v62 = vrot.slane %v9245_v20, 2  ;;  %v10483_v29 = vrot.slane %v9247_v1, 2 }
 0x521   : > { %v4703_v22 = vadd.f32 %v4702_v49, %v9454_v17  ;;  %v4729_v48 = vadd.f32 %v4728_v32, %v9457_v27  ;;  %v4544_v41 = vmul.f32 %v9000_v44, %v4458_v9  ;;  %v4546_v2 = vmul.f32 %v9003_v19, %v4460_v16 }
 0x522   : > { %10480 = vst [vmem:[#allocation113_spill] sm:$0xff] %v9460_v11  ;;  %10481 = vst [vmem:[#allocation114_spill] sm:$0xff] %v9463_v31  ;;  %v4643_v36 = vadd.f32 %v10482_v62, %v9245_v20  ;;  %v4669_v55 = vadd.f32 %v10483_v29, %v9247_v1  ;;  %v4691_v8 = vadd.f32 %v4690_v28, %v9460_v11  ;;  %v10484_v21 = vrot.slane %v9271_v57, 2 }
 0x523   : > { %v4717_v15 = vadd.f32 %v4716_v34, %v9463_v31  ;;  %v10485_v44 = vrot.slane %v9273_v25, 2  ;;  %v9484_v12 = vadd.f32 %v9015_v39, %v4544_v41  ;;  %v9487_v20 = vadd.f32 %v9019_v63, %v4546_v2 }
 0x524   : > { %v4656_v47 = vadd.f32 %v10484_v21, %v9271_v57  ;;  %v4692_v49 = vrot.slane %v4691_v8, 4  ;;  %v4644_v46 = vrot.slane %v4643_v36, 1  ;;  %v4670_v59 = vrot.slane %v4669_v55, 1 }
 0x525   : > { %v4682_v19 = vadd.f32 %v10485_v44, %v9273_v25  ;;  %10486 = vst [vmem:[#allocation115_spill] sm:$0xff] %v9484_v12  ;;  %10487 = vst [vmem:[#allocation116_spill] sm:$0xff] %v9487_v20  ;;  %v4718_v1 = vrot.slane %v4717_v15, 4  ;;  %v4704_v32 = vadd.f32 %v4703_v22, %v9484_v12  ;;  %v4730_v26 = vadd.f32 %v4729_v48, %v9487_v20 }
 0x526   : > { %v4693_v10 = vadd.f32 %v4692_v49, %v4691_v8  ;;  %v4657_v34 = vrot.slane %v4656_v47, 1  ;;  %v4645_v63 = vadd.f32 %v4644_v46, %v4643_v36  ;;  %v4671_v16 = vadd.f32 %v4670_v59, %v4669_v55 }
 0x527   : > { %v4719_v57 = vadd.f32 %v4718_v1, %v4717_v15  ;;  %v4705_v33 = vrot.slane %v4704_v32, 4  ;;  %v4731_v28 = vrot.slane %v4730_v26, 4  ;;  %v4683_v25 = vrot.slane %v4682_v19, 1 }
 0x528   : > { %v4694_v3 = vrot.slane %v4693_v10, 2  ;;  %v4658_v29 = vadd.f32 %v4657_v34, %v4656_v47  ;;  %v4738_v49 = vmul.f32 0.015625, %v4645_v63  ;;  %v4740_v1 = vmul.f32 0.015625, %v4671_v16 }
 0x529   : > { %v4720_v39 = vrot.slane %v4719_v57, 2  ;;  %v4706_v54 = vadd.f32 %v4705_v33, %v4704_v32  ;;  %v4732_v9 = vadd.f32 %v4731_v28, %v4730_v26  ;;  %v4684_v48 = vadd.f32 %v4683_v25, %v4682_v19 }
 0x52a   : > { %v4695_v41 = vadd.f32 %v4694_v3, %v4693_v10  ;;  %v4739_v11 = vmul.f32 0.015625, %v4658_v29  ;;  %v4746_v10 = vpack.c.bf16 %v4738_v49, %v4738_v49  ;;  %v6861_v49 = vld [vmem:[%s10296_s16 + $0x24] ss:$16 sps:$4 sm:$0xff]  }
 0x52b   : > { %v4721_v2 = vadd.f32 %v4720_v39, %v4719_v57  ;;  %v4707_v62 = vrot.slane %v4706_v54, 2  ;;  %v4733_v22 = vrot.slane %v4732_v9, 2  ;;  %v4741_v26 = vmul.f32 0.015625, %v4684_v48 }
 0x52c   : > { %v4696_v21 = vrot.slane %v4695_v41, 1  ;;  %v4748_v57 = vpack.c.bf16 %v4740_v1, %v4740_v1  ;;  %v4747_v28 = vpack.c.bf16 %v4739_v11, %v4739_v11  ;;  %v4833_v63 = vunpack.c.l.b16 %v4746_v10  ;;  %v6853_v11 = vld [vmem:[%s10296_s16] ss:$16 sps:$4 sm:$0xff]   ;;  %v6864_v1 = vld [vmem:[%s10296_s16 + $0x2c] ss:$16 sps:$4 sm:$0xff]  }
 0x52d   : > { %v4722_v44 = vrot.slane %v4721_v2, 1  ;;  %v4708_v8 = vadd.f32 %v4707_v62, %v4706_v54  ;;  %v4734_v15 = vadd.f32 %v4733_v22, %v4732_v9  ;;  %v4749_v25 = vpack.c.bf16 %v4741_v26, %v4741_v26  ;;  %v6862_v26 = vld [vmem:[%s10296_s16 + $0x28] ss:$16 sps:$4 sm:$0xff]   ;;  %v6873_v10 = vld [vmem:[%s10296_s16 + $0x64] ss:$16 sps:$4 sm:$0xff]  }
 0x52e   : > { %v4697_v20 = vadd.f32 %v4696_v21, %v4695_v41  ;;  %v4835_v16 = vunpack.c.l.b16 %v4748_v57  ;;  %v4834_v41 = vunpack.c.l.b16 %v4747_v28  ;;  %v6876_v57 = vld [vmem:[%s10296_s16 + $0x6c] ss:$16 sps:$4 sm:$0xff]  }
 0x52f   : > { %v4723_v31 = vadd.f32 %v4722_v44, %v4721_v2  ;;  %v4709_v12 = vrot.slane %v4708_v8, 1  ;;  %v4735_v32 = vrot.slane %v4734_v15, 1  ;;  %v6856_v44 = vld [vmem:[%s10296_s16 + $0x8] ss:$16 sps:$4 sm:$0xff]   ;;  %v6882_v28 = vld [vmem:[%s10296_s16 + $0x8c] ss:$16 sps:$4 sm:$0xff]  }
 0x530   : > { %v4742_v36 = vmul.f32 0.015625, %v4697_v20 }
 0x531   : > { %v4744_v55 = vmul.f32 0.015625, %v4723_v31  ;;  %v4710_v46 = vadd.f32 %v4709_v12, %v4708_v8  ;;  %v4736_v59 = vadd.f32 %v4735_v32, %v4734_v15  ;;  %v4836_v31 = vunpack.c.l.b16 %v4749_v25  ;;  %v6859_v32 = vld [vmem:[%s10296_s16 + $0x20] ss:$16 sps:$4 sm:$0xff]   ;;  %v6880_v25 = vld [vmem:[%s10296_s16 + $0x88] ss:$16 sps:$4 sm:$0xff]  }
 0x532   : > { %v4750_v47 = vpack.c.bf16 %v4742_v36, %v4742_v36  ;;  %v6867_v36 = vld [vmem:[%s10296_s16 + $0x44] ss:$16 sps:$4 sm:$0xff]  }
 0x533   : > { %v4752_v19 = vpack.c.bf16 %v4744_v55, %v4744_v55  ;;  %v4743_v33 = vmul.f32 0.015625, %v4710_v46  ;;  %v4745_v34 = vmul.f32 0.015625, %v4736_v59  ;;  %v6870_v55 = vld [vmem:[%s10296_s16 + $0x4c] ss:$16 sps:$4 sm:$0xff]   ;;  %v6865_v46 = vld [vmem:[%s10296_s16 + $0x40] ss:$16 sps:$4 sm:$0xff]  }
 0x534   : > { %v4837_v3 = vunpack.c.l.b16 %v4750_v47  ;;  %v6868_v59 = vld [vmem:[%s10296_s16 + $0x48] ss:$16 sps:$4 sm:$0xff]   ;;  %v6871_v47 = vld [vmem:[%s10296_s16 + $0x60] ss:$16 sps:$4 sm:$0xff]  }
 0x535   : > { %v4839_v39 = vunpack.c.l.b16 %v4752_v19  ;;  %v4751_v54 = vpack.c.bf16 %v4743_v33, %v4743_v33  ;;  %v4753_v9 = vpack.c.bf16 %v4745_v34, %v4745_v34  ;;  %v6874_v19 = vld [vmem:[%s10296_s16 + $0x68] ss:$16 sps:$4 sm:$0xff]   ;;  %v6879_v33 = vld [vmem:[%s10296_s16 + $0x84] ss:$16 sps:$4 sm:$0xff]   ;;  %v6877_v34 = vld [vmem:[%s10296_s16 + $0x80] ss:$16 sps:$4 sm:$0xff]  }
 0x536   : > { %v4842_v2 = vsel %vm4841_vm0, %v4837_v3, %v4833_v63  ;;  %v6883_v3 = vld [vmem:[%s10296_s16 + $0xa0] ss:$16 sps:$4 sm:$0xff]  }
 0x537   : > { %v4838_v20 = vunpack.c.l.b16 %v4751_v54  ;;  %v4840_v12 = vunpack.c.l.b16 %v4753_v9  ;;  %v4844_v62 = vsel %vm4841_vm0, %v4839_v39, %v4835_v16  ;;  %v4846_v8 = vpack.c.b16 %v4842_v2, %v4842_v2  ;;  %v6885_v39 = vld [vmem:[%s10296_s16 + $0xa4] ss:$16 sps:$4 sm:$0xff]   ;;  %v6886_v54 = vld [vmem:[%s10296_s16 + $0xa8] ss:$16 sps:$4 sm:$0xff]   ;;  %v6888_v9 = vld [vmem:[%s10296_s16 + $0xac] ss:$16 sps:$4 sm:$0xff]  }
 0x538   : > { %v4848_v15 = vpack.c.b16 %v4844_v62, %v4844_v62  ;;  %v6889_v63 = vld [vmem:[%s10296_s16 + $0xc0] ss:$16 sps:$4 sm:$0xff]   ;;  %v6891_v16 = vld [vmem:[%s10296_s16 + $0xc4] ss:$16 sps:$4 sm:$0xff]   ;;  %v6898_v62 = vld [vmem:[%s10296_s16 + $0xe8] ss:$16 sps:$4 sm:$0xff]  }
 0x539   : > { %v4843_v22 = vsel %vm4841_vm0, %v4838_v20, %v4834_v41  ;;  %v4845_v29 = vsel %vm4841_vm0, %v4840_v12, %v4836_v31  ;;  %v6892_v41 = vld [vmem:[%s10296_s16 + $0xc8] ss:$16 sps:$4 sm:$0xff]   ;;  %v6894_v20 = vld [vmem:[%s10296_s16 + $0xcc] ss:$16 sps:$4 sm:$0xff]   ;;  %v6897_v31 = vld [vmem:[%s10296_s16 + $0xe4] ss:$16 sps:$4 sm:$0xff]  }
 0x53a   : > { %v4847_v48 = vpack.c.b16 %v4843_v22, %v4843_v22  ;;  %v4849_v21 = vpack.c.b16 %v4845_v29, %v4845_v29  ;;  %v6900_v12 = vld [vmem:[%s10296_s16 + $0xec] ss:$16 sps:$4 sm:$0xff]   ;;  %v6895_v2 = vld [vmem:[%s10296_s16 + $0xe0] ss:$16 sps:$4 sm:$0xff]   ;;  %v6993_v22 = vmov 0  }
 0x53c   : > { %5078 = vmatprep.mubr.bf16.mxu1 %v4847_v48  ;;  %5118 = vmatprep.mubr.bf16.mxu0 %v4849_v21  ;;  %v6144_v21 = vld [vmem:[%s10295_s15] ss:$0 sm:$0xff] }
 0x53d   : > { %5079 = vmatmul.mubr.bf16.vlgmr.msra.gmra.mrb[112].mxu1 %v4846_v8  ;;  %5119 = vmatmul.mubr.bf16.vlgmr.msra.gmra.mrb[128].mxu0 %v4848_v15 }
 0x53e   : > { %5343 = vmatpush1.bf16.msra.mxu1 %v6853_v11  ;;  %5384 = vmatpush1.bf16.msra.mxu0 %v6856_v44 }
 0x53f   : > { %5344 = vmatprep.subr.bf16.mxu1 %v6861_v49  ;;  %5385 = vmatprep.subr.bf16.mxu0 %v6864_v1 }
 0x540   : > { %5374 = vmatprep.mubr.bf16.mxu1 %v6993_v22  ;;  %5415 = vmatprep.mubr.bf16.mxu0 %v6993_v22 }
 0x542   : > { %5345 = vmatpush1.bf16.msra.mxu1 %v6859_v32  ;;  %5386 = vmatpush1.bf16.msra.mxu0 %v6862_v26 }
 0x543   : > { %5346 = vmatprep.subr.bf16.mxu1 %v6867_v36  ;;  %5387 = vmatprep.subr.bf16.mxu0 %v6870_v55 }
 0x546   : > { %5347 = vmatpush1.bf16.msra.mxu1 %v6865_v46  ;;  %5388 = vmatpush1.bf16.msra.mxu0 %v6868_v59 }
 0x547   : > { %5348 = vmatprep.subr.bf16.mxu1 %v6873_v10  ;;  %5389 = vmatprep.subr.bf16.mxu0 %v6876_v57  ;;  %v5160_v10 = vld [vmem:[%s10297_s17] sm:$0xf] }
 0x548   : > { %v5165_v57 = vrot.slane %v5160_v10, %v10437_v14 }
 0x54a   : > { %5349 = vmatpush1.bf16.msra.mxu1 %v6871_v47  ;;  %5390 = vmatpush1.bf16.msra.mxu0 %v6874_v19  ;;  %v5173_v47 = vrot.slane %v5160_v10, %v10438_v13  ;;  %v5169_v19 = vrot.slane %v5160_v10, %v10439_v37 }
 0x54b   : > { %5350 = vmatprep.subr.bf16.mxu1 %v6879_v33  ;;  %5391 = vmatprep.subr.bf16.mxu0 %v6882_v28  ;;  %v5177_v33 = vrot.slane %v5160_v10, %v8327_v43  ;;  %v10490_v10 = vld [vmem:[#allocation16_spill] sm:$0xff] }
 0x54e   : > { %5351 = vmatpush1.bf16.msra.mxu1 %v6877_v34  ;;  %5392 = vmatpush1.bf16.msra.mxu0 %v6880_v25 }
 0x54f   : > { %5352 = vmatprep.subr.bf16.mxu1 %v6885_v39  ;;  %5393 = vmatprep.subr.bf16.mxu0 %v6888_v9 }
 0x552   : > { %5353 = vmatpush1.bf16.msra.mxu1 %v6883_v3  ;;  %5394 = vmatpush1.bf16.msra.mxu0 %v6886_v54 }
 0x553   : > { %5354 = vmatprep.subr.bf16.mxu1 %v6891_v16  ;;  %5395 = vmatprep.subr.bf16.mxu0 %v6894_v20 }
 0x556   : > { %5355 = vmatpush1.bf16.msra.mxu1 %v6889_v63  ;;  %5396 = vmatpush1.bf16.msra.mxu0 %v6892_v41 }
 0x557   : > { %5356 = vmatprep.subr.bf16.mxu1 %v6897_v31  ;;  %5397 = vmatprep.subr.bf16.mxu0 %v6900_v12 }
 0x55a   : > { %5357 = vmatpush1.bf16.msra.mxu1 %v6895_v2  ;;  %5398 = vmatpush1.bf16.msra.mxu0 %v6898_v62 }
 0x610   : > { %v6286_v29 = vpop.f32.mrb[112].mxu1  ;;  %v6308_v48 = vpop.f32.mrb[128].mxu0 }
 0x611   : > { %v6287_v11 = vpop.f32.mrb[113].mxu1  ;;  %v6309_v44 = vpop.f32.mrb[129].mxu0 }
 0x612   : > { %v6288_v8 = vadd.f32 %v6287_v11, %v6286_v29  ;;  %v6310_v15 = vadd.f32 %v6309_v44, %v6308_v48  ;;  %v6289_v49 = vpop.f32.mrb[114].mxu1  ;;  %v6311_v1 = vpop.f32.mrb[130].mxu0  ;;  %v2219_v29 = vld [vmem:[%s10285_s5] sm:$0xf] }
 0x613   : > { %v6290_v32 = vpop.f32.mrb[115].mxu1  ;;  %v6312_v26 = vpop.f32.mrb[131].mxu0  ;;  %v2224_v11 = vrot.slane %v2219_v29, %v10437_v14  ;;  %v2228_v44 = vrot.slane %v2219_v29, %v10439_v37 }
 0x614   : > { %v5081_v36 = vadd.f32 %v6288_v8, %v6144_v21 }
 0x616   : > { %v5121_v55 = vadd.f32 %v6310_v15, %v5081_v36  ;;  %v10488_v36 = vld [vmem:[#allocation14_spill] sm:$0xff] }
 0x618   : > { %v5126_v46 = vmax.f32 %v5121_v55, 0.0  ;;  %v9597_v55 = vadd.f32 %v2224_v11, %v10488_v36 }
 0x61a   : > { %v5127_v59 = vpack.c.bf16 %v5126_v46, %v5126_v46  ;;  %v10489_v46 = vld [vmem:[#allocation15_spill] sm:$0xff] }
 0x61c   : > { %5375 = vmatmul.mubr.bf16.vlgmr.msra.gmra.mrb[116].mxu1 %v5127_v59  ;;  %5416 = vmatmul.mubr.bf16.vlgmr.msra.gmra.mrb[132].mxu0 %v5127_v59  ;;  %v9600_v59 = vadd.f32 %v2228_v44, %v10489_v46  ;;  %v10514_v46 = vld [vmem:[#allocation30_spill] sm:$0xff] }
 0x6ef   : > { %v5376_v28 = vpop.f32.mrb[116].mxu1  ;;  %v5417_v34 = vpop.f32.mrb[132].mxu0 }
 0x6f0   : > { %v5377_v25 = vadd.f32 %v5376_v28, %v5165_v57  ;;  %v5418_v3 = vadd.f32 %v5417_v34, %v5173_v47  ;;  %v5378_v39 = vpop.f32.mrb[117].mxu1  ;;  %v5419_v54 = vpop.f32.mrb[133].mxu0  ;;  %v9603_v57 = vadd.f32 %v2224_v11, %v10490_v10  ;;  %v10491_v47 = vld [vmem:[#allocation17_spill] sm:$0xff]  ;;  %v10492_v34 = vld [vmem:[#allocation18_spill] sm:$0xff]  ;;  %v9645_v10 = vadd.f32 %v2224_v11, %v10514_v46 }
 0x6f1   : > { %v5379_v9 = vadd.f32 %v5378_v39, %v5169_v19  ;;  %v5420_v63 = vadd.f32 %v5419_v54, %v5177_v33  ;;  %v5380_v16 = vpop.f32.mrb[118].mxu1  ;;  %v5421_v41 = vpop.f32.mrb[134].mxu0  ;;  %v9606_v19 = vadd.f32 %v2228_v44, %v10491_v47  ;;  %v6994_v33 = vmov 1966171168   ;;  %v10494_v54 = vld [vmem:[#allocation20_spill] sm:$0xff]  ;;  %v10516_v47 = vld [vmem:[#allocation31_spill] sm:$0xff] }
 0x6f2   : > { %v6209_v20 = vmul.f32 -1.442695, %v5377_v25  ;;  %v6211_v31 = vmul.f32 -1.442695, %v5418_v3  ;;  %v5381_v12 = vpop.f32.mrb[119].mxu1  ;;  %v5422_v2 = vpop.f32.mrb[135].mxu0  ;;  %v5455_v28 = vunpack.c.l.s4 %v6994_v33  ;;  %v9609_v25 = vadd.f32 %v2224_v11, %v10492_v34 }
 0x6f3   : > { %v6210_v62 = vmul.f32 -1.442695, %v5379_v9  ;;  %v6212_v22 = vmul.f32 -1.442695, %v5420_v63  ;;  %v10493_v3 = vld [vmem:[#allocation19_spill] sm:$0xff]  ;;  %v9615_v9 = vadd.f32 %v2224_v11, %v10494_v54  ;;  %v10496_v63 = vld [vmem:[#allocation21_spill] sm:$0xff]  ;;  %v9648_v33 = vadd.f32 %v2228_v44, %v10516_v47 }
 0x6f4   : > { %6901 = vpow2.f32 %v6209_v20  ;;  %v9612_v39 = vadd.f32 %v2228_v44, %v10493_v3  ;;  %v9618_v16 = vadd.f32 %v2228_v44, %v10496_v63  ;;  %v10498_v41 = vld [vmem:[#allocation22_spill] sm:$0xff]  ;;  %v10502_v2 = vld [vmem:[#allocation24_spill] sm:$0xff]  ;;  %v5456_v54 = vunpack.c.0.s8 %v5455_v28  ;;  %v10520_v63 = vld [vmem:[#allocation33_spill] sm:$0xff] }
 0x6f5   : > { %6903 = vpow2.f32 %v6211_v31  ;;  %10495 = vst [vmem:[#allocation14_spill] sm:$0xff] %v9615_v9  ;;  %v9621_v20 = vadd.f32 %v2224_v11, %v10498_v41  ;;  %v10500_v31 = vld [vmem:[#allocation23_spill] sm:$0xff]  ;;  %10515 = vst [vmem:[#allocation24_spill] sm:$0xff] %v9645_v10  ;;  %v10518_v34 = vld [vmem:[#allocation32_spill] sm:$0xff]  ;;  %v9654_v41 = vadd.f32 %v2228_v44, %v10520_v63 }
 0x6f6   : > { %6905 = vpow2.f32 %v6210_v62  ;;  %10497 = vst [vmem:[#allocation15_spill] sm:$0xff] %v9618_v16  ;;  %v9624_v12 = vadd.f32 %v2228_v44, %v10500_v31  ;;  %v9627_v62 = vadd.f32 %v2224_v11, %v10502_v2  ;;  %v9651_v3 = vadd.f32 %v2224_v11, %v10518_v34  ;;  %v10522_v31 = vld [vmem:[#allocation34_spill] sm:$0xff]  ;;  %v10528_v47 = vld [vmem:[#allocation37_spill] sm:$0xff] }
 0x6f7   : > { %6907 = vpow2.f32 %v6212_v22  ;;  %10499 = vst [vmem:[#allocation16_spill] sm:$0xff] %v9621_v20  ;;  %v10504_v22 = vld [vmem:[#allocation25_spill] sm:$0xff]  ;;  %v9657_v2 = vadd.f32 %v2224_v11, %v10522_v31  ;;  %v9668_v34 = vadd.f32 %v2228_v44, %v10528_v47  ;;  %v10530_v28 = vld [vmem:[#allocation38_spill] sm:$0xff] }
 0x6f8   : > { %10501 = vst [vmem:[#allocation17_spill] sm:$0xff] %v9624_v12  ;;  %10503 = vst [vmem:[#allocation18_spill] sm:$0xff] %v9627_v62  ;;  %v10567_v62 = vld [vmem:[#allocation59_spill] sm:$0xff] }
 0x6f9   : > { %10517 = vst [vmem:[#allocation25_spill] sm:$0xff] %v9648_v33  ;;  %10529 = vst [vmem:[#allocation31_spill] sm:$0xff] %v9668_v34  ;;  %v10542_v34 = vld [vmem:[#allocation44_spill] sm:$0xff] }
 0x6fe   : > { %v6902_v48 = vpop.eup %6901 }
 0x6ff   : > { %v6904_v21 = vpop.eup %6903  ;;  %v5436_v8 = vadd.f32 1.0, %v6902_v48  ;;  %v9630_v48 = vadd.f32 %v2228_v44, %v10504_v22  ;;  %v2232_v22 = vrot.slane %v2219_v29, %v10438_v13 }
 0x700   : > { %v6906_v15 = vpop.eup %6905  ;;  %v5438_v49 = vadd.f32 1.0, %v6904_v21  ;;  %v10506_v21 = vld [vmem:[#allocation26_spill] sm:$0xff] }
 0x701   : > { %v6908_v1 = vpop.eup %6907  ;;  %6909 = vrcp.f32 %v5436_v8  ;;  %v5437_v32 = vadd.f32 1.0, %v6906_v15  ;;  %10505 = vst [vmem:[#allocation19_spill] sm:$0xff] %v9630_v48  ;;  %v9633_v8 = vadd.f32 %v2224_v11, %v10506_v21  ;;  %v10508_v15 = vld [vmem:[#allocation27_spill] sm:$0xff]  ;;  %10519 = vst [vmem:[#allocation26_spill] sm:$0xff] %v9651_v3  ;;  %v2236_v21 = vrot.slane %v2219_v29, %v8327_v43  ;;  %v10536_v29 = vld [vmem:[#allocation41_spill] sm:$0xff] }
 0x702   : > { %6911 = vrcp.f32 %v5438_v49  ;;  %v5439_v26 = vadd.f32 1.0, %v6908_v1  ;;  %v9636_v49 = vadd.f32 %v2228_v44, %v10508_v15  ;;  %v10510_v1 = vld [vmem:[#allocation28_spill] sm:$0xff]  ;;  %10521 = vst [vmem:[#allocation27_spill] sm:$0xff] %v9654_v41  ;;  %v10524_v15 = vld [vmem:[#allocation35_spill] sm:$0xff]  ;;  %v9671_v3 = vadd.f32 %v2224_v11, %v10530_v28  ;;  %v10561_v48 = vld [vmem:[#allocation57_spill] sm:$0xff] }
 0x703   : > { %6913 = vrcp.f32 %v5437_v32  ;;  %10507 = vst [vmem:[#allocation20_spill] sm:$0xff] %v9633_v8  ;;  %v9639_v32 = vadd.f32 %v2224_v11, %v10510_v1  ;;  %10523 = vst [vmem:[#allocation28_spill] sm:$0xff] %v9657_v2  ;;  %v9662_v1 = vadd.f32 %v2228_v44, %v10524_v15  ;;  %v10532_v41 = vld [vmem:[#allocation39_spill] sm:$0xff]  ;;  %v10534_v2 = vld [vmem:[#allocation40_spill] sm:$0xff]  ;;  %v9680_v10 = vadd.f32 %v2228_v44, %v10536_v29 }
 0x704   : > { %6915 = vrcp.f32 %v5439_v26  ;;  %10509 = vst [vmem:[#allocation21_spill] sm:$0xff] %v9636_v49  ;;  %v10512_v26 = vld [vmem:[#allocation29_spill] sm:$0xff]  ;;  %10531 = vst [vmem:[#allocation32_spill] sm:$0xff] %v9671_v3  ;;  %v9674_v31 = vadd.f32 %v2228_v44, %v10532_v41  ;;  %v9677_v33 = vadd.f32 %v2224_v11, %v10534_v2  ;;  %v10538_v15 = vld [vmem:[#allocation42_spill] sm:$0xff]  ;;  %v9689_v28 = vadd.f32 %v2224_v11, %v10542_v34 }
 0x705   : > { %10511 = vst [vmem:[#allocation22_spill] sm:$0xff] %v9639_v32  ;;  %v9642_v36 = vadd.f32 %v2228_v44, %v10512_v26  ;;  %10525 = vst [vmem:[#allocation29_spill] sm:$0xff] %v9662_v1  ;;  %v10526_v26 = vld [vmem:[#allocation36_spill] sm:$0xff]  ;;  %v9683_v1 = vadd.f32 %v2224_v11, %v10538_v15  ;;  %v10544_v3 = vld [vmem:[#allocation45_spill] sm:$0xff]  ;;  %v5459_v41 = vsub.s32 %v5456_v54, %v7639_v30 }
 0x706   : > { %v9665_v46 = vadd.f32 %v2224_v11, %v10526_v26  ;;  %10533 = vst [vmem:[#allocation33_spill] sm:$0xff] %v9674_v31  ;;  %10535 = vst [vmem:[#allocation34_spill] sm:$0xff] %v9677_v33  ;;  %v10546_v33 = vld [vmem:[#allocation47_spill] sm:$0xff]  ;;  %v10547_v29 = vld [vmem:[#allocation48_spill] sm:$0xff] }
 0x707   : > { %10513 = vst [vmem:[#allocation23_spill] sm:$0xff] %v9642_v36  ;;  %10537 = vst [vmem:[#allocation35_spill] sm:$0xff] %v9680_v10  ;;  %v9692_v36 = vadd.f32 %v2228_v44, %v10544_v3  ;;  %v9696_v31 = vadd.f32 %v2232_v22, %v10546_v33  ;;  %v9699_v10 = vadd.f32 %v2236_v21, %v10547_v29  ;;  %v10548_v15 = vld [vmem:[#allocation49_spill] sm:$0xff]  ;;  %v10550_v34 = vld [vmem:[#allocation51_spill] sm:$0xff] }
 0x708   : > { %10527 = vst [vmem:[#allocation30_spill] sm:$0xff] %v9665_v46  ;;  %10539 = vst [vmem:[#allocation36_spill] sm:$0xff] %v9683_v1  ;;  %v10540_v46 = vld [vmem:[#allocation43_spill] sm:$0xff]  ;;  %v9702_v1 = vadd.f32 %v2232_v22, %v10548_v15  ;;  %v10553_v30 = vld [vmem:[#allocation53_spill] sm:$0xff] }
 0x709   : > { %v9686_v47 = vadd.f32 %v2228_v44, %v10540_v46  ;;  %10543 = vst [vmem:[#allocation38_spill] sm:$0xff] %v9689_v28  ;;  %10545 = vst [vmem:[#allocation39_spill] sm:$0xff] %v9692_v36  ;;  %v10549_v46 = vld [vmem:[#allocation50_spill] sm:$0xff]  ;;  %v9708_v28 = vadd.f32 %v2232_v22, %v10550_v34  ;;  %v10551_v44 = vld [vmem:[#allocation52_spill] sm:$0xff]  ;;  %v9714_v54 = vadd.f32 %v2232_v22, %v10553_v30 }
 0x70a   : > { %v9711_v3 = vadd.f32 %v2236_v21, %v10551_v44  ;;  %v10555_v36 = vld [vmem:[#allocation54_spill] sm:$0xff]  ;;  %v10557_v32 = vld [vmem:[#allocation55_spill] sm:$0xff]  ;;  %v10559_v49 = vld [vmem:[#allocation56_spill] sm:$0xff]  ;;  %v9726_v34 = vadd.f32 %v2232_v22, %v10561_v48  ;;  %v9729_v44 = vadd.f32 %v2236_v21, %v8091_v42  ;;  %v9732_v30 = vadd.f32 %v2232_v22, %v8095_v18 }
 0x70b   : > { %v6910_v63 = vpop.eup %6909  ;;  %10541 = vst [vmem:[#allocation37_spill] sm:$0xff] %v9686_v47  ;;  %v9705_v47 = vadd.f32 %v2236_v21, %v10549_v46  ;;  %10554 = vst [vmem:[#allocation41_spill] sm:$0xff] %v9714_v54  ;;  %v9717_v29 = vadd.f32 %v2236_v21, %v10555_v36  ;;  %v9720_v15 = vadd.f32 %v2232_v22, %v10557_v32 }
 0x70c   : > { %v6912_v26 = vpop.eup %6911  ;;  %10552 = vst [vmem:[#allocation40_spill] sm:$0xff] %v9711_v3  ;;  %v9723_v46 = vadd.f32 %v2236_v21, %v10559_v49  ;;  %10562 = vst [vmem:[#allocation45_spill] sm:$0xff] %v9726_v34  ;;  %v9738_v32 = vadd.f32 %v2232_v22, %v10567_v62  ;;  %v10573_v34 = vld [vmem:[#allocation62_spill] sm:$0xff]  ;;  %v9750_v18 = vadd.f32 %v2232_v22, %v8136_v4  ;;  %v10580_v62 = vld [vmem:[#allocation65_spill] sm:$0xff] }
 0x70d   : > { %v6914_v2 = vpop.eup %6913  ;;  %10556 = vst [vmem:[#allocation42_spill] sm:$0xff] %v9717_v29  ;;  %10558 = vst [vmem:[#allocation43_spill] sm:$0xff] %v9720_v15  ;;  %v10569_v15 = vld [vmem:[#allocation60_spill] sm:$0xff]  ;;  %v9747_v42 = vadd.f32 %v2236_v21, %v10573_v34 }
 0x70e   : > { %v6916_v11 = vpop.eup %6915  ;;  %v5452_v33 = vcombine.low %v6910_v63, %v6914_v2  ;;  %10560 = vst [vmem:[#allocation44_spill] sm:$0xff] %v9723_v46  ;;  %10563 = vst [vmem:[#allocation47_spill] sm:$0xff] %v9729_v44  ;;  %v10565_v2 = vld [vmem:[#allocation58_spill] sm:$0xff]  ;;  %v9741_v49 = vadd.f32 %v2236_v21, %v10569_v15 }
 0x70f   : > { %v5453_v8 = vcombine.low %v6912_v26, %v6916_v11  ;;  %10564 = vst [vmem:[#allocation48_spill] sm:$0xff] %v9732_v30  ;;  %v9735_v36 = vadd.f32 %v2236_v21, %v10565_v2  ;;  %10568 = vst [vmem:[#allocation50_spill] sm:$0xff] %v9738_v32  ;;  %v10571_v11 = vld [vmem:[#allocation61_spill] sm:$0xff]  ;;  %v10578_v2 = vld [vmem:[#allocation64_spill] sm:$0xff]  ;;  %v9759_v32 = vadd.f32 %v2236_v21, %v10580_v62 }
 0x710   : > { %v5460_v63 = vrot.slane %v5452_v33, %v5459_v41  ;;  %10570 = vst [vmem:[#allocation51_spill] sm:$0xff] %v9741_v49  ;;  %v9744_v48 = vadd.f32 %v2232_v22, %v10571_v11  ;;  %10574 = vst [vmem:[#allocation53_spill] sm:$0xff] %v9747_v42  ;;  %v10576_v33 = vld [vmem:[#allocation63_spill] sm:$0xff]  ;;  %v10582_v49 = vld [vmem:[#allocation66_spill] sm:$0xff] }
 0x711   : > { %10566 = vst [vmem:[#allocation49_spill] sm:$0xff] %v9735_v36  ;;  %v5467_v26 = vrot.slane %v5453_v8, %v5459_v41  ;;  %10575 = vst [vmem:[#allocation54_spill] sm:$0xff] %v9750_v18  ;;  %v9753_v30 = vadd.f32 %v2236_v21, %v10576_v33  ;;  %v9756_v36 = vadd.f32 %v2232_v22, %v10578_v2  ;;  %v10586_v42 = vld [vmem:[#allocation68_spill] sm:$0xff]  ;;  %v10588_v18 = vld [vmem:[#allocation69_spill] sm:$0xff] }
 0x712   : > { %10572 = vst [vmem:[#allocation52_spill] sm:$0xff] %v9744_v48  ;;  %10581 = vst [vmem:[#allocation57_spill] sm:$0xff] %v9759_v32  ;;  %v9762_v11 = vadd.f32 %v2232_v22, %v10582_v49  ;;  %v10584_v48 = vld [vmem:[#allocation67_spill] sm:$0xff]  ;;  %v9768_v4 = vadd.f32 %v2232_v22, %v10586_v42  ;;  %v9771_v33 = vadd.f32 %v2236_v21, %v10588_v18 }
 0x713   : > { %10577 = vst [vmem:[#allocation55_spill] sm:$0xff] %v9753_v30  ;;  %10579 = vst [vmem:[#allocation56_spill] sm:$0xff] %v9756_v36  ;;  %v5468_v15 = vcombine.low %v5460_v63, %v5467_v26  ;;  %v5469_v8 = vcombine.high %v5460_v63, %v5467_v26  ;;  %v9765_v34 = vadd.f32 %v2236_v21, %v10584_v48  ;;  %v10590_v30 = vld [vmem:[#allocation70_spill] sm:$0xff]  ;;  %v10592_v36 = vld [vmem:[#allocation71_spill] sm:$0xff] }
 0x714   : > { %10583 = vst [vmem:[#allocation58_spill] sm:$0xff] %v9762_v11  ;;  %10587 = vst [vmem:[#allocation60_spill] sm:$0xff] %v9768_v4  ;;  %v9774_v2 = vadd.f32 %v2232_v22, %v10590_v30  ;;  %v9777_v62 = vadd.f32 %v2236_v21, %v10592_v36  ;;  %v10594_v26 = vld [vmem:[#allocation72_spill] sm:$0xff]  ;;  %v10596_v11 = vld [vmem:[#allocation73_spill] sm:$0xff] }
 0x715   : > { %10585 = vst [vmem:[#allocation59_spill] sm:$0xff] %v9765_v34  ;;  %10589 = vst [vmem:[#allocation61_spill] sm:$0xff] %v9771_v33  ;;  %v5476_v32 = vrot.slane %v5468_v15, %v5459_v41  ;;  %v5483_v63 = vrot.slane %v5469_v8, %v5459_v41  ;;  %v9780_v49 = vadd.f32 %v2232_v22, %v10594_v26  ;;  %v10598_v34 = vld [vmem:[#allocation74_spill] sm:$0xff]  ;;  %v10600_v4 = vld [vmem:[#allocation75_spill] sm:$0xff] }
 0x716   : > { %10591 = vst [vmem:[#allocation62_spill] sm:$0xff] %v9774_v2  ;;  %10593 = vst [vmem:[#allocation63_spill] sm:$0xff] %v9777_v62  ;;  %v9783_v48 = vadd.f32 %v2236_v21, %v10596_v11  ;;  %v9786_v42 = vadd.f32 %v2232_v22, %v10598_v34  ;;  %v9789_v18 = vadd.f32 %v2236_v21, %v10600_v4  ;;  %v10602_v11 = vld [vmem:[#allocation12_spill] sm:$0xff]  ;;  %v10603_v4 = vld [vmem:[#allocation13_spill] sm:$0xff] }
 0x717   : > { %10595 = vst [vmem:[#allocation64_spill] sm:$0xff] %v9780_v49  ;;  %v5487_v30 = vrot.slane %v5476_v32, %v10437_v14  ;;  %v5491_v2 = vrot.slane %v5476_v32, %v10439_v37  ;;  %v5495_v36 = vrot.slane %v5476_v32, %v10438_v13  ;;  %v5499_v41 = vrot.slane %v5476_v32, %v8327_v43 }
 0x718   : > { %10597 = vst [vmem:[#allocation65_spill] sm:$0xff] %v9783_v48  ;;  %10599 = vst [vmem:[#allocation66_spill] sm:$0xff] %v9786_v42  ;;  %v9796_v15 = vrot.slane %v5483_v63, %v10437_v14  ;;  %v9799_v8 = vrot.slane %v5483_v63, %v10439_v37  ;;  %v9802_v22 = vrot.slane %v5483_v63, %v10438_v13  ;;  %v10605_v14 = vld [vmem:[#allocation76_spill] sm:$0xff]  ;;  %v10606_v37 = vld [vmem:[#allocation77_spill] sm:$0xff] }
 0x719   : > { %10601 = vst [vmem:[#allocation67_spill] sm:$0xff] %v9789_v18  ;;  %v9805_v21 = vrot.slane %v5483_v63, %v8327_v43  ;;  %v9808_v34 = vmul.f32 %v5487_v30, %v10602_v11  ;;  %v9811_v26 = vmul.f32 %v5491_v2, %v10603_v4  ;;  %v10604_v18 = vld [vmem:[#allocation46_spill] sm:$0xff]  ;;  %v9817_v42 = vmul.f32 %v5499_v41, %v10605_v14  ;;  %v10607_v13 = vld [vmem:[#allocation79_spill] sm:$0xff]  ;;  %v10609_v11 = vld [vmem:[#allocation80_spill] sm:$0xff] }
 0x71a   : > { %v9814_v32 = vmul.f32 %v5495_v36, %v10604_v18  ;;  %v9820_v48 = vmul.f32 %v5487_v30, %v10606_v37  ;;  %v9823_v49 = vmul.f32 %v5491_v2, %v10607_v13  ;;  %v10608_v43 = vld [vmem:[#allocation78_spill] sm:$0xff]  ;;  %v9829_v62 = vmul.f32 %v5499_v41, %v10609_v11  ;;  %v10610_v4 = vld [vmem:[#allocation81_spill] sm:$0xff]  ;;  %v10611_v18 = vld [vmem:[#allocation83_spill] sm:$0xff] }
 0x71b   : > { %v9826_v63 = vmul.f32 %v5495_v36, %v10608_v43  ;;  %v9832_v33 = vmul.f32 %v5487_v30, %v10610_v4  ;;  %v9835_v44 = vmul.f32 %v5491_v2, %v10611_v18  ;;  %v10612_v14 = vld [vmem:[#allocation82_spill] sm:$0xff]  ;;  %v10613_v37 = vld [vmem:[#allocation84_spill] sm:$0xff]  ;;  %v10615_v13 = vld [vmem:[#allocation85_spill] sm:$0xff] }
 0x71c   : > { %v9838_v46 = vmul.f32 %v5495_v36, %v10612_v14  ;;  %v9841_v12 = vmul.f32 %v5499_v41, %v10613_v37  ;;  %v9844_v20 = vmul.f32 %v5487_v30, %v10615_v13  ;;  %v10617_v43 = vld [vmem:[#allocation87_spill] sm:$0xff]  ;;  %v10619_v11 = vld [vmem:[#allocation86_spill] sm:$0xff]  ;;  %v10621_v4 = vld [vmem:[#allocation88_spill] sm:$0xff] }
 0x71d   : > { %v9847_v29 = vmul.f32 %v5491_v2, %v10617_v43  ;;  %v9850_v54 = vmul.f32 %v5495_v36, %v10619_v11  ;;  %v9853_v16 = vmul.f32 %v5499_v41, %v10621_v4  ;;  %v10623_v18 = vld [vmem:[#allocation89_spill] sm:$0xff]  ;;  %v10625_v14 = vld [vmem:[#allocation91_spill] sm:$0xff]  ;;  %v10627_v37 = vld [vmem:[#allocation90_spill] sm:$0xff] }
 0x71e   : > { %10614 = vst [vmem:[#allocation68_spill] sm:$0xff] %v9841_v12  ;;  %10616 = vst [vmem:[#allocation69_spill] sm:$0xff] %v9844_v20  ;;  %v9856_v9 = vmul.f32 %v5487_v30, %v10623_v18  ;;  %v9859_v3 = vmul.f32 %v5491_v2, %v10625_v14  ;;  %v9862_v12 = vmul.f32 %v5495_v36, %v10627_v37  ;;  %v10629_v13 = vld [vmem:[#allocation92_spill] sm:$0xff]  ;;  %v10631_v43 = vld [vmem:[#allocation93_spill] sm:$0xff] }
 0x71f   : > { %10618 = vst [vmem:[#allocation70_spill] sm:$0xff] %v9847_v29  ;;  %10620 = vst [vmem:[#allocation71_spill] sm:$0xff] %v9850_v54  ;;  %v9865_v20 = vmul.f32 %v5499_v41, %v10629_v13  ;;  %v9868_v29 = vmul.f32 %v5487_v30, %v10631_v43  ;;  %v10633_v11 = vld [vmem:[#allocation95_spill] sm:$0xff]  ;;  %v10635_v4 = vld [vmem:[#allocation94_spill] sm:$0xff] }
 0x720   : > { %10622 = vst [vmem:[#allocation72_spill] sm:$0xff] %v9853_v16  ;;  %10624 = vst [vmem:[#allocation73_spill] sm:$0xff] %v9856_v9  ;;  %v9871_v54 = vmul.f32 %v5491_v2, %v10633_v11  ;;  %v9874_v16 = vmul.f32 %v5495_v36, %v10635_v4  ;;  %v10637_v18 = vld [vmem:[#allocation96_spill] sm:$0xff]  ;;  %v10639_v14 = vld [vmem:[#allocation97_spill] sm:$0xff] }
 0x721   : > { %10626 = vst [vmem:[#allocation74_spill] sm:$0xff] %v9859_v3  ;;  %10628 = vst [vmem:[#allocation75_spill] sm:$0xff] %v9862_v12  ;;  %v9877_v9 = vmul.f32 %v5499_v41, %v10637_v18  ;;  %v9880_v3 = vmul.f32 %v5487_v30, %v10639_v14  ;;  %v10641_v37 = vld [vmem:[#allocation99_spill] sm:$0xff]  ;;  %v10643_v13 = vld [vmem:[#allocation98_spill] sm:$0xff] }
 0x722   : > { %10630 = vst [vmem:[#allocation12_spill] sm:$0xff] %v9865_v20  ;;  %10632 = vst [vmem:[#allocation13_spill] sm:$0xff] %v9868_v29  ;;  %v9883_v12 = vmul.f32 %v5491_v2, %v10641_v37  ;;  %v9886_v20 = vmul.f32 %v5495_v36, %v10643_v13  ;;  %v10644_v43 = vld [vmem:[#allocation100_spill] sm:$0xff]  ;;  %v10645_v11 = vld [vmem:[#allocation101_spill] sm:$0xff]  ;;  %v9909_v13 = vmul.f32 %v9799_v8, %v9276_v0 }
 0x723   : > { %10634 = vst [vmem:[#allocation46_spill] sm:$0xff] %v9871_v54  ;;  %10636 = vst [vmem:[#allocation76_spill] sm:$0xff] %v9874_v16  ;;  %v9889_v29 = vmul.f32 %v5499_v41, %v10644_v43  ;;  %v9892_v54 = vmul.f32 %v5487_v30, %v10645_v11  ;;  %v10646_v4 = vld [vmem:[#allocation103_spill] sm:$0xff]  ;;  %v10647_v18 = vld [vmem:[#allocation102_spill] sm:$0xff] }
 0x724   : > { %10638 = vst [vmem:[#allocation77_spill] sm:$0xff] %v9877_v9  ;;  %10640 = vst [vmem:[#allocation79_spill] sm:$0xff] %v9880_v3  ;;  %v9895_v16 = vmul.f32 %v5491_v2, %v10646_v4  ;;  %v9898_v9 = vmul.f32 %v5495_v36, %v10647_v18  ;;  %v10648_v14 = vld [vmem:[#allocation104_spill] sm:$0xff]  ;;  %v10649_v37 = vld [vmem:[#allocation105_spill] sm:$0xff]  ;;  %v9917_v2 = vmul.f32 %v9805_v21, %v9279_v60 }
 0x725   : > { %10642 = vst [vmem:[#allocation78_spill] sm:$0xff] %v9883_v12  ;;  %v9901_v3 = vmul.f32 %v5499_v41, %v10648_v14  ;;  %v9905_v12 = vmul.f32 %v9796_v15, %v10649_v37  ;;  %v10650_v43 = vld [vmem:[#allocation106_spill] sm:$0xff]  ;;  %v10651_v36 = vld [vmem:[#allocation107_spill] sm:$0xff]  ;;  %v10652_v11 = vld [vmem:[#allocation109_spill] sm:$0xff]  ;;  %v9938_v60 = vmul.f32 %v9796_v15, %v9308_v50  ;;  %v9958_v50 = vmul.f32 %v9799_v8, %v9364_v56 }
 0x726   : > { %v9913_v30 = vmul.f32 %v9802_v22, %v10650_v43  ;;  %v9922_v41 = vmul.f32 %v9796_v15, %v10651_v36  ;;  %v9926_v4 = vmul.f32 %v9799_v8, %v10652_v11  ;;  %v10653_v0 = vld [vmem:[#allocation108_spill] sm:$0xff]  ;;  %v10654_v14 = vld [vmem:[#allocation110_spill] sm:$0xff]  ;;  %v9942_v43 = vmul.f32 %v9799_v8, %v9344_v58  ;;  %v10655_v36 = vld [vmem:[#allocation111_spill] sm:$0xff] }
 0x727   : > { %v9930_v18 = vmul.f32 %v9802_v22, %v10653_v0  ;;  %v9934_v37 = vmul.f32 %v9805_v21, %v10654_v14  ;;  %v9946_v11 = vmul.f32 %v9802_v22, %v10655_v36  ;;  %v9950_v0 = vmul.f32 %v9805_v21, %v9347_v5 }
 0x728   : > { %v9954_v14 = vmul.f32 %v9796_v15, %v9350_v23  ;;  %v9962_v58 = vmul.f32 %v9802_v22, %v9353_v61  ;;  %v9966_v36 = vmul.f32 %v9805_v21, %v9367_v7  ;;  %v9972_v5 = vmul.f32 %v9796_v15, %v9380_v40  ;;  %v10657_v61 = vld [vmem:[#allocation112_spill] sm:$0xff] }
 0x729   : > { %v9976_v23 = vmul.f32 %v9799_v8, %v9400_v51  ;;  %v9980_v56 = vmul.f32 %v9802_v22, %v9383_v6  ;;  %v9988_v7 = vmul.f32 %v9796_v15, %v9408_v38  ;;  %v9992_v40 = vmul.f32 %v9799_v8, %v9420_v53 }
 0x72a   : > { %10656 = vst [vmem:[#allocation80_spill] sm:$0xff] %v9962_v58  ;;  %v9984_v58 = vmul.f32 %v9805_v21, %v10657_v61  ;;  %v9996_v51 = vmul.f32 %v9802_v22, %v9411_v24  ;;  %v10000_v6 = vmul.f32 %v9805_v21, %v9423_v45  ;;  %v10004_v61 = vmul.f32 %v9796_v15, %v9430_v52 }
 0x72b   : > { %v10008_v38 = vmul.f32 %v9799_v8, %v9454_v17  ;;  %v10012_v53 = vmul.f32 %v9802_v22, %v9433_v35  ;;  %v10016_v24 = vmul.f32 %v9805_v21, %v9457_v27  ;;  %v5588_v27 = vadd.f32 %v9808_v34, %v9597_v55 }
 0x72c   : > { %10658 = vst [vmem:[#allocation81_spill] sm:$0xff] %v9996_v51  ;;  %10659 = vst [vmem:[#allocation83_spill] sm:$0xff] %v10000_v6  ;;  %v10663_v51 = vld [vmem:[#allocation113_spill] sm:$0xff]  ;;  %v10664_v6 = vld [vmem:[#allocation115_spill] sm:$0xff]  ;;  %v5595_v55 = vadd.f32 %v9829_v62, %v9705_v47 }
 0x72d   : > { %10660 = vst [vmem:[#allocation82_spill] sm:$0xff] %v10004_v61  ;;  %10661 = vst [vmem:[#allocation84_spill] sm:$0xff] %v10008_v38  ;;  %v10020_v45 = vmul.f32 %v9796_v15, %v10663_v51  ;;  %v10024_v52 = vmul.f32 %v9799_v8, %v10664_v6  ;;  %v10665_v61 = vld [vmem:[#allocation114_spill] sm:$0xff]  ;;  %v10666_v38 = vld [vmem:[#allocation116_spill] sm:$0xff]  ;;  %v5590_v15 = vadd.f32 %v9814_v32, %v9696_v31 }
 0x72e   : > { %10662 = vst [vmem:[#allocation85_spill] sm:$0xff] %v10016_v24  ;;  %v10028_v17 = vmul.f32 %v9802_v22, %v10665_v61  ;;  %v10032_v35 = vmul.f32 %v9805_v21, %v10666_v38  ;;  %v5589_v24 = vadd.f32 %v9811_v26, %v9600_v59  ;;  %v5591_v8 = vadd.f32 %v9817_v42, %v9699_v10  ;;  %v10667_v42 = vld [vmem:[#allocation40_spill] sm:$0xff]  ;;  %v10672_v47 = vld [vmem:[#allocation70_spill] sm:$0xff]  ;;  %v10678_v32 = vld [vmem:[#allocation73_spill] sm:$0xff] }
 0x72f   : > { %v5592_v22 = vadd.f32 %v9820_v48, %v9603_v57  ;;  %v5593_v51 = vadd.f32 %v9823_v49, %v9606_v19  ;;  %v5594_v21 = vadd.f32 %v9826_v63, %v9702_v1  ;;  %v5596_v59 = vadd.f32 %v9832_v33, %v9609_v25  ;;  %v10668_v57 = vld [vmem:[#allocation68_spill] sm:$0xff]  ;;  %5652 = vst [vmem:[%s10058_s19] sm:$0xff] %v5588_v27  ;;  %v10669_v19 = vld [vmem:[#allocation14_spill] sm:$0xff]  ;;  %v10670_v25 = vld [vmem:[#allocation69_spill] sm:$0xff] }
 0x730   : > { %v5597_v31 = vadd.f32 %v9835_v44, %v9612_v39  ;;  %v5598_v10 = vadd.f32 %v9838_v46, %v9708_v28  ;;  %v5599_v48 = vadd.f32 %v10668_v57, %v10667_v42  ;;  %5653 = vst [vmem:[%s10058_s19 + $0x8] sm:$0xff] %v5589_v24  ;;  %5654 = vst [vmem:[%s10058_s19 + $0x10] sm:$0xff] %v5590_v15  ;;  %v10671_v1 = vld [vmem:[#allocation15_spill] sm:$0xff]  ;;  %v10673_v46 = vld [vmem:[#allocation41_spill] sm:$0xff] }
 0x731   : > { %5655 = vst [vmem:[%s10058_s19 + $0x18] sm:$0xff] %v5591_v8  ;;  %v5600_v39 = vadd.f32 %v10670_v25, %v10669_v19  ;;  %v5601_v28 = vadd.f32 %v10672_v47, %v10671_v1  ;;  %v10674_v44 = vld [vmem:[#allocation71_spill] sm:$0xff]  ;;  %v10675_v62 = vld [vmem:[#allocation42_spill] sm:$0xff]  ;;  %v10676_v49 = vld [vmem:[#allocation72_spill] sm:$0xff] }
 0x732   : > { %v5602_v33 = vadd.f32 %v10674_v44, %v10673_v46  ;;  %v5603_v34 = vadd.f32 %v10676_v49, %v10675_v62  ;;  %5656 = vst [vmem:[%s10058_s19 + $0x20] sm:$0xff] %v5592_v22  ;;  %5657 = vst [vmem:[%s10058_s19 + $0x28] sm:$0xff] %v5593_v51  ;;  %v10677_v26 = vld [vmem:[#allocation16_spill] sm:$0xff]  ;;  %v10679_v6 = vld [vmem:[#allocation17_spill] sm:$0xff] }
 0x733   : > { %5658 = vst [vmem:[%s10058_s19 + $0x30] sm:$0xff] %v5594_v21  ;;  %5659 = vst [vmem:[%s10058_s19 + $0x38] sm:$0xff] %v5595_v55  ;;  %v5604_v63 = vadd.f32 %v10678_v32, %v10677_v26  ;;  %v10680_v61 = vld [vmem:[#allocation74_spill] sm:$0xff]  ;;  %v10681_v24 = vld [vmem:[#allocation43_spill] sm:$0xff] }
 0x734   : > { %v5605_v38 = vadd.f32 %v10680_v61, %v10679_v6  ;;  %v10682_v27 = vld [vmem:[#allocation75_spill] sm:$0xff]  ;;  %v10683_v8 = vld [vmem:[#allocation44_spill] sm:$0xff]  ;;  %5660 = vst [vmem:[%s10058_s19 + $0x40] sm:$0xff] %v5596_v59  ;;  %5661 = vst [vmem:[%s10058_s19 + $0x48] sm:$0xff] %v5597_v31 }
 0x735   : > { %v5606_v15 = vadd.f32 %v10682_v27, %v10681_v24  ;;  %v10684_v42 = vld [vmem:[#allocation12_spill] sm:$0xff]  ;;  %5662 = vst [vmem:[%s10058_s19 + $0x50] sm:$0xff] %v5598_v10  ;;  %5663 = vst [vmem:[%s10058_s19 + $0x58] sm:$0xff] %v5599_v48  ;;  %v10685_v22 = vld [vmem:[#allocation18_spill] sm:$0xff] }
 0x736   : > { %v5607_v57 = vadd.f32 %v10684_v42, %v10683_v8  ;;  %v10686_v51 = vld [vmem:[#allocation13_spill] sm:$0xff]  ;;  %v10687_v55 = vld [vmem:[#allocation19_spill] sm:$0xff]  ;;  %v10688_v19 = vld [vmem:[#allocation46_spill] sm:$0xff]  ;;  %5664 = vst [vmem:[%s10058_s19 + $0x60] sm:$0xff] %v5600_v39 }
 0x737   : > { %v5608_v21 = vadd.f32 %v10686_v51, %v10685_v22  ;;  %v5609_v25 = vadd.f32 %v10688_v19, %v10687_v55  ;;  %v10689_v1 = vld [vmem:[#allocation45_spill] sm:$0xff]  ;;  %v10690_v47 = vld [vmem:[#allocation76_spill] sm:$0xff]  ;;  %v10691_v44 = vld [vmem:[#allocation47_spill] sm:$0xff]  ;;  %5665 = vst [vmem:[%s10058_s19 + $0x68] sm:$0xff] %v5601_v28 }
 0x738   : > { %v5610_v46 = vadd.f32 %v10690_v47, %v10689_v1  ;;  %v10692_v62 = vld [vmem:[#allocation77_spill] sm:$0xff]  ;;  %5666 = vst [vmem:[%s10058_s19 + $0x70] sm:$0xff] %v5602_v33  ;;  %5667 = vst [vmem:[%s10058_s19 + $0x78] sm:$0xff] %v5603_v34  ;;  %v10693_v59 = vld [vmem:[#allocation20_spill] sm:$0xff] }
 0x739   : > { %v5611_v49 = vadd.f32 %v10692_v62, %v10691_v44  ;;  %v10694_v31 = vld [vmem:[#allocation79_spill] sm:$0xff]  ;;  %v10695_v48 = vld [vmem:[#allocation21_spill] sm:$0xff]  ;;  %v10696_v26 = vld [vmem:[#allocation78_spill] sm:$0xff]  ;;  %5668 = vst [vmem:[%s10058_s19 + $0x80] sm:$0xff] %v5604_v63 }
 0x73a   : > { %v5612_v10 = vadd.f32 %v10694_v31, %v10693_v59  ;;  %v5613_v32 = vadd.f32 %v10696_v26, %v10695_v48  ;;  %v10697_v6 = vld [vmem:[#allocation48_spill] sm:$0xff]  ;;  %v10698_v24 = vld [vmem:[#allocation49_spill] sm:$0xff]  ;;  %5669 = vst [vmem:[%s10058_s19 + $0x88] sm:$0xff] %v5605_v38  ;;  %5670 = vst [vmem:[%s10058_s19 + $0x90] sm:$0xff] %v5606_v15 }
 0x73b   : > { %v5614_v61 = vadd.f32 %v9886_v20, %v10697_v6  ;;  %v5615_v27 = vadd.f32 %v9889_v29, %v10698_v24  ;;  %5671 = vst [vmem:[%s10058_s19 + $0x98] sm:$0xff] %v5607_v57  ;;  %v10699_v39 = vld [vmem:[#allocation22_spill] sm:$0xff]  ;;  %v10700_v33 = vld [vmem:[#allocation23_spill] sm:$0xff]  ;;  %5672 = vst [vmem:[%s10058_s19 + $0xa0] sm:$0xff] %v5608_v21 }
 0x73c   : > { %v5616_v28 = vadd.f32 %v9892_v54, %v10699_v39  ;;  %v5617_v34 = vadd.f32 %v9895_v16, %v10700_v33  ;;  %v10701_v8 = vld [vmem:[#allocation50_spill] sm:$0xff]  ;;  %v10702_v42 = vld [vmem:[#allocation51_spill] sm:$0xff]  ;;  %5673 = vst [vmem:[%s10058_s19 + $0xa8] sm:$0xff] %v5609_v25  ;;  %5674 = vst [vmem:[%s10058_s19 + $0xb0] sm:$0xff] %v5610_v46 }
 0x73d   : > { %v5618_v20 = vadd.f32 %v9898_v9, %v10701_v8  ;;  %v5619_v29 = vadd.f32 %v9901_v3, %v10702_v42  ;;  %5675 = vst [vmem:[%s10058_s19 + $0xb8] sm:$0xff] %v5611_v49  ;;  %v10703_v63 = vld [vmem:[#allocation24_spill] sm:$0xff]  ;;  %v10704_v38 = vld [vmem:[#allocation25_spill] sm:$0xff]  ;;  %5676 = vst [vmem:[%s10058_s19 + $0xc0] sm:$0xff] %v5612_v10 }
 0x73e   : > { %v5620_v54 = vadd.f32 %v9905_v12, %v10703_v63  ;;  %v5621_v16 = vadd.f32 %v9909_v13, %v10704_v38  ;;  %v10705_v15 = vld [vmem:[#allocation52_spill] sm:$0xff]  ;;  %v10706_v57 = vld [vmem:[#allocation53_spill] sm:$0xff]  ;;  %5677 = vst [vmem:[%s10058_s19 + $0xc8] sm:$0xff] %v5613_v32  ;;  %5678 = vst [vmem:[%s10058_s19 + $0xd0] sm:$0xff] %v5614_v61 }
 0x73f   : > { %v5622_v9 = vadd.f32 %v9913_v30, %v10705_v15  ;;  %v5623_v3 = vadd.f32 %v9917_v2, %v10706_v57  ;;  %5679 = vst [vmem:[%s10058_s19 + $0xd8] sm:$0xff] %v5615_v27  ;;  %v10707_v22 = vld [vmem:[#allocation26_spill] sm:$0xff]  ;;  %v10708_v51 = vld [vmem:[#allocation27_spill] sm:$0xff]  ;;  %5680 = vst [vmem:[%s10058_s19 + $0xe0] sm:$0xff] %v5616_v28 }
 0x740   : > { %v5624_v12 = vadd.f32 %v9922_v41, %v10707_v22  ;;  %v5625_v13 = vadd.f32 %v9926_v4, %v10708_v51  ;;  %v10709_v21 = vld [vmem:[#allocation54_spill] sm:$0xff]  ;;  %v10710_v55 = vld [vmem:[#allocation55_spill] sm:$0xff]  ;;  %5681 = vst [vmem:[%s10058_s19 + $0xe8] sm:$0xff] %v5617_v34  ;;  %5682 = vst [vmem:[%s10058_s19 + $0xf0] sm:$0xff] %v5618_v20 }
 0x741   : > { %v5626_v30 = vadd.f32 %v9930_v18, %v10709_v21  ;;  %v5627_v2 = vadd.f32 %v9934_v37, %v10710_v55  ;;  %5683 = vst [vmem:[%s10058_s19 + $0xf8] sm:$0xff] %v5619_v29  ;;  %v10711_v19 = vld [vmem:[#allocation28_spill] sm:$0xff]  ;;  %v10712_v25 = vld [vmem:[#allocation29_spill] sm:$0xff]  ;;  %5684 = vst [vmem:[%s10058_s19 + $0x100] sm:$0xff] %v5620_v54 }
 0x742   : > { %v5628_v41 = vadd.f32 %v9938_v60, %v10711_v19  ;;  %v5629_v4 = vadd.f32 %v9942_v43, %v10712_v25  ;;  %v10713_v1 = vld [vmem:[#allocation56_spill] sm:$0xff]  ;;  %v10714_v37 = vld [vmem:[#allocation57_spill] sm:$0xff]  ;;  %5685 = vst [vmem:[%s10058_s19 + $0x108] sm:$0xff] %v5621_v16  ;;  %5686 = vst [vmem:[%s10058_s19 + $0x110] sm:$0xff] %v5622_v9 }
 0x743   : > { %v5630_v18 = vadd.f32 %v9946_v11, %v10713_v1  ;;  %v5631_v47 = vadd.f32 %v9950_v0, %v10714_v37  ;;  %5687 = vst [vmem:[%s10058_s19 + $0x118] sm:$0xff] %v5623_v3  ;;  %v10715_v46 = vld [vmem:[#allocation30_spill] sm:$0xff]  ;;  %v10716_v44 = vld [vmem:[#allocation31_spill] sm:$0xff]  ;;  %v10718_v49 = vld [vmem:[#allocation80_spill] sm:$0xff] }
 0x744   : > { %v5632_v60 = vadd.f32 %v9954_v14, %v10715_v46  ;;  %v5633_v43 = vadd.f32 %v9958_v50, %v10716_v44  ;;  %v10717_v62 = vld [vmem:[#allocation58_spill] sm:$0xff]  ;;  %v10719_v59 = vld [vmem:[#allocation59_spill] sm:$0xff]  ;;  %5688 = vst [vmem:[%s10058_s19 + $0x120] sm:$0xff] %v5624_v12  ;;  %5689 = vst [vmem:[%s10058_s19 + $0x128] sm:$0xff] %v5625_v13 }
 0x745   : > { %v5634_v11 = vadd.f32 %v10718_v49, %v10717_v62  ;;  %v5635_v0 = vadd.f32 %v9966_v36, %v10719_v59  ;;  %5690 = vst [vmem:[%s10058_s19 + $0x130] sm:$0xff] %v5626_v30  ;;  %5691 = vst [vmem:[%s10058_s19 + $0x138] sm:$0xff] %v5627_v2  ;;  %v10720_v14 = vld [vmem:[#allocation32_spill] sm:$0xff]  ;;  %v10721_v31 = vld [vmem:[#allocation33_spill] sm:$0xff] }
 0x746   : > { %v5636_v50 = vadd.f32 %v9972_v5, %v10720_v14  ;;  %v5637_v10 = vadd.f32 %v9976_v23, %v10721_v31  ;;  %v10722_v48 = vld [vmem:[#allocation60_spill] sm:$0xff]  ;;  %v10723_v36 = vld [vmem:[#allocation61_spill] sm:$0xff]  ;;  %5692 = vst [vmem:[%s10058_s19 + $0x140] sm:$0xff] %v5628_v41  ;;  %5693 = vst [vmem:[%s10058_s19 + $0x148] sm:$0xff] %v5629_v4 }
 0x747   : > { %v5638_v26 = vadd.f32 %v9980_v56, %v10722_v48  ;;  %v5639_v32 = vadd.f32 %v9984_v58, %v10723_v36  ;;  %5694 = vst [vmem:[%s10058_s19 + $0x150] sm:$0xff] %v5630_v18  ;;  %5695 = vst [vmem:[%s10058_s19 + $0x158] sm:$0xff] %v5631_v47  ;;  %v10724_v6 = vld [vmem:[#allocation34_spill] sm:$0xff]  ;;  %v10725_v61 = vld [vmem:[#allocation35_spill] sm:$0xff] }
 0x748   : > { %v5640_v5 = vadd.f32 %v9988_v7, %v10724_v6  ;;  %v5641_v23 = vadd.f32 %v9992_v40, %v10725_v61  ;;  %v10726_v24 = vld [vmem:[#allocation62_spill] sm:$0xff]  ;;  %v10727_v27 = vld [vmem:[#allocation81_spill] sm:$0xff]  ;;  %v10728_v39 = vld [vmem:[#allocation63_spill] sm:$0xff]  ;;  %5696 = vst [vmem:[%s10058_s19 + $0x160] sm:$0xff] %v5632_v60 }
 0x749   : > { %v5642_v56 = vadd.f32 %v10727_v27, %v10726_v24  ;;  %v10729_v28 = vld [vmem:[#allocation83_spill] sm:$0xff]  ;;  %5697 = vst [vmem:[%s10058_s19 + $0x168] sm:$0xff] %v5633_v43  ;;  %5698 = vst [vmem:[%s10058_s19 + $0x170] sm:$0xff] %v5634_v11  ;;  %v10730_v33 = vld [vmem:[#allocation36_spill] sm:$0xff] }
 0x74a   : > { %v5643_v58 = vadd.f32 %v10729_v28, %v10728_v39  ;;  %5699 = vst [vmem:[%s10058_s19 + $0x178] sm:$0xff] %v5635_v0  ;;  %v10731_v34 = vld [vmem:[#allocation82_spill] sm:$0xff]  ;;  %v10732_v20 = vld [vmem:[#allocation37_spill] sm:$0xff]  ;;  %v10733_v7 = vld [vmem:[#allocation84_spill] sm:$0xff] }
 0x74b   : > { %v5644_v8 = vadd.f32 %v10731_v34, %v10730_v33  ;;  %v5645_v42 = vadd.f32 %v10733_v7, %v10732_v20  ;;  %v10734_v40 = vld [vmem:[#allocation64_spill] sm:$0xff]  ;;  %v10735_v63 = vld [vmem:[#allocation65_spill] sm:$0xff]  ;;  %5700 = vst [vmem:[%s10058_s19 + $0x180] sm:$0xff] %v5636_v50  ;;  %5701 = vst [vmem:[%s10058_s19 + $0x188] sm:$0xff] %v5637_v10 }
 0x74c   : > { %v5646_v29 = vadd.f32 %v10012_v53, %v10734_v40  ;;  %v10736_v54 = vld [vmem:[#allocation85_spill] sm:$0xff]  ;;  %5702 = vst [vmem:[%s10058_s19 + $0x190] sm:$0xff] %v5638_v26  ;;  %5703 = vst [vmem:[%s10058_s19 + $0x198] sm:$0xff] %v5639_v32  ;;  %v10737_v53 = vld [vmem:[#allocation38_spill] sm:$0xff] }
 0x74d   : > { %v5647_v38 = vadd.f32 %v10736_v54, %v10735_v63  ;;  %v5648_v16 = vadd.f32 %v10020_v45, %v10737_v53  ;;  %v10738_v15 = vld [vmem:[#allocation39_spill] sm:$0xff]  ;;  %v10739_v57 = vld [vmem:[#allocation66_spill] sm:$0xff]  ;;  %5704 = vst [vmem:[%s10058_s19 + $0x1a0] sm:$0xff] %v5640_v5  ;;  %5705 = vst [vmem:[%s10058_s19 + $0x1a8] sm:$0xff] %v5641_v23 }
 0x74e   : > { %v5649_v9 = vadd.f32 %v10024_v52, %v10738_v15  ;;  %v5650_v3 = vadd.f32 %v10028_v17, %v10739_v57  ;;  %v10740_v22 = vld [vmem:[#allocation67_spill] sm:$0xff]  ;;  %5706 = vst [vmem:[%s10058_s19 + $0x1b0] sm:$0xff] %v5642_v56  ;;  %5707 = vst [vmem:[%s10058_s19 + $0x1b8] sm:$0xff] %v5643_v58 }
 0x74f   : > { %v5651_v12 = vadd.f32 %v10032_v35, %v10740_v22  ;;  %5708 = vst [vmem:[%s10058_s19 + $0x1c0] sm:$0xff] %v5644_v8  ;;  %5709 = vst [vmem:[%s10058_s19 + $0x1c8] sm:$0xff] %v5645_v42 }
 0x750   : > { %5710 = vst [vmem:[%s10058_s19 + $0x1d0] sm:$0xff] %v5646_v29  ;;  %5711 = vst [vmem:[%s10058_s19 + $0x1d8] sm:$0xff] %v5647_v38 }
 0x751   : > { %5712 = vst [vmem:[%s10058_s19 + $0x1e0] sm:$0xff] %v5648_v16  ;;  %5713 = vst [vmem:[%s10058_s19 + $0x1e8] sm:$0xff] %v5649_v9 }
 0x752   : > { %5714 = vst [vmem:[%s10058_s19 + $0x1f0] sm:$0xff] %v5650_v3  ;;  %5715 = vst [vmem:[%s10058_s19 + $0x1f8] sm:$0xff] %v5651_v12 }
 0x753   : > { %6942 = shalt.err (!%p6939_p3)
}
 0x754   : > { %s6943_s22 = scalar_lea.hbm %s10213_s27, 8192  ;;  %s6947_s0 = scalar_lea.hbm %s10298_s18, 32768 }
 0x755   : > { %p6944_p4 = scmp.ne.s32.totalorder %s10213_s27, %s6943_s22  ;;  %p6948_p9 = scmp.lt.u32.totalorder %s10213_s27, %s10298_s18 }
 0x756   : > { %p6949_p10 = scmp.lt.u32.totalorder %s6947_s0, %s6943_s22  ;;  %p6951_p12 = scmp.lt.u32.totalorder %s6943_s22, %s10213_s27 }
 0x757   : > { %p6945_p7 = pnand %p6944_p4, %p7131_p5 }
 0x758   : > { %p6950_p11 = por %p6949_p10, %p6948_p9 }
 0x759   : > { %p6946_p8 = pneg %p6945_p7 }
 0x75a   : > { %p6952_p13 = por %p6951_p12, %p6950_p11 }
 0x75c   : > { %p6953_p0 = pnand %p6952_p13, %p6946_p8 }
 0x75e   : > { %6956 = shalt.err (!%p6953_p0)
}
 0x75f   : > { %s6996_s29 = smov 512   ;;  %s6997_s1 = smov 32  }
 0x760   : > { %6538 = dma.vmem_to_hbm [thread:$0]  (%p7131_p5), %s10215_s30, 8192, %s10213_s27, %s10239_s25, %s6996_s29, %s6996_s29, %s6997_s1  }
 0x761 PF: > { %s10741_s21 = sld [smem:[#allocation8_spill]]  ;;  %s10742_s19 = sld [smem:[#allocation6_spill]] }
 0x767   : > { %p6544_p1 = scmp.ge.s32.totalorder %s10741_s21, 2  ;;  %s5746_s3 = sand.u32 1, %s10742_s19  }
 0x768   : > { %s5747_s22 = scalar_lea.sflag [#allocation4], %s5746_s3 }
 0x769   : > { %p6541_p2 = pnand %p6544_p1, %p7135_p6 }
 0x76b   : > { %6974 = dma.done.wait (!%p6541_p2), %s5747_s22, 8192  }
 0x76c   : > { %6976 = vsyncadd (!%p6541_p2), %s5747_s22, 4294959104  ;;  %s10744_s30 = sld [smem:[#allocation9_spill]]  ;;  %s10745_s0 = sld [smem:[#allocation7_spill]] }
 0x76d   : > { %s10746_s29 = sld [smem:[#allocation10_spill]]  ;;  %s10747_s27 = smov %s6983_s28 }
 0x772   : > { %p28_p3 = scmp.ge.s32.totalorder %s10744_s30, 6   ;;  %s10748_s28 = smov %s10745_s0 }
 0x774   :  { %30 = sbr.rel (!%p28_p3) target bundleno = 8 (0x8), region = 135 }
 0x77b   :  { %5752 = vsyncpa [#allocation4], 1 }
 0x77c   :  { %5754 = vsyncpa [#allocation4 + $0x1], 1 }

</bundles_post_ra>
